<compile_context>
chip_gen: v6e
topology: v6e:2x2x1
jax: 0.10.0
libtpu: 0.0.40
codegen_flags: <defaults>
</compile_context>

<pallas_src>
import functools

import jax
import jax.numpy as jnp
from jax import lax
from jax.experimental import pallas as pl
from jax.experimental.pallas import tpu as pltpu


# Budget tiles against the smallest VMEM (v7x: 64 MiB physical / 32 MiB scoped).
_VMEM_LIMIT = 32 * 1024 * 1024


# ----------------------------------------------------------------------------
# Fused linear kernel:  out = act_out( act_in(norm(x)) @ w + b ) + residual
# Tiled over M and N ("parallel" grid axes); K kept whole per block.
# ----------------------------------------------------------------------------
def fused_linear(x, w, b=None, *, residual=None, pre_rms=False, rms_eps=1e-6,
                 ln=None, ln_eps=1e-5, act_in=None, act_out=None,
                 block_m=256, block_n=512):
    M, K = x.shape
    Kw, N = w.shape
    assert K == Kw
    has_bias = b is not None
    has_res = residual is not None
    has_ln = ln is not None

    # Full-dim blocks are always legal; tiled blocks are multiples of (8, 128).
    tm = M if M <= block_m else block_m
    tn = N if N <= block_n else block_n
    grid = (pl.cdiv(M, tm), pl.cdiv(N, tn))

    def kernel(*refs):
        it = iter(refs)
        x_ref = next(it)
        w_ref = next(it)
        g_ref = next(it) if has_ln else None
        be_ref = next(it) if has_ln else None
        b_ref = next(it) if has_bias else None
        r_ref = next(it) if has_res else None
        o_ref = next(it)

        xv = x_ref[...]
        if pre_rms:
            # TODO(synk): FastSimpleRMSNorm's exact eps not in the reference; 1e-6 assumed.
            ms = jnp.mean(xv * xv, axis=-1, keepdims=True)
            xv = xv * lax.rsqrt(ms + rms_eps)
        if has_ln:
            mu = jnp.mean(xv, axis=-1, keepdims=True)
            xc = xv - mu
            var = jnp.mean(xc * xc, axis=-1, keepdims=True)
            xv = xc * lax.rsqrt(var + ln_eps) * g_ref[...] + be_ref[...]
        if act_in is not None:
            xv = act_in(xv)
        y = jnp.dot(xv, w_ref[...], preferred_element_type=jnp.float32)
        if has_bias:
            y = y + b_ref[...]
        if act_out is not None:
            y = act_out(y)
        if has_res:
            y = y + r_ref[...]
        o_ref[...] = y.astype(o_ref.dtype)

    inputs = [x, w]
    in_specs = [pl.BlockSpec((tm, K), lambda i, j: (i, 0)),
                pl.BlockSpec((K, tn), lambda i, j: (0, j))]
    if has_ln:
        gamma, beta = ln
        inputs += [gamma.reshape(1, K), beta.reshape(1, K)]
        in_specs += [pl.BlockSpec((1, K), lambda i, j: (0, 0)),
                     pl.BlockSpec((1, K), lambda i, j: (0, 0))]
    if has_bias:
        inputs.append(b.reshape(1, N))
        in_specs.append(pl.BlockSpec((1, tn), lambda i, j: (0, j)))
    if has_res:
        inputs.append(residual)
        in_specs.append(pl.BlockSpec((tm, tn), lambda i, j: (i, j)))

    return pl.pallas_call(
        kernel,
        out_shape=jax.ShapeDtypeStruct((M, N), x.dtype),
        grid=grid,
        in_specs=in_specs,
        out_specs=pl.BlockSpec((tm, tn), lambda i, j: (i, j)),
        compiler_params=pltpu.CompilerParams(
            dimension_semantics=("parallel", "parallel"),
            vmem_limit_bytes=_VMEM_LIMIT),
    )(*inputs)


# ----------------------------------------------------------------------------
# HGRN2 gated-linear-attention recurrence (fla fused_recurrent_gla semantics).
# Layout: q, f, v, o are (L, er, B*H)  (batch*heads on the lane axis).
# lb is (er, B*H).  State S is (er_k, er_v, B*H), carried through the scan:
#     g      = lb + (1 - lb) * sigmoid(f_t)
#     k_t    = 1 - g
#     decay  = g + 1e-6                      (== exp(log(g + 1e-6)) in reference)
#     S      = decay[:,None,:] * S + k_t[:,None,:] * v_t[None,:,:]
#     o_t    = sum_k q_t[:,None,:] * S       (q already GELU'd and pre-scaled)
# ----------------------------------------------------------------------------
def _make_gla_kernel(unroll_limit=64):
    def kernel(lb_ref, q_ref, f_ref, v_ref, o_ref):
        L, er, tbh = q_ref.shape
        lb = lb_ref[...]                               # (er, tbh)
        S0 = jnp.zeros((er, er, tbh), jnp.float32)

        if L <= unroll_limit:
            # Gate math is state-independent: compute it vectorized over the
            # whole time axis (fills vregs instead of per-step (er, tbh)
            # slivers); the serial chain through the unrolled loop is then
            # only the multiply-adds of the state update.
            g = lb[None] + (1.0 - lb)[None] * jax.nn.sigmoid(f_ref[...])
            decay = g + 1e-6
            kt = 1.0 - g
            S = S0
            for t in range(L):
                S = decay[t][:, None, :] * S + kt[t][:, None, :] * v_ref[t][None, :, :]
                o_ref[t] = jnp.sum(q_ref[t][:, None, :] * S, axis=0).astype(o_ref.dtype)
        else:
            one_m_lb = 1.0 - lb                        # hoisted out of the time loop

            def step(t, S):
                g = lb + one_m_lb * jax.nn.sigmoid(f_ref[t])
                k_t = 1.0 - g
                S = (g + 1e-6)[:, None, :] * S + k_t[:, None, :] * v_ref[t][None, :, :]
                o = jnp.sum(q_ref[t][:, None, :] * S, axis=0)   # (er_v, tbh)
                o_ref[t] = o.astype(o_ref.dtype)
                return S

            lax.fori_loop(0, L, step, S0)
    return kernel


def gla_pallas(lb_bh, q, f, v, *, block_bh=512):
    """lb_bh: (er, B*H); q, f, v: (L, er, B*H).  Returns o: (L, er, B*H)."""
    L, er, BH = q.shape
    tbh = BH if BH <= block_bh else block_bh
    grid = (pl.cdiv(BH, tbh),)                 # batch*head tiles are independent
    seq_spec = pl.BlockSpec((L, er, tbh), lambda i: (0, 0, i))
    return pl.pallas_call(
        _make_gla_kernel(),
        out_shape=jax.ShapeDtypeStruct((L, er, BH), q.dtype),
        grid=grid,
        in_specs=[pl.BlockSpec((er, tbh), lambda i: (0, i)),
                  seq_spec, seq_spec, seq_spec],
        out_specs=seq_spec,
        compiler_params=pltpu.CompilerParams(
            dimension_semantics=("parallel",),
            vmem_limit_bytes=_VMEM_LIMIT),
    )(lb_bh, q, f, v)


# ----------------------------------------------------------------------------
# Plain-JAX glue
# ----------------------------------------------------------------------------
def _gelu_exact(x):
    # TODO(synk): exact-erf GELU kept in XLA glue (lax.erf has no reliable Pallas/
    # Mosaic lowering); fusing it in-kernel would require the tanh approximation.
    return jax.nn.gelu(x, approximate=False)


def _torch_pad(x, pad):
    """F.pad(x, pad) with pad = (W_left, W_right, H_top, H_bottom), NCHW input."""
    wl, wr, ht, hb = pad
    x = jnp.pad(x, ((0, 0), (0, 0),
                    (max(ht, 0), max(hb, 0)),
                    (max(wl, 0), max(wr, 0))))
    Hc, Wc = x.shape[2], x.shape[3]
    hs, he = -min(ht, 0), Hc + min(hb, 0)
    ws, we = -min(wl, 0), Wc + min(wr, 0)
    return x[:, :, hs:he, ws:we]


def spt_patchify(img, patch_size):
    """Shifted-Patch-Tokenization rearrange: (B,C,H,W) -> (B, n, p*p*5C)."""
    shifts = ((1, -1, 0, 0), (-1, 1, 0, 0), (0, 0, 1, -1), (0, 0, -1, 1))
    parts = [img] + [_torch_pad(img, s) for s in shifts]
    xc = jnp.concatenate(parts, axis=1)                       # (B, 5C, H, W)
    B, C5, H, W = xc.shape
    p = patch_size
    h, w = H // p, W // p
    x = xc.reshape(B, C5, h, p, w, p)
    x = x.transpose(0, 2, 4, 3, 5, 1)                          # b h w p1 p2 c
    return x.reshape(B, h * w, p * p * C5)


def forward(params, img, cfg):
    dim = cfg["dim"]
    nh, er = cfg["num_heads"], cfg["expand_ratio"]
    depth = cfg["depth"]
    p = cfg["patch_size"]
    fd = nh * er
    B = img.shape[0]
    scale = float(er) ** -0.5                  # fla fused_recurrent_gla default scale

    # --- SPT patch embedding (LayerNorm + Linear fused into one kernel) ---
    tok = spt_patchify(img, p)                 # (B, n, patch_dim)
    n, patch_dim = tok.shape[1], tok.shape[2]
    tok = jnp.transpose(tok, (1, 0, 2))        # token-major layout (n, B, patch_dim)
    x = fused_linear(tok.reshape(n * B, patch_dim), params["spt_w"], params["spt_b"],
                     ln=(params["spt_ln_g"], params["spt_ln_b"]))
    x = x.reshape(n, B, dim)

    # --- cls token (appended at the END) + positional embedding ---
    cls = jnp.broadcast_to(params["cls_token"].reshape(1, 1, dim), (1, B, dim))
    x = jnp.concatenate([x, cls], axis=0)      # (L, B, dim)
    L = n + 1
    pos = params["pos_embedding"][0, :L]       # (L, dim)
    x = x + pos[:, None, :]

    # --- lower bounds (tiny (depth, lb_dim) table) ---
    lb = jax.nn.softmax(params["lower_bounds"], axis=0)
    lb = jnp.cumsum(lb, axis=0)
    lb = lb - lb[0:1]

    x2d = x.reshape(L * B, dim)
    for idx in range(depth):
        lp = params["layers"][idx]
        lb_h = lb[idx].reshape(nh, er)                               # (H, er)
        lb_bh = jnp.broadcast_to(lb_h.T[:, None, :], (er, B, nh)).reshape(er, B * nh)

        # --- HGRN2 attention block ---
        # RMSNorm + fused Q|F|I projection in ONE kernel (one read of x, N=3*fd).
        qfi = fused_linear(x2d, lp["Wqfi"], pre_rms=True)            # (L*B, 3fd)
        q_raw, f, i_ = qfi[:, :fd], qfi[:, fd:2 * fd], qfi[:, 2 * fd:]
        q = _gelu_exact(q_raw) * scale          # GELU + fla scale folded off the scan path

        def to_lkb(a):                          # (L*B, fd) -> (L, er, B*H), no HBM transpose of x
            return a.reshape(L, B, nh, er).transpose(0, 3, 1, 2).reshape(L, er, B * nh)

        o = gla_pallas(lb_bh, to_lkb(q), to_lkb(f), to_lkb(i_))      # (L, er, B*H)
        o = o.reshape(L, er, B, nh).transpose(0, 2, 3, 1).reshape(L * B, fd)
        # o_proj(tanh(o)) + residual, fused in one kernel.
        x2d = fused_linear(o, lp["Wo"], act_in=jnp.tanh, residual=x2d)

        # --- FeedForward block (RMSNorm fused into W1, residual fused into W2) ---
        h = fused_linear(x2d, lp["W1"], lp["b1"], pre_rms=True)
        h = _gelu_exact(h)
        x2d = fused_linear(h, lp["W2"], lp["b2"], residual=x2d)

    # --- final norm + cls pooling + mlp head ---
    assert cfg.get("pool", "cls") == "cls"      # TODO(synk): mean-pool path not implemented
    x = x2d.reshape(L, B, dim)
    x_cls = x[L - 1]                            # cls token is the LAST position
    # Final weightless RMSNorm is row-wise, so applying it to the pooled row only
    # is identical to norm-then-pool; it is fused with the head LayerNorm+Linear.
    logits = fused_linear(x_cls, params["head_w"], params["head_b"],
                          pre_rms=True,
                          ln=(params["head_ln_g"], params["head_ln_b"]))
    return logits


# ----------------------------------------------------------------------------
# Deterministic parameter init (shapes match the module's __init__)
# ----------------------------------------------------------------------------
def init_params(key, cfg):
    dim, depth = cfg["dim"], cfg["depth"]
    nh, er, mlp = cfg["num_heads"], cfg["expand_ratio"], cfg["mlp_dim"]
    p, C, nc = cfg["patch_size"], cfg["channels"], cfg["num_classes"]
    fd = nh * er
    patch_dim = p * p * 5 * C
    n_patches = (cfg["image_size"] // p) ** 2

    keys = iter(jax.random.split(key, 64))

    def lin(fan_in, fan_out):
        return jax.random.normal(next(keys), (fan_in, fan_out), jnp.float32) / jnp.sqrt(
            jnp.float32(fan_in))

    params = {
        "spt_ln_g": jnp.ones((patch_dim,), jnp.float32),
        "spt_ln_b": jnp.zeros((patch_dim,), jnp.float32),
        "spt_w": lin(patch_dim, dim),
        "spt_b": jnp.zeros((dim,), jnp.float32),
        "pos_embedding": jax.random.normal(next(keys), (1, n_patches + 1, dim), jnp.float32),
        "cls_token": jax.random.normal(next(keys), (1, 1, dim), jnp.float32),
        "lower_bounds": jnp.ones((depth, fd), jnp.float32),
        "head_ln_g": jnp.ones((dim,), jnp.float32),
        "head_ln_b": jnp.zeros((dim,), jnp.float32),
        "head_w": lin(dim, nc),
        "head_b": jnp.zeros((nc,), jnp.float32),
        "layers": [],
    }
    for _ in range(depth):
        wq, wf, wi = lin(dim, fd), lin(dim, fd), lin(dim, fd)
        params["layers"].append({
            "Wqfi": jnp.concatenate([wq, wf, wi], axis=1),   # fused q|f|i projection
            "Wo": lin(fd, dim),
            "W1": lin(dim, mlp),
            "b1": jnp.zeros((mlp,), jnp.float32),
            "W2": lin(mlp, dim),
            "b2": jnp.zeros((dim,), jnp.float32),
        })
    return params


# ----------------------------------------------------------------------------
if __name__ == "__main__":
    cfg = dict(image_size=16, patch_size=4, num_classes=10, dim=32, depth=2,
               num_heads=8, expand_ratio=2, mlp_dim=64, channels=3, pool="cls")

    img = jax.random.normal(jax.random.PRNGKey(0),
                            (2, cfg["channels"], cfg["image_size"], cfg["image_size"]),
                            jnp.float32)
    params = init_params(jax.random.PRNGKey(42), cfg)

    fwd = jax.jit(functools.partial(forward, cfg=cfg))
    logits = fwd(params, img)
    jax.block_until_ready(logits)
    assert logits.shape == (2, cfg["num_classes"])
    assert bool(jnp.all(jnp.isfinite(logits)))
    print("KERNEL_OK")
</pallas_src>

<mosaic_0001>
module attributes {stable_mosaic.version = 11 : i64} {
  func.func @kernel(%arg0: i32, %arg1: i32, %arg2: memref<32x240xf32, #tpu.memory_space<vmem>>, %arg3: memref<240x32xf32, #tpu.memory_space<vmem>>, %arg4: memref<1x240xf32, #tpu.memory_space<vmem>>, %arg5: memref<1x240xf32, #tpu.memory_space<vmem>>, %arg6: memref<1x32xf32, #tpu.memory_space<vmem>>, %arg7: memref<32x32xf32, #tpu.memory_space<vmem>>) attributes {dimension_semantics = [#tpu.dimension_semantics<parallel>, #tpu.dimension_semantics<parallel>], iteration_bounds = array<i64: 1, 1>, scalar_prefetch = 0 : i64, scratch_operands = 0 : i64, tpu.core_type = #tpu.core_type<tc>, window_params = [{transform_indices = @transform_0, window_bounds = array<i64: 32, 240>}, {transform_indices = @transform_1, window_bounds = array<i64: 240, 32>}, {pipeline_mode = #tpu.pipeline_mode<synchronous>, transform_indices = @transform_2, window_bounds = array<i64: 1, 240>}, {pipeline_mode = #tpu.pipeline_mode<synchronous>, transform_indices = @transform_3, window_bounds = array<i64: 1, 240>}, {transform_indices = @transform_4, window_bounds = array<i64: 1, 32>}, {transform_indices = @transform_5, window_bounds = array<i64: 32, 32>}]} {
    %c0 = arith.constant 0 : index
    %c0_0 = arith.constant 0 : index
    %0 = vector.load %arg2[%c0, %c0_0] : memref<32x240xf32, #tpu.memory_space<vmem>>, vector<32x240xf32>
    %cst = arith.constant dense<0.000000e+00> : vector<32xf32>
    %1 = vector.multi_reduction <add>, %0, %cst [1] : vector<32x240xf32> to vector<32xf32>
    %2 = vector.shape_cast %1 : vector<32xf32> to vector<32x1xf32>
    %cst_1 = arith.constant 2.400000e+02 : f32
    %3 = vector.broadcast %cst_1 : f32 to vector<32x1xf32>
    %4 = arith.divf %2, %3 : vector<32x1xf32>
    %5 = vector.broadcast %4 : vector<32x1xf32> to vector<32x240xf32>
    %6 = arith.subf %0, %5 : vector<32x240xf32>
    %7 = arith.mulf %6, %6 : vector<32x240xf32>
    %cst_2 = arith.constant dense<0.000000e+00> : vector<32xf32>
    %8 = vector.multi_reduction <add>, %7, %cst_2 [1] : vector<32x240xf32> to vector<32xf32>
    %9 = vector.shape_cast %8 : vector<32xf32> to vector<32x1xf32>
    %cst_3 = arith.constant 2.400000e+02 : f32
    %10 = vector.broadcast %cst_3 : f32 to vector<32x1xf32>
    %11 = arith.divf %9, %10 : vector<32x1xf32>
    %cst_4 = arith.constant 9.99999974E-6 : f32
    %12 = vector.broadcast %cst_4 : f32 to vector<32x1xf32>
    %13 = arith.addf %11, %12 : vector<32x1xf32>
    %14 = math.rsqrt %13 : vector<32x1xf32>
    %15 = vector.broadcast %14 : vector<32x1xf32> to vector<32x240xf32>
    %16 = arith.mulf %6, %15 : vector<32x240xf32>
    %c0_5 = arith.constant 0 : index
    %c0_6 = arith.constant 0 : index
    %17 = vector.load %arg4[%c0_5, %c0_6] : memref<1x240xf32, #tpu.memory_space<vmem>>, vector<1x240xf32>
    %18 = vector.broadcast %17 : vector<1x240xf32> to vector<32x240xf32>
    %19 = arith.mulf %16, %18 : vector<32x240xf32>
    %c0_7 = arith.constant 0 : index
    %c0_8 = arith.constant 0 : index
    %20 = vector.load %arg5[%c0_7, %c0_8] : memref<1x240xf32, #tpu.memory_space<vmem>>, vector<1x240xf32>
    %21 = vector.broadcast %20 : vector<1x240xf32> to vector<32x240xf32>
    %22 = arith.addf %19, %21 : vector<32x240xf32>
    %c0_9 = arith.constant 0 : index
    %c0_10 = arith.constant 0 : index
    %23 = vector.load %arg3[%c0_9, %c0_10] : memref<240x32xf32, #tpu.memory_space<vmem>>, vector<240x32xf32>
    %cst_11 = arith.constant dense<0.000000e+00> : vector<32x32xf32>
    %24 = tpu.matmul %22, %23, %cst_11 {dimension_numbers = #tpu.dot_dimension_numbers<[1], [0], [0], [1], [0, 0, 1, 1], [], []>} : vector<32x240xf32>, vector<240x32xf32>, vector<32x32xf32> -> vector<32x32xf32>
    %c0_12 = arith.constant 0 : index
    %c0_13 = arith.constant 0 : index
    %25 = vector.load %arg6[%c0_12, %c0_13] : memref<1x32xf32, #tpu.memory_space<vmem>>, vector<1x32xf32>
    %26 = vector.broadcast %25 : vector<1x32xf32> to vector<32x32xf32>
    %27 = arith.addf %24, %26 : vector<32x32xf32>
    %c0_14 = arith.constant 0 : index
    %c0_15 = arith.constant 0 : index
    %28 = vector.load %arg7[%c0_14, %c0_15] : memref<32x32xf32, #tpu.memory_space<vmem>>, vector<32x32xf32>
    tpu.vector_store %arg7[%c0_14, %c0_15], %27 {strides = array<i32>} : memref<32x32xf32, #tpu.memory_space<vmem>>, vector<32x32xf32>,
    return
  }
  func.func @transform_0(%arg0: i32, %arg1: i32) -> (i32, i32) {
    %c0_i32 = arith.constant 0 : i32
    %c0_i32_0 = arith.constant 0 : i32
    return %arg0, %c0_i32 : i32, i32
  }
  func.func @transform_1(%arg0: i32, %arg1: i32) -> (i32, i32) {
    %c0_i32 = arith.constant 0 : i32
    %c0_i32_0 = arith.constant 0 : i32
    return %c0_i32, %arg1 : i32, i32
  }
  func.func @transform_2(%arg0: i32, %arg1: i32) -> (i32, i32) {
    %c0_i32 = arith.constant 0 : i32
    %c0_i32_0 = arith.constant 0 : i32
    %c0_i32_1 = arith.constant 0 : i32
    return %c0_i32, %c0_i32_0 : i32, i32
  }
  func.func @transform_3(%arg0: i32, %arg1: i32) -> (i32, i32) {
    %c0_i32 = arith.constant 0 : i32
    %c0_i32_0 = arith.constant 0 : i32
    %c0_i32_1 = arith.constant 0 : i32
    return %c0_i32, %c0_i32_0 : i32, i32
  }
  func.func @transform_4(%arg0: i32, %arg1: i32) -> (i32, i32) {
    %c0_i32 = arith.constant 0 : i32
    %c0_i32_0 = arith.constant 0 : i32
    return %c0_i32, %arg1 : i32, i32
  }
  func.func @transform_5(%arg0: i32, %arg1: i32) -> (i32, i32) {
    %c0_i32 = arith.constant 0 : i32
    return %arg0, %arg1 : i32, i32
  }
}

module attributes {stable_mosaic.version = 11 : i64} {
  func.func @kernel(%arg0: i32, %arg1: i32, %arg2: memref<34x32xf32, #tpu.memory_space<vmem>>, %arg3: memref<32x48xf32, #tpu.memory_space<vmem>>, %arg4: memref<34x48xf32, #tpu.memory_space<vmem>>) attributes {dimension_semantics = [#tpu.dimension_semantics<parallel>, #tpu.dimension_semantics<parallel>], iteration_bounds = array<i64: 1, 1>, scalar_prefetch = 0 : i64, scratch_operands = 0 : i64, tpu.core_type = #tpu.core_type<tc>, window_params = [{transform_indices = @transform_0, window_bounds = array<i64: 34, 32>}, {transform_indices = @transform_1, window_bounds = array<i64: 32, 48>}, {transform_indices = @transform_2, window_bounds = array<i64: 34, 48>}]} {
    %c0 = arith.constant 0 : index
    %c0_0 = arith.constant 0 : index
    %0 = vector.load %arg2[%c0, %c0_0] : memref<34x32xf32, #tpu.memory_space<vmem>>, vector<34x32xf32>
    %1 = arith.mulf %0, %0 : vector<34x32xf32>
    %cst = arith.constant dense<0.000000e+00> : vector<34xf32>
    %2 = vector.multi_reduction <add>, %1, %cst [1] : vector<34x32xf32> to vector<34xf32>
    %3 = vector.shape_cast %2 : vector<34xf32> to vector<34x1xf32>
    %cst_1 = arith.constant 3.200000e+01 : f32
    %4 = vector.broadcast %cst_1 : f32 to vector<34x1xf32>
    %5 = arith.divf %3, %4 : vector<34x1xf32>
    %cst_2 = arith.constant 9.99999997E-7 : f32
    %6 = vector.broadcast %cst_2 : f32 to vector<34x1xf32>
    %7 = arith.addf %5, %6 : vector<34x1xf32>
    %8 = math.rsqrt %7 : vector<34x1xf32>
    %9 = vector.broadcast %8 : vector<34x1xf32> to vector<34x32xf32>
    %10 = arith.mulf %0, %9 : vector<34x32xf32>
    %c0_3 = arith.constant 0 : index
    %c0_4 = arith.constant 0 : index
    %11 = vector.load %arg3[%c0_3, %c0_4] : memref<32x48xf32, #tpu.memory_space<vmem>>, vector<32x48xf32>
    %cst_5 = arith.constant dense<0.000000e+00> : vector<34x48xf32>
    %12 = tpu.matmul %10, %11, %cst_5 {dimension_numbers = #tpu.dot_dimension_numbers<[1], [0], [0], [1], [0, 0, 1, 1], [], []>} : vector<34x32xf32>, vector<32x48xf32>, vector<34x48xf32> -> vector<34x48xf32>
    %c0_6 = arith.constant 0 : index
    %c0_7 = arith.constant 0 : index
    %13 = vector.load %arg4[%c0_6, %c0_7] : memref<34x48xf32, #tpu.memory_space<vmem>>, vector<34x48xf32>
    tpu.vector_store %arg4[%c0_6, %c0_7], %12 {strides = array<i32>} : memref<34x48xf32, #tpu.memory_space<vmem>>, vector<34x48xf32>,
    return
  }
  func.func @transform_0(%arg0: i32, %arg1: i32) -> (i32, i32) {
    %c0_i32 = arith.constant 0 : i32
    %c0_i32_0 = arith.constant 0 : i32
    return %arg0, %c0_i32 : i32, i32
  }
  func.func @transform_1(%arg0: i32, %arg1: i32) -> (i32, i32) {
    %c0_i32 = arith.constant 0 : i32
    %c0_i32_0 = arith.constant 0 : i32
    return %c0_i32, %arg1 : i32, i32
  }
  func.func @transform_2(%arg0: i32, %arg1: i32) -> (i32, i32) {
    %c0_i32 = arith.constant 0 : i32
    return %arg0, %arg1 : i32, i32
  }
}

module attributes {stable_mosaic.version = 11 : i64} {
  func.func @kernel(%arg0: i32, %arg1: i32, %arg2: memref<34x16xf32, #tpu.memory_space<vmem>>, %arg3: memref<16x32xf32, #tpu.memory_space<vmem>>, %arg4: memref<34x32xf32, #tpu.memory_space<vmem>>, %arg5: memref<34x32xf32, #tpu.memory_space<vmem>>) attributes {dimension_semantics = [#tpu.dimension_semantics<parallel>, #tpu.dimension_semantics<parallel>], iteration_bounds = array<i64: 1, 1>, scalar_prefetch = 0 : i64, scratch_operands = 0 : i64, tpu.core_type = #tpu.core_type<tc>, window_params = [{transform_indices = @transform_0, window_bounds = array<i64: 34, 16>}, {transform_indices = @transform_1, window_bounds = array<i64: 16, 32>}, {transform_indices = @transform_2, window_bounds = array<i64: 34, 32>}, {transform_indices = @transform_3, window_bounds = array<i64: 34, 32>}]} {
    %c0 = arith.constant 0 : index
    %c0_0 = arith.constant 0 : index
    %0 = vector.load %arg2[%c0, %c0_0] : memref<34x16xf32, #tpu.memory_space<vmem>>, vector<34x16xf32>
    %1 = math.tanh %0 : vector<34x16xf32>
    %c0_1 = arith.constant 0 : index
    %c0_2 = arith.constant 0 : index
    %2 = vector.load %arg3[%c0_1, %c0_2] : memref<16x32xf32, #tpu.memory_space<vmem>>, vector<16x32xf32>
    %cst = arith.constant dense<0.000000e+00> : vector<34x32xf32>
    %3 = tpu.matmul %1, %2, %cst {dimension_numbers = #tpu.dot_dimension_numbers<[1], [0], [0], [1], [0, 0, 1, 1], [], []>} : vector<34x16xf32>, vector<16x32xf32>, vector<34x32xf32> -> vector<34x32xf32>
    %c0_3 = arith.constant 0 : index
    %c0_4 = arith.constant 0 : index
    %4 = vector.load %arg4[%c0_3, %c0_4] : memref<34x32xf32, #tpu.memory_space<vmem>>, vector<34x32xf32>
    %5 = arith.addf %3, %4 : vector<34x32xf32>
    %c0_5 = arith.constant 0 : index
    %c0_6 = arith.constant 0 : index
    %6 = vector.load %arg5[%c0_5, %c0_6] : memref<34x32xf32, #tpu.memory_space<vmem>>, vector<34x32xf32>
    tpu.vector_store %arg5[%c0_5, %c0_6], %5 {strides = array<i32>} : memref<34x32xf32, #tpu.memory_space<vmem>>, vector<34x32xf32>,
    return
  }
  func.func @transform_0(%arg0: i32, %arg1: i32) -> (i32, i32) {
    %c0_i32 = arith.constant 0 : i32
    %c0_i32_0 = arith.constant 0 : i32
    return %arg0, %c0_i32 : i32, i32
  }
  func.func @transform_1(%arg0: i32, %arg1: i32) -> (i32, i32) {
    %c0_i32 = arith.constant 0 : i32
    %c0_i32_0 = arith.constant 0 : i32
    return %c0_i32, %arg1 : i32, i32
  }
  func.func @transform_2(%arg0: i32, %arg1: i32) -> (i32, i32) {
    %c0_i32 = arith.constant 0 : i32
    return %arg0, %arg1 : i32, i32
  }
  func.func @transform_3(%arg0: i32, %arg1: i32) -> (i32, i32) {
    %c0_i32 = arith.constant 0 : i32
    return %arg0, %arg1 : i32, i32
  }
}

module attributes {stable_mosaic.version = 11 : i64} {
  func.func @kernel(%arg0: i32, %arg1: memref<2x16xf32, #tpu.memory_space<vmem>>, %arg2: memref<17x2x16xf32, #tpu.memory_space<vmem>>, %arg3: memref<17x2x16xf32, #tpu.memory_space<vmem>>, %arg4: memref<17x2x16xf32, #tpu.memory_space<vmem>>, %arg5: memref<17x2x16xf32, #tpu.memory_space<vmem>>) attributes {dimension_semantics = [#tpu.dimension_semantics<parallel>], iteration_bounds = array<i64: 1>, scalar_prefetch = 0 : i64, scratch_operands = 0 : i64, tpu.core_type = #tpu.core_type<tc>, window_params = [{transform_indices = @transform_0, window_bounds = array<i64: 2, 16>}, {transform_indices = @transform_1, window_bounds = array<i64: 17, 2, 16>}, {transform_indices = @transform_2, window_bounds = array<i64: 17, 2, 16>}, {transform_indices = @transform_3, window_bounds = array<i64: 17, 2, 16>}, {transform_indices = @transform_4, window_bounds = array<i64: 17, 2, 16>}]} {
    %c0 = arith.constant 0 : index
    %c0_0 = arith.constant 0 : index
    %0 = vector.load %arg1[%c0, %c0_0] : memref<2x16xf32, #tpu.memory_space<vmem>>, vector<2x16xf32>
    %cst = arith.constant 0.000000e+00 : f32
    %1 = vector.broadcast %cst : f32 to vector<2x2x16xf32>
    %2 = vector.shape_cast %0 : vector<2x16xf32> to vector<1x2x16xf32>
    %cst_1 = arith.constant 1.000000e+00 : f32
    %3 = vector.broadcast %cst_1 : f32 to vector<2x16xf32>
    %4 = arith.subf %3, %0 : vector<2x16xf32>
    %5 = vector.shape_cast %4 : vector<2x16xf32> to vector<1x2x16xf32>
    %c0_2 = arith.constant 0 : index
    %c0_3 = arith.constant 0 : index
    %c0_4 = arith.constant 0 : index
    %6 = vector.load %arg3[%c0_2, %c0_3, %c0_4] : memref<17x2x16xf32, #tpu.memory_space<vmem>>, vector<17x2x16xf32>
    %7 = arith.negf %6 : vector<17x2x16xf32>
    %8 = math.exp %7 : vector<17x2x16xf32>
    %cst_5 = arith.constant 1.000000e+00 : f32
    %9 = vector.broadcast %cst_5 : f32 to vector<17x2x16xf32>
    %10 = arith.addf %9, %8 : vector<17x2x16xf32>
    %11 = arith.divf %9, %10 : vector<17x2x16xf32>
    %12 = vector.broadcast %5 : vector<1x2x16xf32> to vector<17x2x16xf32>
    %13 = arith.mulf %12, %11 : vector<17x2x16xf32>
    %14 = vector.broadcast %2 : vector<1x2x16xf32> to vector<17x2x16xf32>
    %15 = arith.addf %14, %13 : vector<17x2x16xf32>
    %cst_6 = arith.constant 9.99999997E-7 : f32
    %16 = vector.broadcast %cst_6 : f32 to vector<17x2x16xf32>
    %17 = arith.addf %15, %16 : vector<17x2x16xf32>
    %cst_7 = arith.constant 1.000000e+00 : f32
    %18 = vector.broadcast %cst_7 : f32 to vector<17x2x16xf32>
    %19 = arith.subf %18, %15 : vector<17x2x16xf32>
    %20 = vector.extract_strided_slice %17 {offsets = [0, 0, 0], sizes = [1, 2, 16], strides = [1, 1, 1]} : vector<17x2x16xf32> to vector<1x2x16xf32>
    %21 = vector.shape_cast %20 : vector<1x2x16xf32> to vector<2x16xf32>
    %22 = vector.shape_cast %21 : vector<2x16xf32> to vector<2x1x16xf32>
    %23 = vector.broadcast %22 : vector<2x1x16xf32> to vector<2x2x16xf32>
    %24 = arith.mulf %23, %1 : vector<2x2x16xf32>
    %25 = vector.extract_strided_slice %19 {offsets = [0, 0, 0], sizes = [1, 2, 16], strides = [1, 1, 1]} : vector<17x2x16xf32> to vector<1x2x16xf32>
    %26 = vector.shape_cast %25 : vector<1x2x16xf32> to vector<2x16xf32>
    %27 = vector.shape_cast %26 : vector<2x16xf32> to vector<2x1x16xf32>
    %c0_8 = arith.constant 0 : index
    %c0_9 = arith.constant 0 : index
    %c0_10 = arith.constant 0 : index
    %28 = vector.load %arg4[%c0_8, %c0_9, %c0_10] : memref<17x2x16xf32, #tpu.memory_space<vmem>>, vector<1x2x16xf32>
    %29 = vector.shape_cast %28 : vector<1x2x16xf32> to vector<2x16xf32>
    %30 = vector.shape_cast %29 : vector<2x16xf32> to vector<1x2x16xf32>
    %31 = vector.broadcast %27 : vector<2x1x16xf32> to vector<2x2x16xf32>
    %32 = vector.broadcast %30 : vector<1x2x16xf32> to vector<2x2x16xf32>
    %33 = arith.mulf %31, %32 : vector<2x2x16xf32>
    %34 = arith.addf %24, %33 : vector<2x2x16xf32>
    %c0_11 = arith.constant 0 : index
    %c0_12 = arith.constant 0 : index
    %c0_13 = arith.constant 0 : index
    %35 = vector.load %arg2[%c0_11, %c0_12, %c0_13] : memref<17x2x16xf32, #tpu.memory_space<vmem>>, vector<1x2x16xf32>
    %36 = vector.shape_cast %35 : vector<1x2x16xf32> to vector<2x16xf32>
    %37 = vector.shape_cast %36 : vector<2x16xf32> to vector<2x1x16xf32>
    %38 = vector.broadcast %37 : vector<2x1x16xf32> to vector<2x2x16xf32>
    %39 = arith.mulf %38, %34 : vector<2x2x16xf32>
    %cst_14 = arith.constant dense<0.000000e+00> : vector<2x16xf32>
    %40 = vector.multi_reduction <add>, %39, %cst_14 [0] : vector<2x2x16xf32> to vector<2x16xf32>
    %c0_15 = arith.constant 0 : index
    %c0_16 = arith.constant 0 : index
    %c0_17 = arith.constant 0 : index
    %41 = vector.load %arg5[%c0_15, %c0_16, %c0_17] : memref<17x2x16xf32, #tpu.memory_space<vmem>>, vector<1x2x16xf32>
    %42 = vector.shape_cast %41 : vector<1x2x16xf32> to vector<2x16xf32>
    %43 = vector.shape_cast %40 : vector<2x16xf32> to vector<1x2x16xf32>
    tpu.vector_store %arg5[%c0_15, %c0_16, %c0_17], %43 {strides = array<i32>} : memref<17x2x16xf32, #tpu.memory_space<vmem>>, vector<1x2x16xf32>,
    %44 = vector.extract_strided_slice %17 {offsets = [1, 0, 0], sizes = [1, 2, 16], strides = [1, 1, 1]} : vector<17x2x16xf32> to vector<1x2x16xf32>
    %45 = vector.shape_cast %44 : vector<1x2x16xf32> to vector<2x16xf32>
    %46 = vector.shape_cast %45 : vector<2x16xf32> to vector<2x1x16xf32>
    %47 = vector.broadcast %46 : vector<2x1x16xf32> to vector<2x2x16xf32>
    %48 = arith.mulf %47, %34 : vector<2x2x16xf32>
    %49 = vector.extract_strided_slice %19 {offsets = [1, 0, 0], sizes = [1, 2, 16], strides = [1, 1, 1]} : vector<17x2x16xf32> to vector<1x2x16xf32>
    %50 = vector.shape_cast %49 : vector<1x2x16xf32> to vector<2x16xf32>
    %51 = vector.shape_cast %50 : vector<2x16xf32> to vector<2x1x16xf32>
    %c1 = arith.constant 1 : index
    %c0_18 = arith.constant 0 : index
    %c0_19 = arith.constant 0 : index
    %52 = vector.load %arg4[%c1, %c0_18, %c0_19] : memref<17x2x16xf32, #tpu.memory_space<vmem>>, vector<1x2x16xf32>
    %53 = vector.shape_cast %52 : vector<1x2x16xf32> to vector<2x16xf32>
    %54 = vector.shape_cast %53 : vector<2x16xf32> to vector<1x2x16xf32>
    %55 = vector.broadcast %51 : vector<2x1x16xf32> to vector<2x2x16xf32>
    %56 = vector.broadcast %54 : vector<1x2x16xf32> to vector<2x2x16xf32>
    %57 = arith.mulf %55, %56 : vector<2x2x16xf32>
    %58 = arith.addf %48, %57 : vector<2x2x16xf32>
    %c1_20 = arith.constant 1 : index
    %c0_21 = arith.constant 0 : index
    %c0_22 = arith.constant 0 : index
    %59 = vector.load %arg2[%c1_20, %c0_21, %c0_22] : memref<17x2x16xf32, #tpu.memory_space<vmem>>, vector<1x2x16xf32>
    %60 = vector.shape_cast %59 : vector<1x2x16xf32> to vector<2x16xf32>
    %61 = vector.shape_cast %60 : vector<2x16xf32> to vector<2x1x16xf32>
    %62 = vector.broadcast %61 : vector<2x1x16xf32> to vector<2x2x16xf32>
    %63 = arith.mulf %62, %58 : vector<2x2x16xf32>
    %cst_23 = arith.constant dense<0.000000e+00> : vector<2x16xf32>
    %64 = vector.multi_reduction <add>, %63, %cst_23 [0] : vector<2x2x16xf32> to vector<2x16xf32>
    %c1_24 = arith.constant 1 : index
    %c0_25 = arith.constant 0 : index
    %c0_26 = arith.constant 0 : index
    %65 = vector.load %arg5[%c1_24, %c0_25, %c0_26] : memref<17x2x16xf32, #tpu.memory_space<vmem>>, vector<1x2x16xf32>
    %66 = vector.shape_cast %65 : vector<1x2x16xf32> to vector<2x16xf32>
    %67 = vector.shape_cast %64 : vector<2x16xf32> to vector<1x2x16xf32>
    tpu.vector_store %arg5[%c1_24, %c0_25, %c0_26], %67 {strides = array<i32>} : memref<17x2x16xf32, #tpu.memory_space<vmem>>, vector<1x2x16xf32>,
    %68 = vector.extract_strided_slice %17 {offsets = [2, 0, 0], sizes = [1, 2, 16], strides = [1, 1, 1]} : vector<17x2x16xf32> to vector<1x2x16xf32>
    %69 = vector.shape_cast %68 : vector<1x2x16xf32> to vector<2x16xf32>
    %70 = vector.shape_cast %69 : vector<2x16xf32> to vector<2x1x16xf32>
    %71 = vector.broadcast %70 : vector<2x1x16xf32> to vector<2x2x16xf32>
    %72 = arith.mulf %71, %58 : vector<2x2x16xf32>
    %73 = vector.extract_strided_slice %19 {offsets = [2, 0, 0], sizes = [1, 2, 16], strides = [1, 1, 1]} : vector<17x2x16xf32> to vector<1x2x16xf32>
    %74 = vector.shape_cast %73 : vector<1x2x16xf32> to vector<2x16xf32>
    %75 = vector.shape_cast %74 : vector<2x16xf32> to vector<2x1x16xf32>
    %c2 = arith.constant 2 : index
    %c0_27 = arith.constant 0 : index
    %c0_28 = arith.constant 0 : index
    %76 = vector.load %arg4[%c2, %c0_27, %c0_28] : memref<17x2x16xf32, #tpu.memory_space<vmem>>, vector<1x2x16xf32>
    %77 = vector.shape_cast %76 : vector<1x2x16xf32> to vector<2x16xf32>
    %78 = vector.shape_cast %77 : vector<2x16xf32> to vector<1x2x16xf32>
    %79 = vector.broadcast %75 : vector<2x1x16xf32> to vector<2x2x16xf32>
    %80 = vector.broadcast %78 : vector<1x2x16xf32> to vector<2x2x16xf32>
    %81 = arith.mulf %79, %80 : vector<2x2x16xf32>
    %82 = arith.addf %72, %81 : vector<2x2x16xf32>
    %c2_29 = arith.constant 2 : index
    %c0_30 = arith.constant 0 : index
    %c0_31 = arith.constant 0 : index
    %83 = vector.load %arg2[%c2_29, %c0_30, %c0_31] : memref<17x2x16xf32, #tpu.memory_space<vmem>>, vector<1x2x16xf32>
    %84 = vector.shape_cast %83 : vector<1x2x16xf32> to vector<2x16xf32>
    %85 = vector.shape_cast %84 : vector<2x16xf32> to vector<2x1x16xf32>
    %86 = vector.broadcast %85 : vector<2x1x16xf32> to vector<2x2x16xf32>
    %87 = arith.mulf %86, %82 : vector<2x2x16xf32>
    %cst_32 = arith.constant dense<0.000000e+00> : vector<2x16xf32>
    %88 = vector.multi_reduction <add>, %87, %cst_32 [0] : vector<2x2x16xf32> to vector<2x16xf32>
    %c2_33 = arith.constant 2 : index
    %c0_34 = arith.constant 0 : index
    %c0_35 = arith.constant 0 : index
    %89 = vector.load %arg5[%c2_33, %c0_34, %c0_35] : memref<17x2x16xf32, #tpu.memory_space<vmem>>, vector<1x2x16xf32>
    %90 = vector.shape_cast %89 : vector<1x2x16xf32> to vector<2x16xf32>
    %91 = vector.shape_cast %88 : vector<2x16xf32> to vector<1x2x16xf32>
    tpu.vector_store %arg5[%c2_33, %c0_34, %c0_35], %91 {strides = array<i32>} : memref<17x2x16xf32, #tpu.memory_space<vmem>>, vector<1x2x16xf32>,
    %92 = vector.extract_strided_slice %17 {offsets = [3, 0, 0], sizes = [1, 2, 16], strides = [1, 1, 1]} : vector<17x2x16xf32> to vector<1x2x16xf32>
    %93 = vector.shape_cast %92 : vector<1x2x16xf32> to vector<2x16xf32>
    %94 = vector.shape_cast %93 : vector<2x16xf32> to vector<2x1x16xf32>
    %95 = vector.broadcast %94 : vector<2x1x16xf32> to vector<2x2x16xf32>
    %96 = arith.mulf %95, %82 : vector<2x2x16xf32>
    %97 = vector.extract_strided_slice %19 {offsets = [3, 0, 0], sizes = [1, 2, 16], strides = [1, 1, 1]} : vector<17x2x16xf32> to vector<1x2x16xf32>
    %98 = vector.shape_cast %97 : vector<1x2x16xf32> to vector<2x16xf32>
    %99 = vector.shape_cast %98 : vector<2x16xf32> to vector<2x1x16xf32>
    %c3 = arith.constant 3 : index
    %c0_36 = arith.constant 0 : index
    %c0_37 = arith.constant 0 : index
    %100 = vector.load %arg4[%c3, %c0_36, %c0_37] : memref<17x2x16xf32, #tpu.memory_space<vmem>>, vector<1x2x16xf32>
    %101 = vector.shape_cast %100 : vector<1x2x16xf32> to vector<2x16xf32>
    %102 = vector.shape_cast %101 : vector<2x16xf32> to vector<1x2x16xf32>
    %103 = vector.broadcast %99 : vector<2x1x16xf32> to vector<2x2x16xf32>
    %104 = vector.broadcast %102 : vector<1x2x16xf32> to vector<2x2x16xf32>
    %105 = arith.mulf %103, %104 : vector<2x2x16xf32>
    %106 = arith.addf %96, %105 : vector<2x2x16xf32>
    %c3_38 = arith.constant 3 : index
    %c0_39 = arith.constant 0 : index
    %c0_40 = arith.constant 0 : index
    %107 = vector.load %arg2[%c3_38, %c0_39, %c0_40] : memref<17x2x16xf32, #tpu.memory_space<vmem>>, vector<1x2x16xf32>
    %108 = vector.shape_cast %107 : vector<1x2x16xf32> to vector<2x16xf32>
    %109 = vector.shape_cast %108 : vector<2x16xf32> to vector<2x1x16xf32>
    %110 = vector.broadcast %109 : vector<2x1x16xf32> to vector<2x2x16xf32>
    %111 = arith.mulf %110, %106 : vector<2x2x16xf32>
    %cst_41 = arith.constant dense<0.000000e+00> : vector<2x16xf32>
    %112 = vector.multi_reduction <add>, %111, %cst_41 [0] : vector<2x2x16xf32> to vector<2x16xf32>
    %c3_42 = arith.constant 3 : index
    %c0_43 = arith.constant 0 : index
    %c0_44 = arith.constant 0 : index
    %113 = vector.load %arg5[%c3_42, %c0_43, %c0_44] : memref<17x2x16xf32, #tpu.memory_space<vmem>>, vector<1x2x16xf32>
    %114 = vector.shape_cast %113 : vector<1x2x16xf32> to vector<2x16xf32>
    %115 = vector.shape_cast %112 : vector<2x16xf32> to vector<1x2x16xf32>
    tpu.vector_store %arg5[%c3_42, %c0_43, %c0_44], %115 {strides = array<i32>} : memref<17x2x16xf32, #tpu.memory_space<vmem>>, vector<1x2x16xf32>,
    %116 = vector.extract_strided_slice %17 {offsets = [4, 0, 0], sizes = [1, 2, 16], strides = [1, 1, 1]} : vector<17x2x16xf32> to vector<1x2x16xf32>
    %117 = vector.shape_cast %116 : vector<1x2x16xf32> to vector<2x16xf32>
    %118 = vector.shape_cast %117 : vector<2x16xf32> to vector<2x1x16xf32>
    %119 = vector.broadcast %118 : vector<2x1x16xf32> to vector<2x2x16xf32>
    %120 = arith.mulf %119, %106 : vector<2x2x16xf32>
    %121 = vector.extract_strided_slice %19 {offsets = [4, 0, 0], sizes = [1, 2, 16], strides = [1, 1, 1]} : vector<17x2x16xf32> to vector<1x2x16xf32>
    %122 = vector.shape_cast %121 : vector<1x2x16xf32> to vector<2x16xf32>
    %123 = vector.shape_cast %122 : vector<2x16xf32> to vector<2x1x16xf32>
    %c4 = arith.constant 4 : index
    %c0_45 = arith.constant 0 : index
    %c0_46 = arith.constant 0 : index
    %124 = vector.load %arg4[%c4, %c0_45, %c0_46] : memref<17x2x16xf32, #tpu.memory_space<vmem>>, vector<1x2x16xf32>
    %125 = vector.shape_cast %124 : vector<1x2x16xf32> to vector<2x16xf32>
    %126 = vector.shape_cast %125 : vector<2x16xf32> to vector<1x2x16xf32>
    %127 = vector.broadcast %123 : vector<2x1x16xf32> to vector<2x2x16xf32>
    %128 = vector.broadcast %126 : vector<1x2x16xf32> to vector<2x2x16xf32>
    %129 = arith.mulf %127, %128 : vector<2x2x16xf32>
    %130 = arith.addf %120, %129 : vector<2x2x16xf32>
    %c4_47 = arith.constant 4 : index
    %c0_48 = arith.constant 0 : index
    %c0_49 = arith.constant 0 : index
    %131 = vector.load %arg2[%c4_47, %c0_48, %c0_49] : memref<17x2x16xf32, #tpu.memory_space<vmem>>, vector<1x2x16xf32>
    %132 = vector.shape_cast %131 : vector<1x2x16xf32> to vector<2x16xf32>
    %133 = vector.shape_cast %132 : vector<2x16xf32> to vector<2x1x16xf32>
    %134 = vector.broadcast %133 : vector<2x1x16xf32> to vector<2x2x16xf32>
    %135 = arith.mulf %134, %130 : vector<2x2x16xf32>
    %cst_50 = arith.constant dense<0.000000e+00> : vector<2x16xf32>
    %136 = vector.multi_reduction <add>, %135, %cst_50 [0] : vector<2x2x16xf32> to vector<2x16xf32>
    %c4_51 = arith.constant 4 : index
    %c0_52 = arith.constant 0 : index
    %c0_53 = arith.constant 0 : index
    %137 = vector.load %arg5[%c4_51, %c0_52, %c0_53] : memref<17x2x16xf32, #tpu.memory_space<vmem>>, vector<1x2x16xf32>
    %138 = vector.shape_cast %137 : vector<1x2x16xf32> to vector<2x16xf32>
    %139 = vector.shape_cast %136 : vector<2x16xf32> to vector<1x2x16xf32>
    tpu.vector_store %arg5[%c4_51, %c0_52, %c0_53], %139 {strides = array<i32>} : memref<17x2x16xf32, #tpu.memory_space<vmem>>, vector<1x2x16xf32>,
    %140 = vector.extract_strided_slice %17 {offsets = [5, 0, 0], sizes = [1, 2, 16], strides = [1, 1, 1]} : vector<17x2x16xf32> to vector<1x2x16xf32>
    %141 = vector.shape_cast %140 : vector<1x2x16xf32> to vector<2x16xf32>
    %142 = vector.shape_cast %141 : vector<2x16xf32> to vector<2x1x16xf32>
    %143 = vector.broadcast %142 : vector<2x1x16xf32> to vector<2x2x16xf32>
    %144 = arith.mulf %143, %130 : vector<2x2x16xf32>
    %145 = vector.extract_strided_slice %19 {offsets = [5, 0, 0], sizes = [1, 2, 16], strides = [1, 1, 1]} : vector<17x2x16xf32> to vector<1x2x16xf32>
    %146 = vector.shape_cast %145 : vector<1x2x16xf32> to vector<2x16xf32>
    %147 = vector.shape_cast %146 : vector<2x16xf32> to vector<2x1x16xf32>
    %c5 = arith.constant 5 : index
    %c0_54 = arith.constant 0 : index
    %c0_55 = arith.constant 0 : index
    %148 = vector.load %arg4[%c5, %c0_54, %c0_55] : memref<17x2x16xf32, #tpu.memory_space<vmem>>, vector<1x2x16xf32>
    %149 = vector.shape_cast %148 : vector<1x2x16xf32> to vector<2x16xf32>
    %150 = vector.shape_cast %149 : vector<2x16xf32> to vector<1x2x16xf32>
    %151 = vector.broadcast %147 : vector<2x1x16xf32> to vector<2x2x16xf32>
    %152 = vector.broadcast %150 : vector<1x2x16xf32> to vector<2x2x16xf32>
    %153 = arith.mulf %151, %152 : vector<2x2x16xf32>
    %154 = arith.addf %144, %153 : vector<2x2x16xf32>
    %c5_56 = arith.constant 5 : index
    %c0_57 = arith.constant 0 : index
    %c0_58 = arith.constant 0 : index
    %155 = vector.load %arg2[%c5_56, %c0_57, %c0_58] : memref<17x2x16xf32, #tpu.memory_space<vmem>>, vector<1x2x16xf32>
    %156 = vector.shape_cast %155 : vector<1x2x16xf32> to vector<2x16xf32>
    %157 = vector.shape_cast %156 : vector<2x16xf32> to vector<2x1x16xf32>
    %158 = vector.broadcast %157 : vector<2x1x16xf32> to vector<2x2x16xf32>
    %159 = arith.mulf %158, %154 : vector<2x2x16xf32>
    %cst_59 = arith.constant dense<0.000000e+00> : vector<2x16xf32>
    %160 = vector.multi_reduction <add>, %159, %cst_59 [0] : vector<2x2x16xf32> to vector<2x16xf32>
    %c5_60 = arith.constant 5 : index
    %c0_61 = arith.constant 0 : index
    %c0_62 = arith.constant 0 : index
    %161 = vector.load %arg5[%c5_60, %c0_61, %c0_62] : memref<17x2x16xf32, #tpu.memory_space<vmem>>, vector<1x2x16xf32>
    %162 = vector.shape_cast %161 : vector<1x2x16xf32> to vector<2x16xf32>
    %163 = vector.shape_cast %160 : vector<2x16xf32> to vector<1x2x16xf32>
    tpu.vector_store %arg5[%c5_60, %c0_61, %c0_62], %163 {strides = array<i32>} : memref<17x2x16xf32, #tpu.memory_space<vmem>>, vector<1x2x16xf32>,
    %164 = vector.extract_strided_slice %17 {offsets = [6, 0, 0], sizes = [1, 2, 16], strides = [1, 1, 1]} : vector<17x2x16xf32> to vector<1x2x16xf32>
    %165 = vector.shape_cast %164 : vector<1x2x16xf32> to vector<2x16xf32>
    %166 = vector.shape_cast %165 : vector<2x16xf32> to vector<2x1x16xf32>
    %167 = vector.broadcast %166 : vector<2x1x16xf32> to vector<2x2x16xf32>
    %168 = arith.mulf %167, %154 : vector<2x2x16xf32>
    %169 = vector.extract_strided_slice %19 {offsets = [6, 0, 0], sizes = [1, 2, 16], strides = [1, 1, 1]} : vector<17x2x16xf32> to vector<1x2x16xf32>
    %170 = vector.shape_cast %169 : vector<1x2x16xf32> to vector<2x16xf32>
    %171 = vector.shape_cast %170 : vector<2x16xf32> to vector<2x1x16xf32>
    %c6 = arith.constant 6 : index
    %c0_63 = arith.constant 0 : index
    %c0_64 = arith.constant 0 : index
    %172 = vector.load %arg4[%c6, %c0_63, %c0_64] : memref<17x2x16xf32, #tpu.memory_space<vmem>>, vector<1x2x16xf32>
    %173 = vector.shape_cast %172 : vector<1x2x16xf32> to vector<2x16xf32>
    %174 = vector.shape_cast %173 : vector<2x16xf32> to vector<1x2x16xf32>
    %175 = vector.broadcast %171 : vector<2x1x16xf32> to vector<2x2x16xf32>
    %176 = vector.broadcast %174 : vector<1x2x16xf32> to vector<2x2x16xf32>
    %177 = arith.mulf %175, %176 : vector<2x2x16xf32>
    %178 = arith.addf %168, %177 : vector<2x2x16xf32>
    %c6_65 = arith.constant 6 : index
    %c0_66 = arith.constant 0 : index
    %c0_67 = arith.constant 0 : index
    %179 = vector.load %arg2[%c6_65, %c0_66, %c0_67] : memref<17x2x16xf32, #tpu.memory_space<vmem>>, vector<1x2x16xf32>
    %180 = vector.shape_cast %179 : vector<1x2x16xf32> to vector<2x16xf32>
    %181 = vector.shape_cast %180 : vector<2x16xf32> to vector<2x1x16xf32>
    %182 = vector.broadcast %181 : vector<2x1x16xf32> to vector<2x2x16xf32>
    %183 = arith.mulf %182, %178 : vector<2x2x16xf32>
    %cst_68 = arith.constant dense<0.000000e+00> : vector<2x16xf32>
    %184 = vector.multi_reduction <add>, %183, %cst_68 [0] : vector<2x2x16xf32> to vector<2x16xf32>
    %c6_69 = arith.constant 6 : index
    %c0_70 = arith.constant 0 : index
    %c0_71 = arith.constant 0 : index
    %185 = vector.load %arg5[%c6_69, %c0_70, %c0_71] : memref<17x2x16xf32, #tpu.memory_space<vmem>>, vector<1x2x16xf32>
    %186 = vector.shape_cast %185 : vector<1x2x16xf32> to vector<2x16xf32>
    %187 = vector.shape_cast %184 : vector<2x16xf32> to vector<1x2x16xf32>
    tpu.vector_store %arg5[%c6_69, %c0_70, %c0_71], %187 {strides = array<i32>} : memref<17x2x16xf32, #tpu.memory_space<vmem>>, vector<1x2x16xf32>,
    %188 = vector.extract_strided_slice %17 {offsets = [7, 0, 0], sizes = [1, 2, 16], strides = [1, 1, 1]} : vector<17x2x16xf32> to vector<1x2x16xf32>
    %189 = vector.shape_cast %188 : vector<1x2x16xf32> to vector<2x16xf32>
    %190 = vector.shape_cast %189 : vector<2x16xf32> to vector<2x1x16xf32>
    %191 = vector.broadcast %190 : vector<2x1x16xf32> to vector<2x2x16xf32>
    %192 = arith.mulf %191, %178 : vector<2x2x16xf32>
    %193 = vector.extract_strided_slice %19 {offsets = [7, 0, 0], sizes = [1, 2, 16], strides = [1, 1, 1]} : vector<17x2x16xf32> to vector<1x2x16xf32>
    %194 = vector.shape_cast %193 : vector<1x2x16xf32> to vector<2x16xf32>
    %195 = vector.shape_cast %194 : vector<2x16xf32> to vector<2x1x16xf32>
    %c7 = arith.constant 7 : index
    %c0_72 = arith.constant 0 : index
    %c0_73 = arith.constant 0 : index
    %196 = vector.load %arg4[%c7, %c0_72, %c0_73] : memref<17x2x16xf32, #tpu.memory_space<vmem>>, vector<1x2x16xf32>
    %197 = vector.shape_cast %196 : vector<1x2x16xf32> to vector<2x16xf32>
    %198 = vector.shape_cast %197 : vector<2x16xf32> to vector<1x2x16xf32>
    %199 = vector.broadcast %195 : vector<2x1x16xf32> to vector<2x2x16xf32>
    %200 = vector.broadcast %198 : vector<1x2x16xf32> to vector<2x2x16xf32>
    %201 = arith.mulf %199, %200 : vector<2x2x16xf32>
    %202 = arith.addf %192, %201 : vector<2x2x16xf32>
    %c7_74 = arith.constant 7 : index
    %c0_75 = arith.constant 0 : index
    %c0_76 = arith.constant 0 : index
    %203 = vector.load %arg2[%c7_74, %c0_75, %c0_76] : memref<17x2x16xf32, #tpu.memory_space<vmem>>, vector<1x2x16xf32>
    %204 = vector.shape_cast %203 : vector<1x2x16xf32> to vector<2x16xf32>
    %205 = vector.shape_cast %204 : vector<2x16xf32> to vector<2x1x16xf32>
    %206 = vector.broadcast %205 : vector<2x1x16xf32> to vector<2x2x16xf32>
    %207 = arith.mulf %206, %202 : vector<2x2x16xf32>
    %cst_77 = arith.constant dense<0.000000e+00> : vector<2x16xf32>
    %208 = vector.multi_reduction <add>, %207, %cst_77 [0] : vector<2x2x16xf32> to vector<2x16xf32>
    %c7_78 = arith.constant 7 : index
    %c0_79 = arith.constant 0 : index
    %c0_80 = arith.constant 0 : index
    %209 = vector.load %arg5[%c7_78, %c0_79, %c0_80] : memref<17x2x16xf32, #tpu.memory_space<vmem>>, vector<1x2x16xf32>
    %210 = vector.shape_cast %209 : vector<1x2x16xf32> to vector<2x16xf32>
    %211 = vector.shape_cast %208 : vector<2x16xf32> to vector<1x2x16xf32>
    tpu.vector_store %arg5[%c7_78, %c0_79, %c0_80], %211 {strides = array<i32>} : memref<17x2x16xf32, #tpu.memory_space<vmem>>, vector<1x2x16xf32>,
    %212 = vector.extract_strided_slice %17 {offsets = [8, 0, 0], sizes = [1, 2, 16], strides = [1, 1, 1]} : vector<17x2x16xf32> to vector<1x2x16xf32>
    %213 = vector.shape_cast %212 : vector<1x2x16xf32> to vector<2x16xf32>
    %214 = vector.shape_cast %213 : vector<2x16xf32> to vector<2x1x16xf32>
    %215 = vector.broadcast %214 : vector<2x1x16xf32> to vector<2x2x16xf32>
    %216 = arith.mulf %215, %202 : vector<2x2x16xf32>
    %217 = vector.extract_strided_slice %19 {offsets = [8, 0, 0], sizes = [1, 2, 16], strides = [1, 1, 1]} : vector<17x2x16xf32> to vector<1x2x16xf32>
    %218 = vector.shape_cast %217 : vector<1x2x16xf32> to vector<2x16xf32>
    %219 = vector.shape_cast %218 : vector<2x16xf32> to vector<2x1x16xf32>
    %c8 = arith.constant 8 : index
    %c0_81 = arith.constant 0 : index
    %c0_82 = arith.constant 0 : index
    %220 = vector.load %arg4[%c8, %c0_81, %c0_82] : memref<17x2x16xf32, #tpu.memory_space<vmem>>, vector<1x2x16xf32>
    %221 = vector.shape_cast %220 : vector<1x2x16xf32> to vector<2x16xf32>
    %222 = vector.shape_cast %221 : vector<2x16xf32> to vector<1x2x16xf32>
    %223 = vector.broadcast %219 : vector<2x1x16xf32> to vector<2x2x16xf32>
    %224 = vector.broadcast %222 : vector<1x2x16xf32> to vector<2x2x16xf32>
    %225 = arith.mulf %223, %224 : vector<2x2x16xf32>
    %226 = arith.addf %216, %225 : vector<2x2x16xf32>
    %c8_83 = arith.constant 8 : index
    %c0_84 = arith.constant 0 : index
    %c0_85 = arith.constant 0 : index
    %227 = vector.load %arg2[%c8_83, %c0_84, %c0_85] : memref<17x2x16xf32, #tpu.memory_space<vmem>>, vector<1x2x16xf32>
    %228 = vector.shape_cast %227 : vector<1x2x16xf32> to vector<2x16xf32>
    %229 = vector.shape_cast %228 : vector<2x16xf32> to vector<2x1x16xf32>
    %230 = vector.broadcast %229 : vector<2x1x16xf32> to vector<2x2x16xf32>
    %231 = arith.mulf %230, %226 : vector<2x2x16xf32>
    %cst_86 = arith.constant dense<0.000000e+00> : vector<2x16xf32>
    %232 = vector.multi_reduction <add>, %231, %cst_86 [0] : vector<2x2x16xf32> to vector<2x16xf32>
    %c8_87 = arith.constant 8 : index
    %c0_88 = arith.constant 0 : index
    %c0_89 = arith.constant 0 : index
    %233 = vector.load %arg5[%c8_87, %c0_88, %c0_89] : memref<17x2x16xf32, #tpu.memory_space<vmem>>, vector<1x2x16xf32>
    %234 = vector.shape_cast %233 : vector<1x2x16xf32> to vector<2x16xf32>
    %235 = vector.shape_cast %232 : vector<2x16xf32> to vector<1x2x16xf32>
    tpu.vector_store %arg5[%c8_87, %c0_88, %c0_89], %235 {strides = array<i32>} : memref<17x2x16xf32, #tpu.memory_space<vmem>>, vector<1x2x16xf32>,
    %236 = vector.extract_strided_slice %17 {offsets = [9, 0, 0], sizes = [1, 2, 16], strides = [1, 1, 1]} : vector<17x2x16xf32> to vector<1x2x16xf32>
    %237 = vector.shape_cast %236 : vector<1x2x16xf32> to vector<2x16xf32>
    %238 = vector.shape_cast %237 : vector<2x16xf32> to vector<2x1x16xf32>
    %239 = vector.broadcast %238 : vector<2x1x16xf32> to vector<2x2x16xf32>
    %240 = arith.mulf %239, %226 : vector<2x2x16xf32>
    %241 = vector.extract_strided_slice %19 {offsets = [9, 0, 0], sizes = [1, 2, 16], strides = [1, 1, 1]} : vector<17x2x16xf32> to vector<1x2x16xf32>
    %242 = vector.shape_cast %241 : vector<1x2x16xf32> to vector<2x16xf32>
    %243 = vector.shape_cast %242 : vector<2x16xf32> to vector<2x1x16xf32>
    %c9 = arith.constant 9 : index
    %c0_90 = arith.constant 0 : index
    %c0_91 = arith.constant 0 : index
    %244 = vector.load %arg4[%c9, %c0_90, %c0_91] : memref<17x2x16xf32, #tpu.memory_space<vmem>>, vector<1x2x16xf32>
    %245 = vector.shape_cast %244 : vector<1x2x16xf32> to vector<2x16xf32>
    %246 = vector.shape_cast %245 : vector<2x16xf32> to vector<1x2x16xf32>
    %247 = vector.broadcast %243 : vector<2x1x16xf32> to vector<2x2x16xf32>
    %248 = vector.broadcast %246 : vector<1x2x16xf32> to vector<2x2x16xf32>
    %249 = arith.mulf %247, %248 : vector<2x2x16xf32>
    %250 = arith.addf %240, %249 : vector<2x2x16xf32>
    %c9_92 = arith.constant 9 : index
    %c0_93 = arith.constant 0 : index
    %c0_94 = arith.constant 0 : index
    %251 = vector.load %arg2[%c9_92, %c0_93, %c0_94] : memref<17x2x16xf32, #tpu.memory_space<vmem>>, vector<1x2x16xf32>
    %252 = vector.shape_cast %251 : vector<1x2x16xf32> to vector<2x16xf32>
    %253 = vector.shape_cast %252 : vector<2x16xf32> to vector<2x1x16xf32>
    %254 = vector.broadcast %253 : vector<2x1x16xf32> to vector<2x2x16xf32>
    %255 = arith.mulf %254, %250 : vector<2x2x16xf32>
    %cst_95 = arith.constant dense<0.000000e+00> : vector<2x16xf32>
    %256 = vector.multi_reduction <add>, %255, %cst_95 [0] : vector<2x2x16xf32> to vector<2x16xf32>
    %c9_96 = arith.constant 9 : index
    %c0_97 = arith.constant 0 : index
    %c0_98 = arith.constant 0 : index
    %257 = vector.load %arg5[%c9_96, %c0_97, %c0_98] : memref<17x2x16xf32, #tpu.memory_space<vmem>>, vector<1x2x16xf32>
    %258 = vector.shape_cast %257 : vector<1x2x16xf32> to vector<2x16xf32>
    %259 = vector.shape_cast %256 : vector<2x16xf32> to vector<1x2x16xf32>
    tpu.vector_store %arg5[%c9_96, %c0_97, %c0_98], %259 {strides = array<i32>} : memref<17x2x16xf32, #tpu.memory_space<vmem>>, vector<1x2x16xf32>,
    %260 = vector.extract_strided_slice %17 {offsets = [10, 0, 0], sizes = [1, 2, 16], strides = [1, 1, 1]} : vector<17x2x16xf32> to vector<1x2x16xf32>
    %261 = vector.shape_cast %260 : vector<1x2x16xf32> to vector<2x16xf32>
    %262 = vector.shape_cast %261 : vector<2x16xf32> to vector<2x1x16xf32>
    %263 = vector.broadcast %262 : vector<2x1x16xf32> to vector<2x2x16xf32>
    %264 = arith.mulf %263, %250 : vector<2x2x16xf32>
    %265 = vector.extract_strided_slice %19 {offsets = [10, 0, 0], sizes = [1, 2, 16], strides = [1, 1, 1]} : vector<17x2x16xf32> to vector<1x2x16xf32>
    %266 = vector.shape_cast %265 : vector<1x2x16xf32> to vector<2x16xf32>
    %267 = vector.shape_cast %266 : vector<2x16xf32> to vector<2x1x16xf32>
    %c10 = arith.constant 10 : index
    %c0_99 = arith.constant 0 : index
    %c0_100 = arith.constant 0 : index
    %268 = vector.load %arg4[%c10, %c0_99, %c0_100] : memref<17x2x16xf32, #tpu.memory_space<vmem>>, vector<1x2x16xf32>
    %269 = vector.shape_cast %268 : vector<1x2x16xf32> to vector<2x16xf32>
    %270 = vector.shape_cast %269 : vector<2x16xf32> to vector<1x2x16xf32>
    %271 = vector.broadcast %267 : vector<2x1x16xf32> to vector<2x2x16xf32>
    %272 = vector.broadcast %270 : vector<1x2x16xf32> to vector<2x2x16xf32>
    %273 = arith.mulf %271, %272 : vector<2x2x16xf32>
    %274 = arith.addf %264, %273 : vector<2x2x16xf32>
    %c10_101 = arith.constant 10 : index
    %c0_102 = arith.constant 0 : index
    %c0_103 = arith.constant 0 : index
    %275 = vector.load %arg2[%c10_101, %c0_102, %c0_103] : memref<17x2x16xf32, #tpu.memory_space<vmem>>, vector<1x2x16xf32>
    %276 = vector.shape_cast %275 : vector<1x2x16xf32> to vector<2x16xf32>
    %277 = vector.shape_cast %276 : vector<2x16xf32> to vector<2x1x16xf32>
    %278 = vector.broadcast %277 : vector<2x1x16xf32> to vector<2x2x16xf32>
    %279 = arith.mulf %278, %274 : vector<2x2x16xf32>
    %cst_104 = arith.constant dense<0.000000e+00> : vector<2x16xf32>
    %280 = vector.multi_reduction <add>, %279, %cst_104 [0] : vector<2x2x16xf32> to vector<2x16xf32>
    %c10_105 = arith.constant 10 : index
    %c0_106 = arith.constant 0 : index
    %c0_107 = arith.constant 0 : index
    %281 = vector.load %arg5[%c10_105, %c0_106, %c0_107] : memref<17x2x16xf32, #tpu.memory_space<vmem>>, vector<1x2x16xf32>
    %282 = vector.shape_cast %281 : vector<1x2x16xf32> to vector<2x16xf32>
    %283 = vector.shape_cast %280 : vector<2x16xf32> to vector<1x2x16xf32>
    tpu.vector_store %arg5[%c10_105, %c0_106, %c0_107], %283 {strides = array<i32>} : memref<17x2x16xf32, #tpu.memory_space<vmem>>, vector<1x2x16xf32>,
    %284 = vector.extract_strided_slice %17 {offsets = [11, 0, 0], sizes = [1, 2, 16], strides = [1, 1, 1]} : vector<17x2x16xf32> to vector<1x2x16xf32>
    %285 = vector.shape_cast %284 : vector<1x2x16xf32> to vector<2x16xf32>
    %286 = vector.shape_cast %285 : vector<2x16xf32> to vector<2x1x16xf32>
    %287 = vector.broadcast %286 : vector<2x1x16xf32> to vector<2x2x16xf32>
    %288 = arith.mulf %287, %274 : vector<2x2x16xf32>
    %289 = vector.extract_strided_slice %19 {offsets = [11, 0, 0], sizes = [1, 2, 16], strides = [1, 1, 1]} : vector<17x2x16xf32> to vector<1x2x16xf32>
    %290 = vector.shape_cast %289 : vector<1x2x16xf32> to vector<2x16xf32>
    %291 = vector.shape_cast %290 : vector<2x16xf32> to vector<2x1x16xf32>
    %c11 = arith.constant 11 : index
    %c0_108 = arith.constant 0 : index
    %c0_109 = arith.constant 0 : index
    %292 = vector.load %arg4[%c11, %c0_108, %c0_109] : memref<17x2x16xf32, #tpu.memory_space<vmem>>, vector<1x2x16xf32>
    %293 = vector.shape_cast %292 : vector<1x2x16xf32> to vector<2x16xf32>
    %294 = vector.shape_cast %293 : vector<2x16xf32> to vector<1x2x16xf32>
    %295 = vector.broadcast %291 : vector<2x1x16xf32> to vector<2x2x16xf32>
    %296 = vector.broadcast %294 : vector<1x2x16xf32> to vector<2x2x16xf32>
    %297 = arith.mulf %295, %296 : vector<2x2x16xf32>
    %298 = arith.addf %288, %297 : vector<2x2x16xf32>
    %c11_110 = arith.constant 11 : index
    %c0_111 = arith.constant 0 : index
    %c0_112 = arith.constant 0 : index
    %299 = vector.load %arg2[%c11_110, %c0_111, %c0_112] : memref<17x2x16xf32, #tpu.memory_space<vmem>>, vector<1x2x16xf32>
    %300 = vector.shape_cast %299 : vector<1x2x16xf32> to vector<2x16xf32>
    %301 = vector.shape_cast %300 : vector<2x16xf32> to vector<2x1x16xf32>
    %302 = vector.broadcast %301 : vector<2x1x16xf32> to vector<2x2x16xf32>
    %303 = arith.mulf %302, %298 : vector<2x2x16xf32>
    %cst_113 = arith.constant dense<0.000000e+00> : vector<2x16xf32>
    %304 = vector.multi_reduction <add>, %303, %cst_113 [0] : vector<2x2x16xf32> to vector<2x16xf32>
    %c11_114 = arith.constant 11 : index
    %c0_115 = arith.constant 0 : index
    %c0_116 = arith.constant 0 : index
    %305 = vector.load %arg5[%c11_114, %c0_115, %c0_116] : memref<17x2x16xf32, #tpu.memory_space<vmem>>, vector<1x2x16xf32>
    %306 = vector.shape_cast %305 : vector<1x2x16xf32> to vector<2x16xf32>
    %307 = vector.shape_cast %304 : vector<2x16xf32> to vector<1x2x16xf32>
    tpu.vector_store %arg5[%c11_114, %c0_115, %c0_116], %307 {strides = array<i32>} : memref<17x2x16xf32, #tpu.memory_space<vmem>>, vector<1x2x16xf32>,
    %308 = vector.extract_strided_slice %17 {offsets = [12, 0, 0], sizes = [1, 2, 16], strides = [1, 1, 1]} : vector<17x2x16xf32> to vector<1x2x16xf32>
    %309 = vector.shape_cast %308 : vector<1x2x16xf32> to vector<2x16xf32>
    %310 = vector.shape_cast %309 : vector<2x16xf32> to vector<2x1x16xf32>
    %311 = vector.broadcast %310 : vector<2x1x16xf32> to vector<2x2x16xf32>
    %312 = arith.mulf %311, %298 : vector<2x2x16xf32>
    %313 = vector.extract_strided_slice %19 {offsets = [12, 0, 0], sizes = [1, 2, 16], strides = [1, 1, 1]} : vector<17x2x16xf32> to vector<1x2x16xf32>
    %314 = vector.shape_cast %313 : vector<1x2x16xf32> to vector<2x16xf32>
    %315 = vector.shape_cast %314 : vector<2x16xf32> to vector<2x1x16xf32>
    %c12 = arith.constant 12 : index
    %c0_117 = arith.constant 0 : index
    %c0_118 = arith.constant 0 : index
    %316 = vector.load %arg4[%c12, %c0_117, %c0_118] : memref<17x2x16xf32, #tpu.memory_space<vmem>>, vector<1x2x16xf32>
    %317 = vector.shape_cast %316 : vector<1x2x16xf32> to vector<2x16xf32>
    %318 = vector.shape_cast %317 : vector<2x16xf32> to vector<1x2x16xf32>
    %319 = vector.broadcast %315 : vector<2x1x16xf32> to vector<2x2x16xf32>
    %320 = vector.broadcast %318 : vector<1x2x16xf32> to vector<2x2x16xf32>
    %321 = arith.mulf %319, %320 : vector<2x2x16xf32>
    %322 = arith.addf %312, %321 : vector<2x2x16xf32>
    %c12_119 = arith.constant 12 : index
    %c0_120 = arith.constant 0 : index
    %c0_121 = arith.constant 0 : index
    %323 = vector.load %arg2[%c12_119, %c0_120, %c0_121] : memref<17x2x16xf32, #tpu.memory_space<vmem>>, vector<1x2x16xf32>
    %324 = vector.shape_cast %323 : vector<1x2x16xf32> to vector<2x16xf32>
    %325 = vector.shape_cast %324 : vector<2x16xf32> to vector<2x1x16xf32>
    %326 = vector.broadcast %325 : vector<2x1x16xf32> to vector<2x2x16xf32>
    %327 = arith.mulf %326, %322 : vector<2x2x16xf32>
    %cst_122 = arith.constant dense<0.000000e+00> : vector<2x16xf32>
    %328 = vector.multi_reduction <add>, %327, %cst_122 [0] : vector<2x2x16xf32> to vector<2x16xf32>
    %c12_123 = arith.constant 12 : index
    %c0_124 = arith.constant 0 : index
    %c0_125 = arith.constant 0 : index
    %329 = vector.load %arg5[%c12_123, %c0_124, %c0_125] : memref<17x2x16xf32, #tpu.memory_space<vmem>>, vector<1x2x16xf32>
    %330 = vector.shape_cast %329 : vector<1x2x16xf32> to vector<2x16xf32>
    %331 = vector.shape_cast %328 : vector<2x16xf32> to vector<1x2x16xf32>
    tpu.vector_store %arg5[%c12_123, %c0_124, %c0_125], %331 {strides = array<i32>} : memref<17x2x16xf32, #tpu.memory_space<vmem>>, vector<1x2x16xf32>,
    %332 = vector.extract_strided_slice %17 {offsets = [13, 0, 0], sizes = [1, 2, 16], strides = [1, 1, 1]} : vector<17x2x16xf32> to vector<1x2x16xf32>
    %333 = vector.shape_cast %332 : vector<1x2x16xf32> to vector<2x16xf32>
    %334 = vector.shape_cast %333 : vector<2x16xf32> to vector<2x1x16xf32>
    %335 = vector.broadcast %334 : vector<2x1x16xf32> to vector<2x2x16xf32>
    %336 = arith.mulf %335, %322 : vector<2x2x16xf32>
    %337 = vector.extract_strided_slice %19 {offsets = [13, 0, 0], sizes = [1, 2, 16], strides = [1, 1, 1]} : vector<17x2x16xf32> to vector<1x2x16xf32>
    %338 = vector.shape_cast %337 : vector<1x2x16xf32> to vector<2x16xf32>
    %339 = vector.shape_cast %338 : vector<2x16xf32> to vector<2x1x16xf32>
    %c13 = arith.constant 13 : index
    %c0_126 = arith.constant 0 : index
    %c0_127 = arith.constant 0 : index
    %340 = vector.load %arg4[%c13, %c0_126, %c0_127] : memref<17x2x16xf32, #tpu.memory_space<vmem>>, vector<1x2x16xf32>
    %341 = vector.shape_cast %340 : vector<1x2x16xf32> to vector<2x16xf32>
    %342 = vector.shape_cast %341 : vector<2x16xf32> to vector<1x2x16xf32>
    %343 = vector.broadcast %339 : vector<2x1x16xf32> to vector<2x2x16xf32>
    %344 = vector.broadcast %342 : vector<1x2x16xf32> to vector<2x2x16xf32>
    %345 = arith.mulf %343, %344 : vector<2x2x16xf32>
    %346 = arith.addf %336, %345 : vector<2x2x16xf32>
    %c13_128 = arith.constant 13 : index
    %c0_129 = arith.constant 0 : index
    %c0_130 = arith.constant 0 : index
    %347 = vector.load %arg2[%c13_128, %c0_129, %c0_130] : memref<17x2x16xf32, #tpu.memory_space<vmem>>, vector<1x2x16xf32>
    %348 = vector.shape_cast %347 : vector<1x2x16xf32> to vector<2x16xf32>
    %349 = vector.shape_cast %348 : vector<2x16xf32> to vector<2x1x16xf32>
    %350 = vector.broadcast %349 : vector<2x1x16xf32> to vector<2x2x16xf32>
    %351 = arith.mulf %350, %346 : vector<2x2x16xf32>
    %cst_131 = arith.constant dense<0.000000e+00> : vector<2x16xf32>
    %352 = vector.multi_reduction <add>, %351, %cst_131 [0] : vector<2x2x16xf32> to vector<2x16xf32>
    %c13_132 = arith.constant 13 : index
    %c0_133 = arith.constant 0 : index
    %c0_134 = arith.constant 0 : index
    %353 = vector.load %arg5[%c13_132, %c0_133, %c0_134] : memref<17x2x16xf32, #tpu.memory_space<vmem>>, vector<1x2x16xf32>
    %354 = vector.shape_cast %353 : vector<1x2x16xf32> to vector<2x16xf32>
    %355 = vector.shape_cast %352 : vector<2x16xf32> to vector<1x2x16xf32>
    tpu.vector_store %arg5[%c13_132, %c0_133, %c0_134], %355 {strides = array<i32>} : memref<17x2x16xf32, #tpu.memory_space<vmem>>, vector<1x2x16xf32>,
    %356 = vector.extract_strided_slice %17 {offsets = [14, 0, 0], sizes = [1, 2, 16], strides = [1, 1, 1]} : vector<17x2x16xf32> to vector<1x2x16xf32>
    %357 = vector.shape_cast %356 : vector<1x2x16xf32> to vector<2x16xf32>
    %358 = vector.shape_cast %357 : vector<2x16xf32> to vector<2x1x16xf32>
    %359 = vector.broadcast %358 : vector<2x1x16xf32> to vector<2x2x16xf32>
    %360 = arith.mulf %359, %346 : vector<2x2x16xf32>
    %361 = vector.extract_strided_slice %19 {offsets = [14, 0, 0], sizes = [1, 2, 16], strides = [1, 1, 1]} : vector<17x2x16xf32> to vector<1x2x16xf32>
    %362 = vector.shape_cast %361 : vector<1x2x16xf32> to vector<2x16xf32>
    %363 = vector.shape_cast %362 : vector<2x16xf32> to vector<2x1x16xf32>
    %c14 = arith.constant 14 : index
    %c0_135 = arith.constant 0 : index
    %c0_136 = arith.constant 0 : index
    %364 = vector.load %arg4[%c14, %c0_135, %c0_136] : memref<17x2x16xf32, #tpu.memory_space<vmem>>, vector<1x2x16xf32>
    %365 = vector.shape_cast %364 : vector<1x2x16xf32> to vector<2x16xf32>
    %366 = vector.shape_cast %365 : vector<2x16xf32> to vector<1x2x16xf32>
    %367 = vector.broadcast %363 : vector<2x1x16xf32> to vector<2x2x16xf32>
    %368 = vector.broadcast %366 : vector<1x2x16xf32> to vector<2x2x16xf32>
    %369 = arith.mulf %367, %368 : vector<2x2x16xf32>
    %370 = arith.addf %360, %369 : vector<2x2x16xf32>
    %c14_137 = arith.constant 14 : index
    %c0_138 = arith.constant 0 : index
    %c0_139 = arith.constant 0 : index
    %371 = vector.load %arg2[%c14_137, %c0_138, %c0_139] : memref<17x2x16xf32, #tpu.memory_space<vmem>>, vector<1x2x16xf32>
    %372 = vector.shape_cast %371 : vector<1x2x16xf32> to vector<2x16xf32>
    %373 = vector.shape_cast %372 : vector<2x16xf32> to vector<2x1x16xf32>
    %374 = vector.broadcast %373 : vector<2x1x16xf32> to vector<2x2x16xf32>
    %375 = arith.mulf %374, %370 : vector<2x2x16xf32>
    %cst_140 = arith.constant dense<0.000000e+00> : vector<2x16xf32>
    %376 = vector.multi_reduction <add>, %375, %cst_140 [0] : vector<2x2x16xf32> to vector<2x16xf32>
    %c14_141 = arith.constant 14 : index
    %c0_142 = arith.constant 0 : index
    %c0_143 = arith.constant 0 : index
    %377 = vector.load %arg5[%c14_141, %c0_142, %c0_143] : memref<17x2x16xf32, #tpu.memory_space<vmem>>, vector<1x2x16xf32>
    %378 = vector.shape_cast %377 : vector<1x2x16xf32> to vector<2x16xf32>
    %379 = vector.shape_cast %376 : vector<2x16xf32> to vector<1x2x16xf32>
    tpu.vector_store %arg5[%c14_141, %c0_142, %c0_143], %379 {strides = array<i32>} : memref<17x2x16xf32, #tpu.memory_space<vmem>>, vector<1x2x16xf32>,
    %380 = vector.extract_strided_slice %17 {offsets = [15, 0, 0], sizes = [1, 2, 16], strides = [1, 1, 1]} : vector<17x2x16xf32> to vector<1x2x16xf32>
    %381 = vector.shape_cast %380 : vector<1x2x16xf32> to vector<2x16xf32>
    %382 = vector.shape_cast %381 : vector<2x16xf32> to vector<2x1x16xf32>
    %383 = vector.broadcast %382 : vector<2x1x16xf32> to vector<2x2x16xf32>
    %384 = arith.mulf %383, %370 : vector<2x2x16xf32>
    %385 = vector.extract_strided_slice %19 {offsets = [15, 0, 0], sizes = [1, 2, 16], strides = [1, 1, 1]} : vector<17x2x16xf32> to vector<1x2x16xf32>
    %386 = vector.shape_cast %385 : vector<1x2x16xf32> to vector<2x16xf32>
    %387 = vector.shape_cast %386 : vector<2x16xf32> to vector<2x1x16xf32>
    %c15 = arith.constant 15 : index
    %c0_144 = arith.constant 0 : index
    %c0_145 = arith.constant 0 : index
    %388 = vector.load %arg4[%c15, %c0_144, %c0_145] : memref<17x2x16xf32, #tpu.memory_space<vmem>>, vector<1x2x16xf32>
    %389 = vector.shape_cast %388 : vector<1x2x16xf32> to vector<2x16xf32>
    %390 = vector.shape_cast %389 : vector<2x16xf32> to vector<1x2x16xf32>
    %391 = vector.broadcast %387 : vector<2x1x16xf32> to vector<2x2x16xf32>
    %392 = vector.broadcast %390 : vector<1x2x16xf32> to vector<2x2x16xf32>
    %393 = arith.mulf %391, %392 : vector<2x2x16xf32>
    %394 = arith.addf %384, %393 : vector<2x2x16xf32>
    %c15_146 = arith.constant 15 : index
    %c0_147 = arith.constant 0 : index
    %c0_148 = arith.constant 0 : index
    %395 = vector.load %arg2[%c15_146, %c0_147, %c0_148] : memref<17x2x16xf32, #tpu.memory_space<vmem>>, vector<1x2x16xf32>
    %396 = vector.shape_cast %395 : vector<1x2x16xf32> to vector<2x16xf32>
    %397 = vector.shape_cast %396 : vector<2x16xf32> to vector<2x1x16xf32>
    %398 = vector.broadcast %397 : vector<2x1x16xf32> to vector<2x2x16xf32>
    %399 = arith.mulf %398, %394 : vector<2x2x16xf32>
    %cst_149 = arith.constant dense<0.000000e+00> : vector<2x16xf32>
    %400 = vector.multi_reduction <add>, %399, %cst_149 [0] : vector<2x2x16xf32> to vector<2x16xf32>
    %c15_150 = arith.constant 15 : index
    %c0_151 = arith.constant 0 : index
    %c0_152 = arith.constant 0 : index
    %401 = vector.load %arg5[%c15_150, %c0_151, %c0_152] : memref<17x2x16xf32, #tpu.memory_space<vmem>>, vector<1x2x16xf32>
    %402 = vector.shape_cast %401 : vector<1x2x16xf32> to vector<2x16xf32>
    %403 = vector.shape_cast %400 : vector<2x16xf32> to vector<1x2x16xf32>
    tpu.vector_store %arg5[%c15_150, %c0_151, %c0_152], %403 {strides = array<i32>} : memref<17x2x16xf32, #tpu.memory_space<vmem>>, vector<1x2x16xf32>,
    %404 = vector.extract_strided_slice %17 {offsets = [16, 0, 0], sizes = [1, 2, 16], strides = [1, 1, 1]} : vector<17x2x16xf32> to vector<1x2x16xf32>
    %405 = vector.shape_cast %404 : vector<1x2x16xf32> to vector<2x16xf32>
    %406 = vector.shape_cast %405 : vector<2x16xf32> to vector<2x1x16xf32>
    %407 = vector.broadcast %406 : vector<2x1x16xf32> to vector<2x2x16xf32>
    %408 = arith.mulf %407, %394 : vector<2x2x16xf32>
    %409 = vector.extract_strided_slice %19 {offsets = [16, 0, 0], sizes = [1, 2, 16], strides = [1, 1, 1]} : vector<17x2x16xf32> to vector<1x2x16xf32>
    %410 = vector.shape_cast %409 : vector<1x2x16xf32> to vector<2x16xf32>
    %411 = vector.shape_cast %410 : vector<2x16xf32> to vector<2x1x16xf32>
    %c16 = arith.constant 16 : index
    %c0_153 = arith.constant 0 : index
    %c0_154 = arith.constant 0 : index
    %412 = vector.load %arg4[%c16, %c0_153, %c0_154] : memref<17x2x16xf32, #tpu.memory_space<vmem>>, vector<1x2x16xf32>
    %413 = vector.shape_cast %412 : vector<1x2x16xf32> to vector<2x16xf32>
    %414 = vector.shape_cast %413 : vector<2x16xf32> to vector<1x2x16xf32>
    %415 = vector.broadcast %411 : vector<2x1x16xf32> to vector<2x2x16xf32>
    %416 = vector.broadcast %414 : vector<1x2x16xf32> to vector<2x2x16xf32>
    %417 = arith.mulf %415, %416 : vector<2x2x16xf32>
    %418 = arith.addf %408, %417 : vector<2x2x16xf32>
    %c16_155 = arith.constant 16 : index
    %c0_156 = arith.constant 0 : index
    %c0_157 = arith.constant 0 : index
    %419 = vector.load %arg2[%c16_155, %c0_156, %c0_157] : memref<17x2x16xf32, #tpu.memory_space<vmem>>, vector<1x2x16xf32>
    %420 = vector.shape_cast %419 : vector<1x2x16xf32> to vector<2x16xf32>
    %421 = vector.shape_cast %420 : vector<2x16xf32> to vector<2x1x16xf32>
    %422 = vector.broadcast %421 : vector<2x1x16xf32> to vector<2x2x16xf32>
    %423 = arith.mulf %422, %418 : vector<2x2x16xf32>
    %cst_158 = arith.constant dense<0.000000e+00> : vector<2x16xf32>
    %424 = vector.multi_reduction <add>, %423, %cst_158 [0] : vector<2x2x16xf32> to vector<2x16xf32>
    %c16_159 = arith.constant 16 : index
    %c0_160 = arith.constant 0 : index
    %c0_161 = arith.constant 0 : index
    %425 = vector.load %arg5[%c16_159, %c0_160, %c0_161] : memref<17x2x16xf32, #tpu.memory_space<vmem>>, vector<1x2x16xf32>
    %426 = vector.shape_cast %425 : vector<1x2x16xf32> to vector<2x16xf32>
    %427 = vector.shape_cast %424 : vector<2x16xf32> to vector<1x2x16xf32>
    tpu.vector_store %arg5[%c16_159, %c0_160, %c0_161], %427 {strides = array<i32>} : memref<17x2x16xf32, #tpu.memory_space<vmem>>, vector<1x2x16xf32>,
    return
  }
  func.func @transform_0(%arg0: i32) -> (i32, i32) {
    %c0_i32 = arith.constant 0 : i32
    %c0_i32_0 = arith.constant 0 : i32
    return %c0_i32, %arg0 : i32, i32
  }
  func.func @transform_1(%arg0: i32) -> (i32, i32, i32) {
    %c0_i32 = arith.constant 0 : i32
    %c0_i32_0 = arith.constant 0 : i32
    %c0_i32_1 = arith.constant 0 : i32
    return %c0_i32, %c0_i32_0, %arg0 : i32, i32, i32
  }
  func.func @transform_2(%arg0: i32) -> (i32, i32, i32) {
    %c0_i32 = arith.constant 0 : i32
    %c0_i32_0 = arith.constant 0 : i32
    %c0_i32_1 = arith.constant 0 : i32
    return %c0_i32, %c0_i32_0, %arg0 : i32, i32, i32
  }
  func.func @transform_3(%arg0: i32) -> (i32, i32, i32) {
    %c0_i32 = arith.constant 0 : i32
    %c0_i32_0 = arith.constant 0 : i32
    %c0_i32_1 = arith.constant 0 : i32
    return %c0_i32, %c0_i32_0, %arg0 : i32, i32, i32
  }
  func.func @transform_4(%arg0: i32) -> (i32, i32, i32) {
    %c0_i32 = arith.constant 0 : i32
    %c0_i32_0 = arith.constant 0 : i32
    %c0_i32_1 = arith.constant 0 : i32
    return %c0_i32, %c0_i32_0, %arg0 : i32, i32, i32
  }
}

module attributes {stable_mosaic.version = 11 : i64} {
  func.func @kernel(%arg0: i32, %arg1: i32, %arg2: memref<34x32xf32, #tpu.memory_space<vmem>>, %arg3: memref<32x64xf32, #tpu.memory_space<vmem>>, %arg4: memref<1x64xf32, #tpu.memory_space<vmem>>, %arg5: memref<34x64xf32, #tpu.memory_space<vmem>>) attributes {dimension_semantics = [#tpu.dimension_semantics<parallel>, #tpu.dimension_semantics<parallel>], iteration_bounds = array<i64: 1, 1>, scalar_prefetch = 0 : i64, scratch_operands = 0 : i64, tpu.core_type = #tpu.core_type<tc>, window_params = [{transform_indices = @transform_0, window_bounds = array<i64: 34, 32>}, {transform_indices = @transform_1, window_bounds = array<i64: 32, 64>}, {transform_indices = @transform_2, window_bounds = array<i64: 1, 64>}, {transform_indices = @transform_3, window_bounds = array<i64: 34, 64>}]} {
    %c0 = arith.constant 0 : index
    %c0_0 = arith.constant 0 : index
    %0 = vector.load %arg2[%c0, %c0_0] : memref<34x32xf32, #tpu.memory_space<vmem>>, vector<34x32xf32>
    %1 = arith.mulf %0, %0 : vector<34x32xf32>
    %cst = arith.constant dense<0.000000e+00> : vector<34xf32>
    %2 = vector.multi_reduction <add>, %1, %cst [1] : vector<34x32xf32> to vector<34xf32>
    %3 = vector.shape_cast %2 : vector<34xf32> to vector<34x1xf32>
    %cst_1 = arith.constant 3.200000e+01 : f32
    %4 = vector.broadcast %cst_1 : f32 to vector<34x1xf32>
    %5 = arith.divf %3, %4 : vector<34x1xf32>
    %cst_2 = arith.constant 9.99999997E-7 : f32
    %6 = vector.broadcast %cst_2 : f32 to vector<34x1xf32>
    %7 = arith.addf %5, %6 : vector<34x1xf32>
    %8 = math.rsqrt %7 : vector<34x1xf32>
    %9 = vector.broadcast %8 : vector<34x1xf32> to vector<34x32xf32>
    %10 = arith.mulf %0, %9 : vector<34x32xf32>
    %c0_3 = arith.constant 0 : index
    %c0_4 = arith.constant 0 : index
    %11 = vector.load %arg3[%c0_3, %c0_4] : memref<32x64xf32, #tpu.memory_space<vmem>>, vector<32x64xf32>
    %cst_5 = arith.constant dense<0.000000e+00> : vector<34x64xf32>
    %12 = tpu.matmul %10, %11, %cst_5 {dimension_numbers = #tpu.dot_dimension_numbers<[1], [0], [0], [1], [0, 0, 1, 1], [], []>} : vector<34x32xf32>, vector<32x64xf32>, vector<34x64xf32> -> vector<34x64xf32>
    %c0_6 = arith.constant 0 : index
    %c0_7 = arith.constant 0 : index
    %13 = vector.load %arg4[%c0_6, %c0_7] : memref<1x64xf32, #tpu.memory_space<vmem>>, vector<1x64xf32>
    %14 = vector.broadcast %13 : vector<1x64xf32> to vector<34x64xf32>
    %15 = arith.addf %12, %14 : vector<34x64xf32>
    %c0_8 = arith.constant 0 : index
    %c0_9 = arith.constant 0 : index
    %16 = vector.load %arg5[%c0_8, %c0_9] : memref<34x64xf32, #tpu.memory_space<vmem>>, vector<34x64xf32>
    tpu.vector_store %arg5[%c0_8, %c0_9], %15 {strides = array<i32>} : memref<34x64xf32, #tpu.memory_space<vmem>>, vector<34x64xf32>,
    return
  }
  func.func @transform_0(%arg0: i32, %arg1: i32) -> (i32, i32) {
    %c0_i32 = arith.constant 0 : i32
    %c0_i32_0 = arith.constant 0 : i32
    return %arg0, %c0_i32 : i32, i32
  }
  func.func @transform_1(%arg0: i32, %arg1: i32) -> (i32, i32) {
    %c0_i32 = arith.constant 0 : i32
    %c0_i32_0 = arith.constant 0 : i32
    return %c0_i32, %arg1 : i32, i32
  }
  func.func @transform_2(%arg0: i32, %arg1: i32) -> (i32, i32) {
    %c0_i32 = arith.constant 0 : i32
    %c0_i32_0 = arith.constant 0 : i32
    return %c0_i32, %arg1 : i32, i32
  }
  func.func @transform_3(%arg0: i32, %arg1: i32) -> (i32, i32) {
    %c0_i32 = arith.constant 0 : i32
    return %arg0, %arg1 : i32, i32
  }
}

module attributes {stable_mosaic.version = 11 : i64} {
  func.func @kernel(%arg0: i32, %arg1: i32, %arg2: memref<34x64xf32, #tpu.memory_space<vmem>>, %arg3: memref<64x32xf32, #tpu.memory_space<vmem>>, %arg4: memref<1x32xf32, #tpu.memory_space<vmem>>, %arg5: memref<34x32xf32, #tpu.memory_space<vmem>>, %arg6: memref<34x32xf32, #tpu.memory_space<vmem>>) attributes {dimension_semantics = [#tpu.dimension_semantics<parallel>, #tpu.dimension_semantics<parallel>], iteration_bounds = array<i64: 1, 1>, scalar_prefetch = 0 : i64, scratch_operands = 0 : i64, tpu.core_type = #tpu.core_type<tc>, window_params = [{transform_indices = @transform_0, window_bounds = array<i64: 34, 64>}, {transform_indices = @transform_1, window_bounds = array<i64: 64, 32>}, {transform_indices = @transform_2, window_bounds = array<i64: 1, 32>}, {transform_indices = @transform_3, window_bounds = array<i64: 34, 32>}, {transform_indices = @transform_4, window_bounds = array<i64: 34, 32>}]} {
    %c0 = arith.constant 0 : index
    %c0_0 = arith.constant 0 : index
    %0 = vector.load %arg2[%c0, %c0_0] : memref<34x64xf32, #tpu.memory_space<vmem>>, vector<34x64xf32>
    %c0_1 = arith.constant 0 : index
    %c0_2 = arith.constant 0 : index
    %1 = vector.load %arg3[%c0_1, %c0_2] : memref<64x32xf32, #tpu.memory_space<vmem>>, vector<64x32xf32>
    %cst = arith.constant dense<0.000000e+00> : vector<34x32xf32>
    %2 = tpu.matmul %0, %1, %cst {dimension_numbers = #tpu.dot_dimension_numbers<[1], [0], [0], [1], [0, 0, 1, 1], [], []>} : vector<34x64xf32>, vector<64x32xf32>, vector<34x32xf32> -> vector<34x32xf32>
    %c0_3 = arith.constant 0 : index
    %c0_4 = arith.constant 0 : index
    %3 = vector.load %arg4[%c0_3, %c0_4] : memref<1x32xf32, #tpu.memory_space<vmem>>, vector<1x32xf32>
    %4 = vector.broadcast %3 : vector<1x32xf32> to vector<34x32xf32>
    %5 = arith.addf %2, %4 : vector<34x32xf32>
    %c0_5 = arith.constant 0 : index
    %c0_6 = arith.constant 0 : index
    %6 = vector.load %arg5[%c0_5, %c0_6] : memref<34x32xf32, #tpu.memory_space<vmem>>, vector<34x32xf32>
    %7 = arith.addf %5, %6 : vector<34x32xf32>
    %c0_7 = arith.constant 0 : index
    %c0_8 = arith.constant 0 : index
    %8 = vector.load %arg6[%c0_7, %c0_8] : memref<34x32xf32, #tpu.memory_space<vmem>>, vector<34x32xf32>
    tpu.vector_store %arg6[%c0_7, %c0_8], %7 {strides = array<i32>} : memref<34x32xf32, #tpu.memory_space<vmem>>, vector<34x32xf32>,
    return
  }
  func.func @transform_0(%arg0: i32, %arg1: i32) -> (i32, i32) {
    %c0_i32 = arith.constant 0 : i32
    %c0_i32_0 = arith.constant 0 : i32
    return %arg0, %c0_i32 : i32, i32
  }
  func.func @transform_1(%arg0: i32, %arg1: i32) -> (i32, i32) {
    %c0_i32 = arith.constant 0 : i32
    %c0_i32_0 = arith.constant 0 : i32
    return %c0_i32, %arg1 : i32, i32
  }
  func.func @transform_2(%arg0: i32, %arg1: i32) -> (i32, i32) {
    %c0_i32 = arith.constant 0 : i32
    %c0_i32_0 = arith.constant 0 : i32
    return %c0_i32, %arg1 : i32, i32
  }
  func.func @transform_3(%arg0: i32, %arg1: i32) -> (i32, i32) {
    %c0_i32 = arith.constant 0 : i32
    return %arg0, %arg1 : i32, i32
  }
  func.func @transform_4(%arg0: i32, %arg1: i32) -> (i32, i32) {
    %c0_i32 = arith.constant 0 : i32
    return %arg0, %arg1 : i32, i32
  }
}

module attributes {stable_mosaic.version = 11 : i64} {
  func.func @kernel(%arg0: i32, %arg1: i32, %arg2: memref<2x32xf32, #tpu.memory_space<vmem>>, %arg3: memref<32x10xf32, #tpu.memory_space<vmem>>, %arg4: memref<1x32xf32, #tpu.memory_space<vmem>>, %arg5: memref<1x32xf32, #tpu.memory_space<vmem>>, %arg6: memref<1x10xf32, #tpu.memory_space<vmem>>, %arg7: memref<2x10xf32, #tpu.memory_space<vmem>>) attributes {dimension_semantics = [#tpu.dimension_semantics<parallel>, #tpu.dimension_semantics<parallel>], iteration_bounds = array<i64: 1, 1>, scalar_prefetch = 0 : i64, scratch_operands = 0 : i64, tpu.core_type = #tpu.core_type<tc>, window_params = [{transform_indices = @transform_0, window_bounds = array<i64: 2, 32>}, {transform_indices = @transform_1, window_bounds = array<i64: 32, 10>}, {pipeline_mode = #tpu.pipeline_mode<synchronous>, transform_indices = @transform_2, window_bounds = array<i64: 1, 32>}, {pipeline_mode = #tpu.pipeline_mode<synchronous>, transform_indices = @transform_3, window_bounds = array<i64: 1, 32>}, {transform_indices = @transform_4, window_bounds = array<i64: 1, 10>}, {transform_indices = @transform_5, window_bounds = array<i64: 2, 10>}]} {
    %c0 = arith.constant 0 : index
    %c0_0 = arith.constant 0 : index
    %0 = vector.load %arg2[%c0, %c0_0] : memref<2x32xf32, #tpu.memory_space<vmem>>, vector<2x32xf32>
    %1 = arith.mulf %0, %0 : vector<2x32xf32>
    %cst = arith.constant dense<0.000000e+00> : vector<2xf32>
    %2 = vector.multi_reduction <add>, %1, %cst [1] : vector<2x32xf32> to vector<2xf32>
    %3 = vector.shape_cast %2 : vector<2xf32> to vector<2x1xf32>
    %cst_1 = arith.constant 3.200000e+01 : f32
    %4 = vector.broadcast %cst_1 : f32 to vector<2x1xf32>
    %5 = arith.divf %3, %4 : vector<2x1xf32>
    %cst_2 = arith.constant 9.99999997E-7 : f32
    %6 = vector.broadcast %cst_2 : f32 to vector<2x1xf32>
    %7 = arith.addf %5, %6 : vector<2x1xf32>
    %8 = math.rsqrt %7 : vector<2x1xf32>
    %9 = vector.broadcast %8 : vector<2x1xf32> to vector<2x32xf32>
    %10 = arith.mulf %0, %9 : vector<2x32xf32>
    %cst_3 = arith.constant dense<0.000000e+00> : vector<2xf32>
    %11 = vector.multi_reduction <add>, %10, %cst_3 [1] : vector<2x32xf32> to vector<2xf32>
    %12 = vector.shape_cast %11 : vector<2xf32> to vector<2x1xf32>
    %cst_4 = arith.constant 3.200000e+01 : f32
    %13 = vector.broadcast %cst_4 : f32 to vector<2x1xf32>
    %14 = arith.divf %12, %13 : vector<2x1xf32>
    %15 = vector.broadcast %14 : vector<2x1xf32> to vector<2x32xf32>
    %16 = arith.subf %10, %15 : vector<2x32xf32>
    %17 = arith.mulf %16, %16 : vector<2x32xf32>
    %cst_5 = arith.constant dense<0.000000e+00> : vector<2xf32>
    %18 = vector.multi_reduction <add>, %17, %cst_5 [1] : vector<2x32xf32> to vector<2xf32>
    %19 = vector.shape_cast %18 : vector<2xf32> to vector<2x1xf32>
    %cst_6 = arith.constant 3.200000e+01 : f32
    %20 = vector.broadcast %cst_6 : f32 to vector<2x1xf32>
    %21 = arith.divf %19, %20 : vector<2x1xf32>
    %cst_7 = arith.constant 9.99999974E-6 : f32
    %22 = vector.broadcast %cst_7 : f32 to vector<2x1xf32>
    %23 = arith.addf %21, %22 : vector<2x1xf32>
    %24 = math.rsqrt %23 : vector<2x1xf32>
    %25 = vector.broadcast %24 : vector<2x1xf32> to vector<2x32xf32>
    %26 = arith.mulf %16, %25 : vector<2x32xf32>
    %c0_8 = arith.constant 0 : index
    %c0_9 = arith.constant 0 : index
    %27 = vector.load %arg4[%c0_8, %c0_9] : memref<1x32xf32, #tpu.memory_space<vmem>>, vector<1x32xf32>
    %28 = vector.broadcast %27 : vector<1x32xf32> to vector<2x32xf32>
    %29 = arith.mulf %26, %28 : vector<2x32xf32>
    %c0_10 = arith.constant 0 : index
    %c0_11 = arith.constant 0 : index
    %30 = vector.load %arg5[%c0_10, %c0_11] : memref<1x32xf32, #tpu.memory_space<vmem>>, vector<1x32xf32>
    %31 = vector.broadcast %30 : vector<1x32xf32> to vector<2x32xf32>
    %32 = arith.addf %29, %31 : vector<2x32xf32>
    %c0_12 = arith.constant 0 : index
    %c0_13 = arith.constant 0 : index
    %33 = vector.load %arg3[%c0_12, %c0_13] : memref<32x10xf32, #tpu.memory_space<vmem>>, vector<32x10xf32>
    %cst_14 = arith.constant dense<0.000000e+00> : vector<2x10xf32>
    %34 = tpu.matmul %32, %33, %cst_14 {dimension_numbers = #tpu.dot_dimension_numbers<[1], [0], [0], [1], [0, 0, 1, 1], [], []>} : vector<2x32xf32>, vector<32x10xf32>, vector<2x10xf32> -> vector<2x10xf32>
    %c0_15 = arith.constant 0 : index
    %c0_16 = arith.constant 0 : index
    %35 = vector.load %arg6[%c0_15, %c0_16] : memref<1x10xf32, #tpu.memory_space<vmem>>, vector<1x10xf32>
    %36 = vector.broadcast %35 : vector<1x10xf32> to vector<2x10xf32>
    %37 = arith.addf %34, %36 : vector<2x10xf32>
    %c0_17 = arith.constant 0 : index
    %c0_18 = arith.constant 0 : index
    %38 = vector.load %arg7[%c0_17, %c0_18] : memref<2x10xf32, #tpu.memory_space<vmem>>, vector<2x10xf32>
    tpu.vector_store %arg7[%c0_17, %c0_18], %37 {strides = array<i32>} : memref<2x10xf32, #tpu.memory_space<vmem>>, vector<2x10xf32>,
    return
  }
  func.func @transform_0(%arg0: i32, %arg1: i32) -> (i32, i32) {
    %c0_i32 = arith.constant 0 : i32
    %c0_i32_0 = arith.constant 0 : i32
    return %arg0, %c0_i32 : i32, i32
  }
  func.func @transform_1(%arg0: i32, %arg1: i32) -> (i32, i32) {
    %c0_i32 = arith.constant 0 : i32
    %c0_i32_0 = arith.constant 0 : i32
    return %c0_i32, %arg1 : i32, i32
  }
  func.func @transform_2(%arg0: i32, %arg1: i32) -> (i32, i32) {
    %c0_i32 = arith.constant 0 : i32
    %c0_i32_0 = arith.constant 0 : i32
    %c0_i32_1 = arith.constant 0 : i32
    return %c0_i32, %c0_i32_0 : i32, i32
  }
  func.func @transform_3(%arg0: i32, %arg1: i32) -> (i32, i32) {
    %c0_i32 = arith.constant 0 : i32
    %c0_i32_0 = arith.constant 0 : i32
    %c0_i32_1 = arith.constant 0 : i32
    return %c0_i32, %c0_i32_0 : i32, i32
  }
  func.func @transform_4(%arg0: i32, %arg1: i32) -> (i32, i32) {
    %c0_i32 = arith.constant 0 : i32
    %c0_i32_0 = arith.constant 0 : i32
    return %c0_i32, %arg1 : i32, i32
  }
  func.func @transform_5(%arg0: i32, %arg1: i32) -> (i32, i32) {
    %c0_i32 = arith.constant 0 : i32
    return %arg0, %arg1 : i32, i32
  }
}

</mosaic_0001>

<bundles_post_ra>
// kernel: forward.13
= control target key start
LH: loop header
LB: loop body
LE: loop exit
PB: predicated region body
PF: predicated region fallthrough
CT: control target
= control target key end

     0   :  { %vm21_vm0 = vcmask 261120   ;;  %vm34_vm1 = vcmask 254976   ;;  %v236_v15 = vmov 0.0   ;;  %vm237_vm2 = vmmov 0   ;;  %s334_s0 = inlined_call_operand.vmem [shape: f32[34,32], index: 0, kind: input, shape index: {}]   ;;  %s335_s1 = inlined_call_operand.vmem [shape: f32[32,48], index: 1, kind: input, shape index: {}]   ;;  %s336_s2 = inlined_call_operand.vmem [shape: f32[34,48], index: 2, kind: output, shape index: {}]  }
   0x1   :  { %v256_v0 = vld [vmem:[%s334_s0] sm:$0xff]  ;;  %v261_v1 = vld [vmem:[%s334_s0 + $0x18] sm:$0xff]  ;;  %v266_v2 = vld [vmem:[%s334_s0 + $0x8] sm:$0xff]  ;;  %193 = vmatprep.subr.mxu0 %v236_v15  ;;  %216 = vmatprep.subr.mxu1 %v236_v15  ;;  %vm168_vm3 = vcmask 392192   ;;  %vm173_vm4 = vcmask 386048  }
   0x2   :  { %v16_v3 = vmul.f32 %v256_v0, %v256_v0  ;;  %v19_v4 = vmul.f32 %v261_v1, %v261_v1  ;;  %v17_v5 = vmul.f32 %v266_v2, %v266_v2  ;;  %v277_v6 = vld [vmem:[%s334_s0 + $0x10] sm:$0xff]  ;;  %v284_v8 = vld [vmem:[%s334_s0 + $0x20] sm:$0x3]  ;;  %v62_v16 = vld [vmem:[%s335_s1 + $0x18] sm:$0xff]  ;;  %201 = vmatprep.mubr.msk.f32.mxu0 %vm237_vm2, %v236_v15  ;;  %210 = vmatprep.mubr.msk.f32.mxu1 %vm237_vm2, %v236_v15 }
   0x3   :  { %v18_v7 = vmul.f32 %v277_v6, %v277_v6  ;;  %v20_v13 = vmul.f32 %v284_v8, %v284_v8  ;;  %v61_v17 = vld [vmem:[%s335_s1 + $0x10] sm:$0xff]  ;;  %194 = vmatpush3.msra.mxu0 %v62_v16  ;;  %220 = vmatpush3.msra.mxu1 %v62_v16  ;;  %v60_v18 = vld [vmem:[%s335_s1 + $0x8] sm:$0xff]  ;;  %v59_v19 = vld [vmem:[%s335_s1] sm:$0xff] }
   0x4   :  { %v22_v9 = vsel %vm21_vm0, %v16_v3, 0.0  ;;  %v31_v10 = vsel %vm21_vm0, %v19_v4, 0.0  ;;  %v25_v11 = vsel %vm21_vm0, %v17_v5, 0.0  ;;  %195 = vmatprep.subr.mxu0 %v236_v15  ;;  %217 = vmatprep.subr.mxu1 %v236_v15 }
   0x5   :  { %23 = vadd.xlane.f32.xlu0 %v22_v9  ;;  %32 = vadd.xlane.f32.xlu1 %v31_v10  ;;  %v28_v12 = vsel %vm21_vm0, %v18_v7, 0.0  ;;  %v35_v14 = vsel %vm34_vm1, %v20_v13, 0.0 }
   0x6   :  { %196 = vmatpush3.msra.mxu0 %v61_v17  ;;  %221 = vmatpush3.msra.mxu1 %v61_v17 }
   0x7   :  { %197 = vmatprep.subr.mxu0 %v236_v15  ;;  %218 = vmatprep.subr.mxu1 %v236_v15 }
   0x8   :  { %198 = vmatpush3.msra.mxu0 %v60_v18  ;;  %222 = vmatpush3.msra.mxu1 %v60_v18 }
   0x9   :  { %26 = vadd.xlane.f32.xlu0 %v25_v11  ;;  %29 = vadd.xlane.f32.xlu1 %v28_v12 }
   0xa   :  { %199 = vmatprep.subr.mxu0 %v236_v15  ;;  %219 = vmatprep.subr.mxu1 %v236_v15 }
   0xb   :  { %200 = vmatpush3.msra.mxu0 %v59_v19  ;;  %223 = vmatpush3.msra.mxu1 %v59_v19 }
   0xd   :  { %36 = vadd.xlane.f32.xlu0 %v35_v14 }
  0x8e   :  { %v24_v20 = vpop.xlane.xlu0 %23  ;;  %v33_v21 = vpop.xlane.xlu1 %32 }
  0x8f   :  { %v39_v22 = vmul.f32 0.03125, %v24_v20  ;;  %v42_v23 = vmul.f32 0.03125, %v33_v21 }
  0x91   :  { %v44_v24 = vadd.f32 1e-06, %v39_v22  ;;  %v47_v25 = vadd.f32 1e-06, %v42_v23 }
  0x92   :  { %v27_v26 = vpop.xlane.xlu0 %26  ;;  %v30_v27 = vpop.xlane.xlu1 %29 }
  0x93   :  { %226 = vrsqrt.f32 %v44_v24  ;;  %v40_v28 = vmul.f32 0.03125, %v27_v26  ;;  %v41_v29 = vmul.f32 0.03125, %v30_v27 }
  0x94   :  { %228 = vrsqrt.f32 %v47_v25 }
  0x95   :  { %v45_v30 = vadd.f32 1e-06, %v40_v28  ;;  %v46_v31 = vadd.f32 1e-06, %v41_v29 }
  0x96   :  { %v37_v32 = vpop.xlane.xlu0 %36 }
  0x97   :  { %230 = vrsqrt.f32 %v45_v30  ;;  %v43_v33 = vmul.f32 0.03125, %v37_v32 }
  0x98   :  { %232 = vrsqrt.f32 %v46_v31 }
  0x99   :  { %v48_v34 = vadd.f32 1e-06, %v43_v33 }
  0x9b   :  { %234 = vrsqrt.f32 %v48_v34 }
  0xa0   :  { %v227_v35 = vpop.eup %226 }
  0xa1   :  { %v229_v36 = vpop.eup %228  ;;  %v54_v37 = vmul.f32 %v227_v35, %v256_v0 }
  0xa2   :  { %v57_v38 = vmul.f32 %v229_v36, %v261_v1 }
  0xa3   :  { %202 = vmatmul.mubr.msk.f32.vlgmr.msra.gmra.mxu0 %vm21_vm0, %v54_v37 }
  0xa4   :  { %v231_v39 = vpop.eup %230  ;;  %211 = vmatmul.mubr.msk.f32.vlgmr.msra.gmra.mxu1 %vm21_vm0, %v57_v38  ;;  %204 = vmatprep.mubr.msk.f32.mxu0 %vm237_vm2, %v236_v15 }
  0xa5   :  { %v233_v40 = vpop.eup %232  ;;  %v55_v41 = vmul.f32 %v231_v39, %v266_v2  ;;  %213 = vmatprep.mubr.msk.f32.mxu1 %vm237_vm2, %v236_v15 }
  0xa6   :  { %v56_v42 = vmul.f32 %v233_v40, %v277_v6 }
  0xa7   :  { %205 = vmatmul.mubr.msk.f32.gmra.mxu0 %vm21_vm0, %v55_v41 }
  0xa8   :  { %v235_v43 = vpop.eup %234  ;;  %207 = vmatprep.mubr.msk.f32.mxu0 %vm237_vm2, %v236_v15 }
  0xa9   :  { %v58_v44 = vmul.f32 %v235_v43, %v284_v8 }
  0xab   :  { %208 = vmatmul.mubr.msk.f32.gmra.mxu0 %vm21_vm0, %v56_v42  ;;  %214 = vmatmul.mubr.msk.f32.gmra.mxu1 %vm21_vm0, %v58_v44 }
 0x163   :  { %v144_v45 = vpop.f32.mrf.mxu0 }
 0x164   :  { %169 = vst.msk [vmem:[%s336_s2] sm:$0xff] %vm168_vm3, %v144_v45  ;;  %v159_v46 = vpop.f32.mrf.mxu1 }
 0x165   :  { %v203_v47 = vpop.f32.mrf.mxu0  ;;  %172 = vst.msk [vmem:[%s336_s2 + $0x18] sm:$0xff] %vm168_vm3, %v159_v46 }
 0x166   :  { %v212_v48 = vpop.f32.mrf.mxu1 }
 0x167   :  { %v149_v49 = vpop.f32.mrf.mxu0 }
 0x168   :  { %170 = vst.msk [vmem:[%s336_s2 + $0x8] sm:$0xff] %vm168_vm3, %v149_v49 }
 0x169   :  { %v206_v50 = vpop.f32.mrf.mxu0 }
 0x16b   :  { %v154_v51 = vpop.f32.mrf.mxu0  ;;  %v164_v52 = vpop.f32.mrf.mxu1 }
 0x16c   :  { %171 = vst.msk [vmem:[%s336_s2 + $0x10] sm:$0xff] %vm168_vm3, %v154_v51 }
 0x16d   :  { %174 = vst.msk [vmem:[%s336_s2 + $0x20] sm:$0x3] %vm173_vm4, %v164_v52  ;;  %v209_v53 = vpop.f32.mrf.mxu0  ;;  %v215_v54 = vpop.f32.mrf.mxu1 }

// kernel: forward.12
= control target key start
LH: loop header
LB: loop body
LE: loop exit
PB: predicated region body
PF: predicated region fallthrough
CT: control target
= control target key end

     0   :  { %vm28_vm0 = vcmask 916480   ;;  %v359_v16 = vmov 0.0   ;;  %vm276_vm1 = vcmask 261120   ;;  %s669_s0 = inlined_call_operand.vmem [shape: f32[32,240], index: 0, kind: input, shape index: {}]   ;;  %s670_s1 = inlined_call_operand.vmem [shape: f32[240,32], index: 1, kind: input, shape index: {}]   ;;  %s671_s2 = inlined_call_operand.vmem [shape: f32[1,240], index: 2, kind: input, shape index: {}]   ;;  %s672_s3 = inlined_call_operand.vmem [shape: f32[1,240], index: 3, kind: input, shape index: {}]   ;;  %s673_s4 = inlined_call_operand.vmem [shape: f32[1,32], index: 4, kind: input, shape index: {}]   ;;  %s674_s5 = inlined_call_operand.vmem [shape: f32[32,32], index: 5, kind: output, shape index: {}]  }
   0x1   :  { %v393_v0 = vld [vmem:[%s669_s0] sm:$0xff]  ;;  %v398_v1 = vld [vmem:[%s669_s0 + $0x8] sm:$0xff]  ;;  %v403_v2 = vld [vmem:[%s669_s0 + $0x10] sm:$0xff]  ;;  %191 = vmatprep.subr.mxu0 %v359_v16  ;;  %290 = vmatprep.subr.mxu1 %v359_v16 }
   0x2   :  { %v29_v3 = vsel %vm28_vm0, %v398_v1, 0.0  ;;  %v410_v4 = vld [vmem:[%s669_s0 + $0x18] sm:$0xff]  ;;  %v415_v5 = vld [vmem:[%s669_s0 + $0x20] sm:$0xff]  ;;  %v420_v6 = vld [vmem:[%s669_s0 + $0x28] sm:$0xff] }
   0x3   :  { %v30_v7 = vadd.f32 %v29_v3, %v393_v0  ;;  %v33_v8 = vsel %vm28_vm0, %v410_v4, 0.0  ;;  %v37_v9 = vsel %vm28_vm0, %v420_v6, 0.0  ;;  %v430_v10 = vld [vmem:[%s669_s0 + $0x30] sm:$0xff]  ;;  %v435_v11 = vld [vmem:[%s669_s0 + $0x38] sm:$0xff]  ;;  %v155_v19 = vld [vmem:[%s670_s1 + $0x68] sm:$0xff] }
   0x4   :  { %v34_v12 = vadd.f32 %v33_v8, %v403_v2  ;;  %v41_v13 = vsel %vm28_vm0, %v435_v11, 0.0  ;;  %v38_v14 = vadd.f32 %v37_v9, %v415_v5  ;;  %v157_v17 = vld [vmem:[%s670_s1 + $0x78] sm:$0xff]  ;;  %v156_v18 = vld [vmem:[%s670_s1 + $0x70] sm:$0xff]  ;;  %v154_v20 = vld [vmem:[%s670_s1 + $0x60] sm:$0xff] }
   0x5   :  { %31 = vadd.xlane.f32.xlu0 %v30_v7  ;;  %v42_v15 = vadd.f32 %v41_v13, %v430_v10  ;;  %192 = vmatpush1.msra.mxu0 %v157_v17  ;;  %v153_v21 = vld [vmem:[%s670_s1 + $0x58] sm:$0xff]  ;;  %v152_v22 = vld [vmem:[%s670_s1 + $0x50] sm:$0xff]  ;;  %v151_v23 = vld [vmem:[%s670_s1 + $0x48] sm:$0xff] }
   0x6   :  { %35 = vadd.xlane.f32.xlu1 %v34_v12  ;;  %320 = vmatpush1.msra.mxu1 %v157_v17  ;;  %v150_v24 = vld [vmem:[%s670_s1 + $0x40] sm:$0xff]  ;;  %v149_v25 = vld [vmem:[%s670_s1 + $0x38] sm:$0xff]  ;;  %v148_v26 = vld [vmem:[%s670_s1 + $0x30] sm:$0xff] }
   0x7   :  { %193 = vmatprep.subr.mxu0 %v359_v16  ;;  %291 = vmatprep.subr.mxu1 %v359_v16  ;;  %v147_v27 = vld [vmem:[%s670_s1 + $0x28] sm:$0xff]  ;;  %v146_v28 = vld [vmem:[%s670_s1 + $0x20] sm:$0xff]  ;;  %v145_v29 = vld [vmem:[%s670_s1 + $0x18] sm:$0xff] }
   0x8   :  { %194 = vmatpush1.msra.mxu0 %v156_v18  ;;  %321 = vmatpush1.msra.mxu1 %v156_v18  ;;  %v144_v30 = vld [vmem:[%s670_s1 + $0x10] sm:$0xff]  ;;  %v143_v31 = vld [vmem:[%s670_s1 + $0x8] sm:$0xff]  ;;  %v142_v32 = vld [vmem:[%s670_s1] sm:$0xff] }
   0x9   :  { %39 = vadd.xlane.f32.xlu0 %v38_v14  ;;  %195 = vmatprep.subr.mxu0 %v359_v16  ;;  %v171_v33 = vld [vmem:[%s670_s1 + $0xe8] sm:$0xff]  ;;  %v169_v3 = vld [vmem:[%s670_s1 + $0xd8] sm:$0xff]  ;;  %v164_v8 = vld [vmem:[%s670_s1 + $0xb0] sm:$0xff] }
   0xa   :  { %43 = vadd.xlane.f32.xlu1 %v42_v15  ;;  %292 = vmatprep.subr.mxu1 %v359_v16  ;;  %v165_v7 = vld [vmem:[%s670_s1 + $0xb8] sm:$0xff]  ;;  %v163_v9 = vld [vmem:[%s670_s1 + $0xa8] sm:$0xff]  ;;  %v160_v12 = vld [vmem:[%s670_s1 + $0x90] sm:$0xff] }
   0xb   :  { %196 = vmatpush1.msra.mxu0 %v155_v19  ;;  %322 = vmatpush1.msra.mxu1 %v155_v19  ;;  %v159_v13 = vld [vmem:[%s670_s1 + $0x88] sm:$0xff]  ;;  %v158_v14 = vld [vmem:[%s670_s1 + $0x80] sm:$0xff] }
   0xc   :  { %197 = vmatprep.subr.mxu0 %v359_v16  ;;  %293 = vmatprep.subr.mxu1 %v359_v16 }
   0xd   :  { %198 = vmatpush1.msra.mxu0 %v154_v20  ;;  %323 = vmatpush1.msra.mxu1 %v154_v20 }
   0xe   :  { %199 = vmatprep.subr.mxu0 %v359_v16  ;;  %294 = vmatprep.subr.mxu1 %v359_v16 }
   0xf   :  { %200 = vmatpush1.msra.mxu0 %v153_v21  ;;  %324 = vmatpush1.msra.mxu1 %v153_v21 }
  0x10   :  { %201 = vmatprep.subr.mxu0 %v359_v16  ;;  %295 = vmatprep.subr.mxu1 %v359_v16 }
  0x11   :  { %202 = vmatpush1.msra.mxu0 %v152_v22  ;;  %325 = vmatpush1.msra.mxu1 %v152_v22 }
  0x12   :  { %203 = vmatprep.subr.mxu0 %v359_v16  ;;  %296 = vmatprep.subr.mxu1 %v359_v16 }
  0x13   :  { %204 = vmatpush1.msra.mxu0 %v151_v23  ;;  %326 = vmatpush1.msra.mxu1 %v151_v23  ;;  %v104_v23 = vlaneseq }
  0x14   :  { %205 = vmatprep.subr.mxu0 %v359_v16  ;;  %297 = vmatprep.subr.mxu1 %v359_v16 }
  0x15   :  { %206 = vmatpush1.msra.mxu0 %v150_v24  ;;  %327 = vmatpush1.msra.mxu1 %v150_v24 }
  0x16   :  { %207 = vmatprep.subr.mxu0 %v359_v16  ;;  %298 = vmatprep.subr.mxu1 %v359_v16 }
  0x17   :  { %208 = vmatpush1.msra.mxu0 %v149_v25  ;;  %328 = vmatpush1.msra.mxu1 %v149_v25 }
  0x18   :  { %209 = vmatprep.subr.mxu0 %v359_v16  ;;  %299 = vmatprep.subr.mxu1 %v359_v16 }
  0x19   :  { %210 = vmatpush1.msra.mxu0 %v148_v26  ;;  %329 = vmatpush1.msra.mxu1 %v148_v26 }
  0x1a   :  { %211 = vmatprep.subr.mxu0 %v359_v16  ;;  %300 = vmatprep.subr.mxu1 %v359_v16 }
  0x1b   :  { %212 = vmatpush1.msra.mxu0 %v147_v27  ;;  %330 = vmatpush1.msra.mxu1 %v147_v27 }
  0x1c   :  { %213 = vmatprep.subr.mxu0 %v359_v16  ;;  %301 = vmatprep.subr.mxu1 %v359_v16 }
  0x1d   :  { %214 = vmatpush1.msra.mxu0 %v146_v28  ;;  %331 = vmatpush1.msra.mxu1 %v146_v28  ;;  %v105_v28 = vshrl.u32 %v104_v23, 7 }
  0x1e   :  { %215 = vmatprep.subr.mxu0 %v359_v16  ;;  %302 = vmatprep.subr.mxu1 %v359_v16 }
  0x1f   :  { %216 = vmatpush1.msra.mxu0 %v145_v29  ;;  %332 = vmatpush1.msra.mxu1 %v145_v29 }
  0x20   :  { %217 = vmatprep.subr.mxu0 %v359_v16  ;;  %303 = vmatprep.subr.mxu1 %v359_v16 }
  0x21   :  { %218 = vmatpush1.msra.mxu0 %v144_v30  ;;  %333 = vmatpush1.msra.mxu1 %v144_v30  ;;  %v110_v30 = vsub.s32 1, %v105_v28 }
  0x22   :  { %219 = vmatprep.subr.mxu0 %v359_v16  ;;  %304 = vmatprep.subr.mxu1 %v359_v16 }
  0x23   :  { %220 = vmatpush1.msra.mxu0 %v143_v31  ;;  %334 = vmatpush1.msra.mxu1 %v143_v31  ;;  %v102_v31 = vld [vmem:[%s671_s2] sm:$0x3] }
  0x24   :  { %221 = vmatprep.subr.mxu0 %v359_v16  ;;  %305 = vmatprep.subr.mxu1 %v359_v16 }
  0x25   :  { %222 = vmatpush1.msra.mxu0 %v142_v32  ;;  %335 = vmatpush1.msra.mxu1 %v142_v32  ;;  %v122_v32 = vld [vmem:[%s672_s3] sm:$0x3] }
  0x26   :  { %227 = vmatprep.subr.mxu0 %v359_v16  ;;  %306 = vmatprep.subr.mxu1 %v359_v16 }
  0x27   :  { %228 = vmatpush2.msra.mxu0 %v171_v33  ;;  %336 = vmatpush2.msra.mxu1 %v171_v33 }
  0x28   :  { %229 = vmatprep.subr.mxu0 %v359_v16  ;;  %307 = vmatprep.subr.mxu1 %v359_v16 }
  0x8e   :  { %v32_v34 = vpop.xlane.xlu0 %31 }
  0x8f   :  { %v46_v35 = vmul.f32 0.004166667, %v32_v34  ;;  %v36_v36 = vpop.xlane.xlu1 %35  ;;  %v111_v34 = vrot.slane %v102_v31, %v110_v30 }
  0x90   :  { %v47_v37 = vmul.f32 0.004166667, %v36_v36 }
  0x91   :  { %v530_v38 = vsub.f32 %v393_v0, %v46_v35  ;;  %v533_v39 = vsub.f32 %v398_v1, %v46_v35 }
  0x92   :  { %v536_v40 = vsub.f32 %v403_v2, %v47_v37  ;;  %v539_v41 = vsub.f32 %v410_v4, %v47_v37  ;;  %v40_v42 = vpop.xlane.xlu0 %39  ;;  %v170_v2 = vld [vmem:[%s670_s1 + $0xe0] sm:$0xff]  ;;  %v168_v4 = vld [vmem:[%s670_s1 + $0xd0] sm:$0xff] }
  0x93   :  { %v48_v43 = vmul.f32 0.004166667, %v40_v42  ;;  %v44_v44 = vpop.xlane.xlu1 %43  ;;  %v58_v45 = vmul.f32 %v530_v38, %v530_v38  ;;  %v59_v46 = vmul.f32 %v533_v39, %v533_v39  ;;  %230 = vmatpush2.msra.mxu0 %v170_v2  ;;  %337 = vmatpush2.msra.mxu1 %v170_v2  ;;  %v131_v42 = vrot.slane %v122_v32, %v110_v30 }
  0x94   :  { %v49_v47 = vmul.f32 0.004166667, %v44_v44  ;;  %v60_v48 = vmul.f32 %v536_v40, %v536_v40  ;;  %v61_v49 = vmul.f32 %v539_v41, %v539_v41  ;;  %231 = vmatprep.subr.mxu0 %v359_v16  ;;  %308 = vmatprep.subr.mxu1 %v359_v16 }
  0x95   :  { %v550_v50 = vsub.f32 %v415_v5, %v48_v43  ;;  %v553_v51 = vsub.f32 %v420_v6, %v48_v43  ;;  %v66_v52 = vsel %vm28_vm0, %v59_v46, 0.0  ;;  %232 = vmatpush2.msra.mxu0 %v169_v3  ;;  %338 = vmatpush2.msra.mxu1 %v169_v3  ;;  %v167_v5 = vld [vmem:[%s670_s1 + $0xc8] sm:$0xff]  ;;  %v166_v6 = vld [vmem:[%s670_s1 + $0xc0] sm:$0xff] }
  0x96   :  { %v557_v53 = vsub.f32 %v430_v10, %v49_v47  ;;  %v560_v54 = vsub.f32 %v435_v11, %v49_v47  ;;  %v67_v55 = vadd.f32 %v66_v52, %v58_v45  ;;  %v70_v56 = vsel %vm28_vm0, %v61_v49, 0.0  ;;  %233 = vmatprep.subr.mxu0 %v359_v16  ;;  %309 = vmatprep.subr.mxu1 %v359_v16  ;;  %v162_v10 = vld [vmem:[%s670_s1 + $0xa0] sm:$0xff]  ;;  %v161_v11 = vld [vmem:[%s670_s1 + $0x98] sm:$0xff] }
  0x97   :  { %v62_v57 = vmul.f32 %v550_v50, %v550_v50  ;;  %v63_v58 = vmul.f32 %v553_v51, %v553_v51  ;;  %v71_v59 = vadd.f32 %v70_v56, %v60_v48  ;;  %234 = vmatpush2.msra.mxu0 %v168_v4  ;;  %339 = vmatpush2.msra.mxu1 %v168_v4 }
  0x98   :  { %68 = vadd.xlane.f32.xlu0 %v67_v55  ;;  %v64_v60 = vmul.f32 %v557_v53, %v557_v53  ;;  %v65_v61 = vmul.f32 %v560_v54, %v560_v54  ;;  %235 = vmatprep.subr.mxu0 %v359_v16 }
  0x99   :  { %v74_v62 = vsel %vm28_vm0, %v63_v58, 0.0  ;;  %310 = vmatprep.subr.mxu1 %v359_v16  ;;  %236 = vmatpush2.msra.mxu0 %v167_v5 }
  0x9a   :  { %v75_v63 = vadd.f32 %v74_v62, %v62_v57  ;;  %v78_v0 = vsel %vm28_vm0, %v65_v61, 0.0  ;;  %340 = vmatpush2.msra.mxu1 %v167_v5  ;;  %237 = vmatprep.subr.mxu0 %v359_v16 }
  0x9b   :  { %v79_v1 = vadd.f32 %v78_v0, %v64_v60  ;;  %311 = vmatprep.subr.mxu1 %v359_v16  ;;  %238 = vmatpush2.msra.mxu0 %v166_v6 }
  0x9c   :  { %72 = vadd.xlane.f32.xlu0 %v71_v59  ;;  %76 = vadd.xlane.f32.xlu1 %v75_v63 }
  0x9d   :  { %341 = vmatpush2.msra.mxu1 %v166_v6  ;;  %239 = vmatprep.subr.mxu0 %v359_v16 }
  0x9e   :  { %312 = vmatprep.subr.mxu1 %v359_v16  ;;  %240 = vmatpush2.msra.mxu0 %v165_v7 }
  0x9f   :  { %342 = vmatpush2.msra.mxu1 %v165_v7  ;;  %241 = vmatprep.subr.mxu0 %v359_v16 }
  0xa0   :  { %80 = vadd.xlane.f32.xlu1 %v79_v1  ;;  %313 = vmatprep.subr.mxu1 %v359_v16 }
  0xa1   :  { %242 = vmatpush2.msra.mxu0 %v164_v8  ;;  %343 = vmatpush2.msra.mxu1 %v164_v8 }
  0xa2   :  { %243 = vmatprep.subr.mxu0 %v359_v16  ;;  %314 = vmatprep.subr.mxu1 %v359_v16 }
  0xa3   :  { %244 = vmatpush2.msra.mxu0 %v163_v9  ;;  %344 = vmatpush2.msra.mxu1 %v163_v9 }
  0xa4   :  { %245 = vmatprep.subr.mxu0 %v359_v16  ;;  %315 = vmatprep.subr.mxu1 %v359_v16 }
  0xa5   :  { %246 = vmatpush2.msra.mxu0 %v162_v10  ;;  %345 = vmatpush2.msra.mxu1 %v162_v10 }
  0xa6   :  { %247 = vmatprep.subr.mxu0 %v359_v16  ;;  %316 = vmatprep.subr.mxu1 %v359_v16 }
  0xa7   :  { %248 = vmatpush2.msra.mxu0 %v161_v11  ;;  %346 = vmatpush2.msra.mxu1 %v161_v11 }
  0xa8   :  { %249 = vmatprep.subr.mxu0 %v359_v16  ;;  %317 = vmatprep.subr.mxu1 %v359_v16 }
  0xa9   :  { %250 = vmatpush2.msra.mxu0 %v160_v12  ;;  %347 = vmatpush2.msra.mxu1 %v160_v12 }
  0xaa   :  { %251 = vmatprep.subr.mxu0 %v359_v16  ;;  %318 = vmatprep.subr.mxu1 %v359_v16 }
  0xab   :  { %252 = vmatpush2.msra.mxu0 %v159_v13  ;;  %348 = vmatpush2.msra.mxu1 %v159_v13 }
  0xac   :  { %253 = vmatprep.subr.mxu0 %v359_v16  ;;  %319 = vmatprep.subr.mxu1 %v359_v16  ;;  %v106_v16 = vsub.s32 0, %v105_v28 }
  0xad   :  { %254 = vmatpush2.msra.mxu0 %v158_v14  ;;  %349 = vmatpush2.msra.mxu1 %v158_v14 }
  0xae   :  { %v107_v33 = vrot.slane %v102_v31, %v106_v16  ;;  %v127_v37 = vrot.slane %v122_v32, %v106_v16 }
 0x121   :  { %v69_v15 = vpop.xlane.xlu0 %68 }
 0x122   :  { %v82_v17 = vmul.f32 0.004166667, %v69_v15 }
 0x124   :  { %v86_v18 = vadd.f32 1e-05, %v82_v17 }
 0x125   :  { %v77_v19 = vpop.xlane.xlu1 %76  ;;  %v73_v20 = vpop.xlane.xlu0 %72 }
 0x126   :  { %351 = vrsqrt.f32 %v86_v18  ;;  %v84_v21 = vmul.f32 0.004166667, %v77_v19  ;;  %v83_v22 = vmul.f32 0.004166667, %v73_v20 }
 0x128   :  { %v88_v24 = vadd.f32 1e-05, %v84_v21  ;;  %v87_v25 = vadd.f32 1e-05, %v83_v22 }
 0x129   :  { %v81_v26 = vpop.xlane.xlu1 %80 }
 0x12a   :  { %353 = vrsqrt.f32 %v88_v24  ;;  %v85_v27 = vmul.f32 0.004166667, %v81_v26 }
 0x12b   :  { %355 = vrsqrt.f32 %v87_v25 }
 0x12c   :  { %v89_v29 = vadd.f32 1e-05, %v85_v27 }
 0x12e   :  { %357 = vrsqrt.f32 %v89_v29 }
 0x133   :  { %v352_v35 = vpop.eup %351 }
 0x134   :  { %v95_v36 = vmul.f32 %v352_v35, %v533_v39  ;;  %v94_v43 = vmul.f32 %v352_v35, %v530_v38 }
 0x136   :  { %v115_v44 = vmul.f32 %v111_v34, %v95_v36  ;;  %v114_v45 = vmul.f32 %v107_v33, %v94_v43 }
 0x137   :  { %v354_v46 = vpop.eup %353 }
 0x138   :  { %v356_v47 = vpop.eup %355  ;;  %v135_v48 = vadd.f32 %v131_v42, %v115_v44  ;;  %v134_v49 = vadd.f32 %v127_v37, %v114_v45  ;;  %v99_v52 = vmul.f32 %v354_v46, %v553_v51  ;;  %v98_v55 = vmul.f32 %v354_v46, %v550_v50 }
 0x139   :  { %v97_v56 = vmul.f32 %v356_v47, %v539_v41  ;;  %v96_v57 = vmul.f32 %v356_v47, %v536_v40 }
 0x13a   :  { %286 = vmatprep.mubr.msk.f32.mxu0 %vm28_vm0, %v135_v48  ;;  %v119_v39 = vmul.f32 %v111_v34, %v99_v52  ;;  %v118_v58 = vmul.f32 %v107_v33, %v98_v55 }
 0x13b   :  { %v358_v59 = vpop.eup %357  ;;  %256 = vmatmul.mubr.f32.vlgmr.msra.gmra.mxu0 %v134_v49  ;;  %v117_v38 = vmul.f32 %v111_v34, %v97_v56  ;;  %v116_v60 = vmul.f32 %v107_v33, %v96_v57 }
 0x13c   :  { %v139_v61 = vadd.f32 %v131_v42, %v119_v39  ;;  %v138_v62 = vadd.f32 %v127_v37, %v118_v58  ;;  %v101_v63 = vmul.f32 %v358_v59, %v560_v54  ;;  %v100_v51 = vmul.f32 %v358_v59, %v557_v53  ;;  %v285_v54 = vld [vmem:[%s673_s4] ss:$0 sm:$0xff] }
 0x13d   :  { %v137_v0 = vadd.f32 %v131_v42, %v117_v38  ;;  %v136_v50 = vadd.f32 %v127_v37, %v116_v60 }
 0x13e   :  { %288 = vmatprep.mubr.msk.f32.mxu1 %vm28_vm0, %v139_v61  ;;  %v121_v41 = vmul.f32 %v111_v34, %v101_v63  ;;  %v120_v40 = vmul.f32 %v107_v33, %v100_v51 }
 0x13f   :  { %287 = vmatprep.mubr.msk.f32.mxu0 %vm28_vm0, %v137_v0  ;;  %266 = vmatmul.mubr.f32.vlgmr.msra.gmra.mxu1 %v138_v62 }
 0x140   :  { %261 = vmatmul.mubr.f32.gmra.mxu0 %v136_v50  ;;  %v141_v1 = vadd.f32 %v131_v42, %v121_v41  ;;  %v140_v2 = vadd.f32 %v127_v37, %v120_v40 }
 0x142   :  { %289 = vmatprep.mubr.msk.f32.mxu1 %vm28_vm0, %v141_v1 }
 0x143   :  { %271 = vmatmul.mubr.f32.gmra.mxu1 %v140_v2 }
 0x1fb   :  { %v257_v53 = vpop.f32.mrf.mxu0 }
 0x1fc   :  { %v258_v3 = vadd.f32 %v285_v54, %v257_v53 }
 0x1fd   :  { %v259_v4 = vpop.f32.mrf.mxu0 }
 0x1fe   :  { %277 = vst.msk [vmem:[%s674_s5] sm:$0xff] %vm276_vm1, %v258_v3 }
 0x1ff   :  { %v267_v5 = vpop.f32.mrf.mxu1 }
 0x200   :  { %v262_v6 = vpop.f32.mrf.mxu0  ;;  %v268_v7 = vadd.f32 %v285_v54, %v267_v5 }
 0x201   :  { %v263_v8 = vadd.f32 %v285_v54, %v262_v6  ;;  %v269_v9 = vpop.f32.mrf.mxu1 }
 0x202   :  { %279 = vst.msk [vmem:[%s674_s5 + $0x10] sm:$0xff] %vm276_vm1, %v268_v7  ;;  %v264_v10 = vpop.f32.mrf.mxu0 }
 0x203   :  { %278 = vst.msk [vmem:[%s674_s5 + $0x8] sm:$0xff] %vm276_vm1, %v263_v8  ;;  %v272_v11 = vpop.f32.mrf.mxu1 }
 0x204   :  { %v273_v12 = vadd.f32 %v285_v54, %v272_v11 }
 0x205   :  { %v274_v13 = vpop.f32.mrf.mxu1 }
 0x206   :  { %280 = vst.msk [vmem:[%s674_s5 + $0x18] sm:$0xff] %vm276_vm1, %v273_v12 }

// kernel: squeeze.5
= control target key start
LH: loop header
LB: loop body
LE: loop exit
PB: predicated region body
PF: predicated region fallthrough
CT: control target
= control target key end

     0   :  { %s67_s8 = smov 122   ;;  %vm8_vm0 = vcmask 15360   ;;  %s68_s11 = smov 124   ;;  %s118_s0 = inlined_call_operand.vmem [shape: f32[16], index: 0, kind: input, shape index: {}]   ;;  %s119_s1 = inlined_call_operand.vmem [shape: f32[8,2], index: 1, kind: output, shape index: {}]  }
   0x1   :  { %v5_v0 = vld [vmem:[%s118_s0] sm:$0x1]  ;;  %s66_s0 = smov 126   ;;  %s69_s12 = smov 120  }
   0x2   :  { %6 = vst [vmem:[#allocation0] sm:$0x1] %v5_v0  ;;  %s70_s13 = smov 118   ;;  %s71_s14 = smov 116  }
   0x3   :  { %s72_s15 = smov 114  }
   0x9   :  { %v10_v1 = vld [vmem:[#allocation0] sm:$0x1]  }
   0xa   :  { %v22_v2 = vld [vmem:[#allocation0] sm:$0x1]   ;;  %11 = vrot.lane.b32.xlu0 %v10_v1, %s66_s0 }
   0xb   :  { %23 = vrot.lane.b32.xlu1 %v22_v2, %s67_s8  ;;  %v16_v3 = vld [vmem:[#allocation0] sm:$0x1]  }
   0xc   :  { %v28_v4 = vld [vmem:[#allocation0] sm:$0x1]  }
   0xd   :  { %v7_v5 = vld [vmem:[#allocation0] sm:$0x1]  }
   0xe   :  { %9 = vst.msk [vmem:[%s119_s1] sm:$0x1] %vm8_vm0, %v7_v5   ;;  %17 = vrot.lane.b32.xlu0 %v16_v3, %s68_s11  ;;  %v34_v6 = vld [vmem:[#allocation0] sm:$0x1]  }
   0xf   :  { %29 = vrot.lane.b32.xlu1 %v28_v4, %s69_s12  ;;  %v40_v7 = vld [vmem:[#allocation0] sm:$0x1]  }
  0x10   :  { %v46_v8 = vld [vmem:[#allocation0] sm:$0x1]  }
  0x12   :  { %35 = vrot.lane.b32.xlu0 %v34_v6, %s70_s13 }
  0x13   :  { %41 = vrot.lane.b32.xlu1 %v40_v7, %s71_s14 }
  0x16   :  { %47 = vrot.lane.b32.xlu0 %v46_v8, %s72_s15 }
  0x7c   :  { %v12_v9 = vpop.permute.xlu0 %11  }
  0x7d   :  { %v24_v10 = vpop.permute.xlu1 %23   ;;  %52 = vst.msk [vmem:[%s119_s1 + $0x1] sm:$0x1] %vm8_vm0, %v12_v9  }
  0x7e   :  { %54 = vst.msk [vmem:[%s119_s1 + $0x3] sm:$0x1] %vm8_vm0, %v24_v10  }
  0x80   :  { %v18_v11 = vpop.permute.xlu0 %17  }
  0x81   :  { %v30_v12 = vpop.permute.xlu1 %29   ;;  %53 = vst.msk [vmem:[%s119_s1 + $0x2] sm:$0x1] %vm8_vm0, %v18_v11  }
  0x82   :  { %55 = vst.msk [vmem:[%s119_s1 + $0x4] sm:$0x1] %vm8_vm0, %v30_v12  }
  0x84   :  { %v36_v13 = vpop.permute.xlu0 %35  }
  0x85   :  { %v42_v14 = vpop.permute.xlu1 %41   ;;  %56 = vst.msk [vmem:[%s119_s1 + $0x5] sm:$0x1] %vm8_vm0, %v36_v13  }
  0x86   :  { %57 = vst.msk [vmem:[%s119_s1 + $0x6] sm:$0x1] %vm8_vm0, %v42_v14  }
  0x88   :  { %v48_v15 = vpop.permute.xlu0 %47  }
  0x89   :  { %58 = vst.msk [vmem:[%s119_s1 + $0x7] sm:$0x1] %vm8_vm0, %v48_v15  }

// kernel: forward.15
= control target key start
LH: loop header
LB: loop body
LE: loop exit
PB: predicated region body
PF: predicated region fallthrough
CT: control target
= control target key end

     0   :  { %v195_v0 = vmov 0.0   ;;  %vm196_vm0 = vmmov 0   ;;  %vm31_vm1 = vcmask 130048   ;;  %vm137_vm2 = vcmask 261120   ;;  %s277_s1 = inlined_call_operand.vmem [shape: f32[16,32], index: 1, kind: input, shape index: {}]   ;;  %s278_s0 = inlined_call_operand.vmem [shape: f32[34,16], index: 0, kind: input, shape index: {}]   ;;  %s279_s2 = inlined_call_operand.vmem [shape: f32[34,32], index: 2, kind: input, shape index: {}]   ;;  %s280_s3 = inlined_call_operand.vmem [shape: f32[34,32], index: 3, kind: output, shape index: {}]  }
   0x1   :  { %160 = vmatprep.subr.mxu0 %v195_v0  ;;  %v25_v1 = vld [vmem:[%s277_s1 + $0x8] sm:$0xff]  ;;  %179 = vmatprep.subr.mxu1 %v195_v0  ;;  %v24_v2 = vld [vmem:[%s277_s1] sm:$0xff]  ;;  %v17_v4 = vld [vmem:[%s278_s0 + $0x18] sm:$0xff]  ;;  %vm142_vm3 = vcmask 254976  }
   0x2   :  { %v14_v3 = vld [vmem:[%s278_s0] sm:$0xff]  ;;  %161 = vmatpush3.msra.mxu0 %v25_v1  ;;  %181 = vmatpush3.msra.mxu1 %v25_v1  ;;  %v15_v5 = vld [vmem:[%s278_s0 + $0x8] sm:$0xff]  ;;  %v16_v7 = vld [vmem:[%s278_s0 + $0x10] sm:$0xff] }
   0x3   :  { %185 = vtanh.f32 %v14_v3  ;;  %v18_v6 = vld [vmem:[%s278_s0 + $0x20] sm:$0x3]  ;;  %162 = vmatprep.subr.mxu0 %v195_v0  ;;  %164 = vmatprep.mubr.msk.f32.mxu0 %vm196_vm0, %v195_v0  ;;  %v29_v14 = vld [vmem:[%s279_s2 + $0x18] sm:$0xff]  ;;  %v27_v20 = vld [vmem:[%s279_s2 + $0x8] sm:$0xff] }
   0x4   :  { %187 = vtanh.f32 %v17_v4  ;;  %163 = vmatpush3.msra.mxu0 %v24_v2  ;;  %180 = vmatprep.subr.mxu1 %v195_v0  ;;  %v26_v13 = vld [vmem:[%s279_s2] sm:$0xff]  ;;  %v28_v28 = vld [vmem:[%s279_s2 + $0x10] sm:$0xff] }
   0x5   :  { %189 = vtanh.f32 %v15_v5  ;;  %182 = vmatpush3.msra.mxu1 %v24_v2  ;;  %173 = vmatprep.mubr.msk.f32.mxu1 %vm196_vm0, %v195_v0  ;;  %v30_v22 = vld [vmem:[%s279_s2 + $0x20] sm:$0x3] }
   0x6   :  { %191 = vtanh.f32 %v18_v6 }
   0x7   :  { %193 = vtanh.f32 %v16_v7 }
  0x10   :  { %v186_v8 = vpop.eup %185 }
  0x11   :  { %v188_v9 = vpop.eup %187  ;;  %165 = vmatmul.mubr.msk.f32.vlgmr.msra.gmra.mxu0 %vm31_vm1, %v186_v8 }
  0x12   :  { %v190_v10 = vpop.eup %189  ;;  %174 = vmatmul.mubr.msk.f32.vlgmr.msra.gmra.mxu1 %vm31_vm1, %v188_v9  ;;  %167 = vmatprep.mubr.msk.f32.mxu0 %vm196_vm0, %v195_v0 }
  0x13   :  { %v192_v11 = vpop.eup %191  ;;  %176 = vmatprep.mubr.msk.f32.mxu1 %vm196_vm0, %v195_v0 }
  0x14   :  { %v194_v12 = vpop.eup %193 }
  0x15   :  { %168 = vmatmul.mubr.msk.f32.gmra.mxu0 %vm31_vm1, %v190_v10 }
  0x16   :  { %177 = vmatmul.mubr.msk.f32.gmra.mxu1 %vm31_vm1, %v192_v11  ;;  %170 = vmatprep.mubr.msk.f32.mxu0 %vm196_vm0, %v195_v0 }
  0x19   :  { %171 = vmatmul.mubr.msk.f32.gmra.mxu0 %vm31_vm1, %v194_v12 }
  0xd1   :  { %v113_v15 = vpop.f32.mrf.mxu0 }
  0xd2   :  { %v114_v16 = vadd.f32 %v113_v15, %v26_v13  ;;  %v128_v17 = vpop.f32.mrf.mxu1 }
  0xd3   :  { %v166_v18 = vpop.f32.mrf.mxu0  ;;  %v129_v19 = vadd.f32 %v128_v17, %v29_v14 }
  0xd4   :  { %138 = vst.msk [vmem:[%s280_s3] sm:$0xff] %vm137_vm2, %v114_v16  ;;  %v175_v21 = vpop.f32.mrf.mxu1 }
  0xd5   :  { %141 = vst.msk [vmem:[%s280_s3 + $0x18] sm:$0xff] %vm137_vm2, %v129_v19  ;;  %v118_v23 = vpop.f32.mrf.mxu0 }
  0xd6   :  { %v119_v24 = vadd.f32 %v118_v23, %v27_v20  ;;  %v133_v25 = vpop.f32.mrf.mxu1 }
  0xd7   :  { %v169_v26 = vpop.f32.mrf.mxu0  ;;  %v134_v27 = vadd.f32 %v133_v25, %v30_v22 }
  0xd8   :  { %139 = vst.msk [vmem:[%s280_s3 + $0x8] sm:$0xff] %vm137_vm2, %v119_v24  ;;  %v178_v29 = vpop.f32.mrf.mxu1 }
  0xd9   :  { %143 = vst.msk [vmem:[%s280_s3 + $0x20] sm:$0x3] %vm142_vm3, %v134_v27  ;;  %v123_v30 = vpop.f32.mrf.mxu0 }
  0xda   :  { %v124_v31 = vadd.f32 %v123_v30, %v28_v28 }
  0xdb   :  { %v172_v32 = vpop.f32.mrf.mxu0 }
  0xdc   :  { %140 = vst.msk [vmem:[%s280_s3 + $0x10] sm:$0xff] %vm137_vm2, %v124_v31 }

// kernel: forward.16
= control target key start
LH: loop header
LB: loop body
LE: loop exit
PB: predicated region body
PF: predicated region fallthrough
CT: control target
= control target key end

     0   :  { %vm24_vm0 = vcmask 261120   ;;  %vm37_vm1 = vcmask 254976   ;;  %v247_v15 = vmov 0.0   ;;  %vm248_vm2 = vmmov 0   ;;  %s357_s0 = inlined_call_operand.vmem [shape: f32[34,32], index: 0, kind: input, shape index: {}]   ;;  %s358_s1 = inlined_call_operand.vmem [shape: f32[32,64], index: 1, kind: input, shape index: {}]   ;;  %s359_s2 = inlined_call_operand.vmem [shape: f32[1,64], index: 2, kind: input, shape index: {}]   ;;  %s360_s3 = inlined_call_operand.vmem [shape: f32[34,64], index: 3, kind: output, shape index: {}]  }
   0x1   :  { %v272_v0 = vld [vmem:[%s357_s0] sm:$0xff]  ;;  %v277_v1 = vld [vmem:[%s357_s0 + $0x18] sm:$0xff]  ;;  %v282_v2 = vld [vmem:[%s357_s0 + $0x8] sm:$0xff]  ;;  %204 = vmatprep.subr.mxu0 %v247_v15  ;;  %227 = vmatprep.subr.mxu1 %v247_v15  ;;  %vm178_vm3 = vcmask 523264   ;;  %vm183_vm4 = vcmask 517120  }
   0x2   :  { %v19_v3 = vmul.f32 %v272_v0, %v272_v0  ;;  %v22_v4 = vmul.f32 %v277_v1, %v277_v1  ;;  %v20_v5 = vmul.f32 %v282_v2, %v282_v2  ;;  %v293_v6 = vld [vmem:[%s357_s0 + $0x10] sm:$0xff]  ;;  %v300_v8 = vld [vmem:[%s357_s0 + $0x20] sm:$0x3]  ;;  %v65_v16 = vld [vmem:[%s358_s1 + $0x18] sm:$0xff]  ;;  %212 = vmatprep.mubr.msk.f32.mxu0 %vm248_vm2, %v247_v15  ;;  %221 = vmatprep.mubr.msk.f32.mxu1 %vm248_vm2, %v247_v15 }
   0x3   :  { %v21_v7 = vmul.f32 %v293_v6, %v293_v6  ;;  %v23_v13 = vmul.f32 %v300_v8, %v300_v8  ;;  %v64_v17 = vld [vmem:[%s358_s1 + $0x10] sm:$0xff]  ;;  %205 = vmatpush3.msra.mxu0 %v65_v16  ;;  %231 = vmatpush3.msra.mxu1 %v65_v16  ;;  %v63_v18 = vld [vmem:[%s358_s1 + $0x8] sm:$0xff]  ;;  %v62_v19 = vld [vmem:[%s358_s1] sm:$0xff] }
   0x4   :  { %v25_v9 = vsel %vm24_vm0, %v19_v3, 0.0  ;;  %v34_v10 = vsel %vm24_vm0, %v22_v4, 0.0  ;;  %v28_v11 = vsel %vm24_vm0, %v20_v5, 0.0  ;;  %206 = vmatprep.subr.mxu0 %v247_v15  ;;  %228 = vmatprep.subr.mxu1 %v247_v15  ;;  %v189_v45 = vld [vmem:[%s359_s2] ss:$0 sm:$0xff] }
   0x5   :  { %26 = vadd.xlane.f32.xlu0 %v25_v9  ;;  %35 = vadd.xlane.f32.xlu1 %v34_v10  ;;  %v31_v12 = vsel %vm24_vm0, %v21_v7, 0.0  ;;  %v38_v14 = vsel %vm37_vm1, %v23_v13, 0.0 }
   0x6   :  { %207 = vmatpush3.msra.mxu0 %v64_v17  ;;  %232 = vmatpush3.msra.mxu1 %v64_v17 }
   0x7   :  { %208 = vmatprep.subr.mxu0 %v247_v15  ;;  %229 = vmatprep.subr.mxu1 %v247_v15 }
   0x8   :  { %209 = vmatpush3.msra.mxu0 %v63_v18  ;;  %233 = vmatpush3.msra.mxu1 %v63_v18 }
   0x9   :  { %29 = vadd.xlane.f32.xlu0 %v28_v11  ;;  %32 = vadd.xlane.f32.xlu1 %v31_v12 }
   0xa   :  { %210 = vmatprep.subr.mxu0 %v247_v15  ;;  %230 = vmatprep.subr.mxu1 %v247_v15 }
   0xb   :  { %211 = vmatpush3.msra.mxu0 %v62_v19  ;;  %234 = vmatpush3.msra.mxu1 %v62_v19 }
   0xd   :  { %39 = vadd.xlane.f32.xlu0 %v38_v14 }
  0x8e   :  { %v27_v20 = vpop.xlane.xlu0 %26  ;;  %v36_v21 = vpop.xlane.xlu1 %35 }
  0x8f   :  { %v42_v22 = vmul.f32 0.03125, %v27_v20  ;;  %v45_v23 = vmul.f32 0.03125, %v36_v21 }
  0x91   :  { %v47_v24 = vadd.f32 1e-06, %v42_v22  ;;  %v50_v25 = vadd.f32 1e-06, %v45_v23 }
  0x92   :  { %v30_v26 = vpop.xlane.xlu0 %29  ;;  %v33_v27 = vpop.xlane.xlu1 %32 }
  0x93   :  { %237 = vrsqrt.f32 %v47_v24  ;;  %v43_v28 = vmul.f32 0.03125, %v30_v26  ;;  %v44_v29 = vmul.f32 0.03125, %v33_v27 }
  0x94   :  { %239 = vrsqrt.f32 %v50_v25 }
  0x95   :  { %v48_v30 = vadd.f32 1e-06, %v43_v28  ;;  %v49_v31 = vadd.f32 1e-06, %v44_v29 }
  0x96   :  { %v40_v32 = vpop.xlane.xlu0 %39 }
  0x97   :  { %241 = vrsqrt.f32 %v48_v30  ;;  %v46_v33 = vmul.f32 0.03125, %v40_v32 }
  0x98   :  { %243 = vrsqrt.f32 %v49_v31 }
  0x99   :  { %v51_v34 = vadd.f32 1e-06, %v46_v33 }
  0x9b   :  { %245 = vrsqrt.f32 %v51_v34 }
  0xa0   :  { %v238_v35 = vpop.eup %237 }
  0xa1   :  { %v240_v36 = vpop.eup %239  ;;  %v57_v37 = vmul.f32 %v238_v35, %v272_v0 }
  0xa2   :  { %v60_v38 = vmul.f32 %v240_v36, %v277_v1 }
  0xa3   :  { %213 = vmatmul.mubr.msk.f32.vlgmr.msra.gmra.mxu0 %vm24_vm0, %v57_v37 }
  0xa4   :  { %v242_v39 = vpop.eup %241  ;;  %222 = vmatmul.mubr.msk.f32.vlgmr.msra.gmra.mxu1 %vm24_vm0, %v60_v38  ;;  %215 = vmatprep.mubr.msk.f32.mxu0 %vm248_vm2, %v247_v15 }
  0xa5   :  { %v244_v40 = vpop.eup %243  ;;  %v58_v41 = vmul.f32 %v242_v39, %v282_v2  ;;  %224 = vmatprep.mubr.msk.f32.mxu1 %vm248_vm2, %v247_v15 }
  0xa6   :  { %v59_v42 = vmul.f32 %v244_v40, %v293_v6 }
  0xa7   :  { %216 = vmatmul.mubr.msk.f32.gmra.mxu0 %vm24_vm0, %v58_v41 }
  0xa8   :  { %v246_v43 = vpop.eup %245  ;;  %218 = vmatprep.mubr.msk.f32.mxu0 %vm248_vm2, %v247_v15 }
  0xa9   :  { %v61_v44 = vmul.f32 %v246_v43, %v300_v8 }
  0xab   :  { %219 = vmatmul.mubr.msk.f32.gmra.mxu0 %vm24_vm0, %v59_v42  ;;  %225 = vmatmul.mubr.msk.f32.gmra.mxu1 %vm24_vm0, %v61_v44 }
 0x163   :  { %v154_v46 = vpop.f32.mrf.mxu0 }
 0x164   :  { %v155_v47 = vadd.f32 %v189_v45, %v154_v46  ;;  %v169_v48 = vpop.f32.mrf.mxu1 }
 0x165   :  { %v214_v49 = vpop.f32.mrf.mxu0  ;;  %v170_v50 = vadd.f32 %v189_v45, %v169_v48 }
 0x166   :  { %179 = vst.msk [vmem:[%s360_s3] sm:$0xff] %vm178_vm3, %v155_v47  ;;  %v223_v51 = vpop.f32.mrf.mxu1 }
 0x167   :  { %182 = vst.msk [vmem:[%s360_s3 + $0x18] sm:$0xff] %vm178_vm3, %v170_v50  ;;  %v159_v52 = vpop.f32.mrf.mxu0 }
 0x168   :  { %v160_v53 = vadd.f32 %v189_v45, %v159_v52 }
 0x169   :  { %v217_v54 = vpop.f32.mrf.mxu0 }
 0x16a   :  { %180 = vst.msk [vmem:[%s360_s3 + $0x8] sm:$0xff] %vm178_vm3, %v160_v53 }
 0x16b   :  { %v164_v55 = vpop.f32.mrf.mxu0  ;;  %v174_v56 = vpop.f32.mrf.mxu1 }
 0x16c   :  { %v165_v57 = vadd.f32 %v189_v45, %v164_v55  ;;  %v175_v58 = vadd.f32 %v189_v45, %v174_v56 }
 0x16d   :  { %v220_v59 = vpop.f32.mrf.mxu0  ;;  %v226_v60 = vpop.f32.mrf.mxu1 }
 0x16e   :  { %181 = vst.msk [vmem:[%s360_s3 + $0x10] sm:$0xff] %vm178_vm3, %v165_v57 }
 0x16f   :  { %184 = vst.msk [vmem:[%s360_s3 + $0x20] sm:$0x3] %vm183_vm4, %v175_v58 }

// kernel: forward.17
= control target key start
LH: loop header
LB: loop body
LE: loop exit
PB: predicated region body
PF: predicated region fallthrough
CT: control target
= control target key end

     0   :  { %v232_v0 = vmov 0.0   ;;  %vm37_vm0 = vcmask 523264   ;;  %vm233_vm1 = vmmov 0   ;;  %vm153_vm2 = vcmask 261120   ;;  %s340_s1 = inlined_call_operand.vmem [shape: f32[64,32], index: 1, kind: input, shape index: {}]   ;;  %s341_s0 = inlined_call_operand.vmem [shape: f32[34,64], index: 0, kind: input, shape index: {}]   ;;  %s342_s2 = inlined_call_operand.vmem [shape: f32[1,32], index: 2, kind: input, shape index: {}]   ;;  %s343_s3 = inlined_call_operand.vmem [shape: f32[34,32], index: 3, kind: input, shape index: {}]   ;;  %s344_s4 = inlined_call_operand.vmem [shape: f32[34,32], index: 4, kind: output, shape index: {}]  }
   0x1   :  { %183 = vmatprep.subr.mxu0 %v232_v0  ;;  %v29_v1 = vld [vmem:[%s340_s1 + $0x38] sm:$0xff]  ;;  %214 = vmatprep.subr.mxu1 %v232_v0  ;;  %v28_v2 = vld [vmem:[%s340_s1 + $0x30] sm:$0xff]  ;;  %v27_v3 = vld [vmem:[%s340_s1 + $0x28] sm:$0xff]  ;;  %vm158_vm3 = vcmask 254976  }
   0x2   :  { %184 = vmatpush3.msra.mxu0 %v29_v1  ;;  %222 = vmatpush3.msra.mxu1 %v29_v1  ;;  %v26_v4 = vld [vmem:[%s340_s1 + $0x20] sm:$0xff]  ;;  %v25_v5 = vld [vmem:[%s340_s1 + $0x18] sm:$0xff]  ;;  %v24_v6 = vld [vmem:[%s340_s1 + $0x10] sm:$0xff] }
   0x3   :  { %185 = vmatprep.subr.mxu0 %v232_v0  ;;  %215 = vmatprep.subr.mxu1 %v232_v0  ;;  %v23_v7 = vld [vmem:[%s340_s1 + $0x8] sm:$0xff]  ;;  %v22_v8 = vld [vmem:[%s340_s1] sm:$0xff]  ;;  %v20_v10 = vld [vmem:[%s341_s0 + $0x18] sm:$0xff] }
   0x4   :  { %186 = vmatpush3.msra.mxu0 %v28_v2  ;;  %223 = vmatpush3.msra.mxu1 %v28_v2  ;;  %v17_v9 = vld [vmem:[%s341_s0] sm:$0xff]  ;;  %v18_v11 = vld [vmem:[%s341_s0 + $0x8] sm:$0xff]  ;;  %v19_v13 = vld [vmem:[%s341_s0 + $0x10] sm:$0xff] }
   0x5   :  { %187 = vmatprep.subr.mxu0 %v232_v0  ;;  %216 = vmatprep.subr.mxu1 %v232_v0  ;;  %v21_v12 = vld [vmem:[%s341_s0 + $0x20] sm:$0x3]  ;;  %v146_v20 = vld [vmem:[%s343_s3 + $0x18] sm:$0xff]  ;;  %v144_v24 = vld [vmem:[%s343_s3 + $0x8] sm:$0xff] }
   0x6   :  { %188 = vmatpush3.msra.mxu0 %v27_v3  ;;  %224 = vmatpush3.msra.mxu1 %v27_v3  ;;  %v164_v14 = vld [vmem:[%s342_s2] ss:$0 sm:$0xff]  ;;  %v145_v34 = vld [vmem:[%s343_s3 + $0x10] sm:$0xff] }
   0x7   :  { %189 = vmatprep.subr.mxu0 %v232_v0  ;;  %217 = vmatprep.subr.mxu1 %v232_v0  ;;  %v143_v16 = vld [vmem:[%s343_s3] sm:$0xff] }
   0x8   :  { %190 = vmatpush3.msra.mxu0 %v26_v4  ;;  %225 = vmatpush3.msra.mxu1 %v26_v4  ;;  %v147_v30 = vld [vmem:[%s343_s3 + $0x20] sm:$0x3] }
   0x9   :  { %191 = vmatprep.subr.mxu0 %v232_v0  ;;  %218 = vmatprep.subr.mxu1 %v232_v0 }
   0xa   :  { %192 = vmatpush3.msra.mxu0 %v25_v5  ;;  %226 = vmatpush3.msra.mxu1 %v25_v5 }
   0xb   :  { %193 = vmatprep.subr.mxu0 %v232_v0  ;;  %219 = vmatprep.subr.mxu1 %v232_v0 }
   0xc   :  { %194 = vmatpush3.msra.mxu0 %v24_v6  ;;  %227 = vmatpush3.msra.mxu1 %v24_v6 }
   0xd   :  { %195 = vmatprep.subr.mxu0 %v232_v0  ;;  %220 = vmatprep.subr.mxu1 %v232_v0 }
   0xe   :  { %196 = vmatpush3.msra.mxu0 %v23_v7  ;;  %228 = vmatpush3.msra.mxu1 %v23_v7 }
   0xf   :  { %197 = vmatprep.subr.mxu0 %v232_v0  ;;  %199 = vmatprep.mubr.msk.f32.mxu0 %vm233_vm1, %v232_v0 }
  0x10   :  { %198 = vmatpush3.msra.mxu0 %v22_v8  ;;  %221 = vmatprep.subr.mxu1 %v232_v0 }
  0x11   :  { %200 = vmatmul.mubr.msk.f32.vlgmr.msra.gmra.mxu0 %vm37_vm0, %v17_v9  ;;  %229 = vmatpush3.msra.mxu1 %v22_v8 }
  0x12   :  { %208 = vmatprep.mubr.msk.f32.mxu1 %vm233_vm1, %v232_v0  ;;  %202 = vmatprep.mubr.msk.f32.mxu0 %vm233_vm1, %v232_v0 }
  0x13   :  { %209 = vmatmul.mubr.msk.f32.vlgmr.msra.gmra.mxu1 %vm37_vm0, %v20_v10 }
  0x14   :  { %211 = vmatprep.mubr.msk.f32.mxu1 %vm233_vm1, %v232_v0 }
  0x15   :  { %203 = vmatmul.mubr.msk.f32.gmra.mxu0 %vm37_vm0, %v18_v11 }
  0x16   :  { %205 = vmatprep.mubr.msk.f32.mxu0 %vm233_vm1, %v232_v0 }
  0x17   :  { %212 = vmatmul.mubr.msk.f32.gmra.mxu1 %vm37_vm0, %v21_v12 }
  0x19   :  { %206 = vmatmul.mubr.msk.f32.gmra.mxu0 %vm37_vm0, %v19_v13 }
  0xd1   :  { %v119_v15 = vpop.f32.mrf.mxu0 }
  0xd2   :  { %v120_v17 = vadd.f32 %v164_v14, %v119_v15 }
  0xd3   :  { %v201_v18 = vpop.f32.mrf.mxu0  ;;  %v134_v19 = vpop.f32.mrf.mxu1 }
  0xd4   :  { %v148_v21 = vadd.f32 %v143_v16, %v120_v17  ;;  %v135_v22 = vadd.f32 %v164_v14, %v134_v19 }
  0xd5   :  { %v124_v23 = vpop.f32.mrf.mxu0  ;;  %v210_v25 = vpop.f32.mrf.mxu1 }
  0xd6   :  { %154 = vst.msk [vmem:[%s344_s4] sm:$0xff] %vm153_vm2, %v148_v21  ;;  %v151_v26 = vadd.f32 %v146_v20, %v135_v22  ;;  %v125_v27 = vadd.f32 %v164_v14, %v124_v23 }
  0xd7   :  { %v204_v28 = vpop.f32.mrf.mxu0  ;;  %v139_v29 = vpop.f32.mrf.mxu1 }
  0xd8   :  { %157 = vst.msk [vmem:[%s344_s4 + $0x18] sm:$0xff] %vm153_vm2, %v151_v26  ;;  %v149_v31 = vadd.f32 %v144_v24, %v125_v27  ;;  %v140_v32 = vadd.f32 %v164_v14, %v139_v29 }
  0xd9   :  { %v129_v33 = vpop.f32.mrf.mxu0  ;;  %v213_v35 = vpop.f32.mrf.mxu1 }
  0xda   :  { %155 = vst.msk [vmem:[%s344_s4 + $0x8] sm:$0xff] %vm153_vm2, %v149_v31  ;;  %v152_v36 = vadd.f32 %v147_v30, %v140_v32  ;;  %v130_v37 = vadd.f32 %v164_v14, %v129_v33 }
  0xdb   :  { %v207_v38 = vpop.f32.mrf.mxu0 }
  0xdc   :  { %159 = vst.msk [vmem:[%s344_s4 + $0x20] sm:$0x3] %vm158_vm3, %v152_v36  ;;  %v150_v39 = vadd.f32 %v145_v34, %v130_v37 }
  0xde   :  { %156 = vst.msk [vmem:[%s344_s4 + $0x10] sm:$0xff] %vm153_vm2, %v150_v39 }

// kernel: forward.23
= control target key start
LH: loop header
LB: loop body
LE: loop exit
PB: predicated region body
PF: predicated region fallthrough
CT: control target
= control target key end

     0   :  { %vm23_vm0 = vcmask 254976   ;;  %s274_s0 = inlined_call_operand.vmem [shape: f32[2,32], index: 0, kind: input, shape index: {}]   ;;  %s275_s1 = inlined_call_operand.vmem [shape: f32[32,10], index: 1, kind: input, shape index: {}]   ;;  %s276_s2 = inlined_call_operand.vmem [shape: f32[1,32], index: 2, kind: input, shape index: {}]   ;;  %s277_s3 = inlined_call_operand.vmem [shape: f32[1,32], index: 3, kind: input, shape index: {}]   ;;  %s278_s4 = inlined_call_operand.vmem [shape: f32[1,10], index: 4, kind: input, shape index: {}]   ;;  %s279_s5 = inlined_call_operand.hbm [shape: f32[2,10], index: 5, kind: output, shape index: {}]  }
   0x1   :  { %v21_v0 = vld [vmem:[%s274_s0] sm:$0x3] }
   0x2   :  { %10 = vsyncpa [#allocation3], 0  ;;  %v22_v1 = vmul.f32 %v21_v0, %v21_v0  ;;  %v64_v14 = vld [vmem:[%s275_s1 + $0x18] sm:$0xff]  ;;  %v211_v15 = vmov 0.0   ;;  %v63_v16 = vld [vmem:[%s275_s1 + $0x10] sm:$0xff]  ;;  %vm212_vm1 = vmmov 0  }
   0x3   :  { %171 = vmatprep.subr.mxu0 %v211_v15  ;;  %179 = vmatprep.mubr.msk.f32.mxu0 %vm212_vm1, %v211_v15  ;;  %v62_v17 = vld [vmem:[%s275_s1 + $0x8] sm:$0xff]  ;;  %v61_v18 = vld [vmem:[%s275_s1] sm:$0xff]  ;;  %vm72_vm2 = vcmask 261120   ;;  %s213_s7 = smov [#allocation2]   ;;  %vm146_vm3 = vcmask 74752  }
   0x4   :  { %v24_v2 = vsel %vm23_vm0, %v22_v1, 0.0  ;;  %172 = vmatpush3.msra.mxu0 %v64_v14  ;;  %v162_v23 = vld [vmem:[%s276_s2] ss:$0 sm:$0xff]  ;;  %s154_s8 = sshll.u32 %s213_s7, 4  ;;  %s155_s8 = int_to_ptr.vmem [resolvable:$true] %s154_s8 }
   0x5   :  { %25 = vadd.xlane.f32.xlu0 %v24_v2  ;;  %173 = vmatprep.subr.mxu0 %v211_v15  ;;  %v163_v25 = vld [vmem:[%s277_s3] ss:$0 sm:$0xff]  ;;  %s189_s2 = scalar_lea.vmem %s155_s8, 32  ;;  %p194_p1 = scmp.lt.s32.totalorder %s155_s8, %s155_s8 }
   0x6   :  { %174 = vmatpush3.msra.mxu0 %v63_v16  ;;  %v164_v28 = vld [vmem:[%s278_s4] ss:$0 sm:$0xff]  ;;  %p190_p0 = scmp.ne.s32.totalorder %s155_s8, %s189_s2  ;;  %p195_p2 = scmp.lt.s32.totalorder %s189_s2, %s189_s2 }
   0x7   :  { %175 = vmatprep.subr.mxu0 %v211_v15 }
   0x8   :  { %176 = vmatpush3.msra.mxu0 %v62_v17  ;;  %p196_p3 = por %p195_p2, %p194_p1 }
   0x9   :  { %177 = vmatprep.subr.mxu0 %v211_v15 }
   0xa   :  { %178 = vmatpush3.msra.mxu0 %v61_v18  ;;  %p197_p4 = pnand %p196_p3, %p190_p0 }
  0x8e   :  { %v26_v3 = vpop.xlane.xlu0 %25 }
  0x8f   :  { %v28_v4 = vmul.f32 0.03125, %v26_v3 }
  0x91   :  { %v29_v5 = vadd.f32 1e-06, %v28_v4 }
  0x93   :  { %185 = vrsqrt.f32 %v29_v5 }
  0xa0   :  { %v186_v6 = vpop.eup %185 }
  0xa1   :  { %v31_v7 = vmul.f32 %v186_v6, %v21_v0 }
  0xa3   :  { %v32_v8 = vsel %vm23_vm0, %v31_v7, 0.0 }
  0xa4   :  { %33 = vadd.xlane.f32.xlu0 %v32_v8 }
 0x12d   :  { %v34_v9 = vpop.xlane.xlu0 %33 }
 0x12e   :  { %v35_v10 = vmul.f32 0.03125, %v34_v9 }
 0x130   :  { %v36_v11 = vsub.f32 %v31_v7, %v35_v10 }
 0x132   :  { %v37_v12 = vmul.f32 %v36_v11, %v36_v11 }
 0x134   :  { %v38_v13 = vsel %vm23_vm0, %v37_v12, 0.0 }
 0x135   :  { %39 = vadd.xlane.f32.xlu1 %v38_v13 }
 0x1be   :  { %v40_v19 = vpop.xlane.xlu1 %39 }
 0x1bf   :  { %v41_v20 = vmul.f32 0.03125, %v40_v19 }
 0x1c1   :  { %v42_v21 = vadd.f32 1e-05, %v41_v20 }
 0x1c3   :  { %187 = vrsqrt.f32 %v42_v21 }
 0x1d0   :  { %v188_v22 = vpop.eup %187 }
 0x1d1   :  { %v44_v24 = vmul.f32 %v188_v22, %v36_v11 }
 0x1d3   :  { %v52_v26 = vmul.f32 %v162_v23, %v44_v24 }
 0x1d5   :  { %v60_v27 = vadd.f32 %v163_v25, %v52_v26 }
 0x1d7   :  { %180 = vmatmul.mubr.msk.f32.vlgmr.msra.gmra.mxu0 %vm72_vm2, %v60_v27 }
 0x297   :  { %v142_v29 = vpop.f32.mrf.mxu0 }
 0x298   :  { %v143_v30 = vadd.f32 %v164_v28, %v142_v29 }
 0x299   :  { %v181_v31 = vpop.f32.mrf.mxu0 }
 0x29a   :  { %147 = vst.msk [vmem:[#allocation2] sm:$0x3] %vm146_vm3, %v143_v30 }
 0x29b   :  { %200 = shalt.err (!%p197_p4)
}
 0x29c   :  { %157 = dma.vmem_to_hbm [thread:$0]  %s155_s8, 32, %s279_s5, [#allocation3]  }
 0x29d   :  { %209 = dma.done.wait [#allocation3], 32  }
 0x29e   :  { %210 = vsyncadd [#allocation3], 4294967264 }
 0x29f   :  { %161 = vsyncpa [#allocation3], 1 }

// kernel: forward.14
= control target key start
LH: loop header
LB: loop body
LE: loop exit
PB: predicated region body
PF: predicated region fallthrough
CT: control target
= control target key end

     0   :  { %v2332_v4 = vmov 1966171168   ;;  %v210_v6 = vlaneseq  ;;  %vm315_vm0 = vcmask 123904   ;;  %s3105_s2 = inlined_call_operand.vmem [shape: f32[17,2,16], index: 2, kind: input, shape index: {}]   ;;  %s3106_s1 = inlined_call_operand.vmem [shape: f32[17,2,16], index: 1, kind: input, shape index: {}]   ;;  %s3107_s0 = inlined_call_operand.vmem [shape: f32[2,16], index: 0, kind: input, shape index: {}]   ;;  %s3108_s3 = inlined_call_operand.vmem [shape: f32[17,2,16], index: 3, kind: input, shape index: {}]   ;;  %s3109_s4 = inlined_call_operand.vmem [shape: f32[17,2,16], index: 4, kind: output, shape index: {}]  }
   0x1   :  { %v19_v0 = vld [vmem:[%s3105_s2] sm:$0x3]  ;;  %v20_v2 = vld [vmem:[%s3105_s2 + $0x2] sm:$0x3]  ;;  %v208_v5 = vunpack.c.l.s4 %v2332_v4  ;;  %v21_v7 = vld [vmem:[%s3105_s2 + $0x4] sm:$0x3] }
   0x2   :  { %v2180_v1 = vmul.f32 -1.442695, %v19_v0  ;;  %v2181_v3 = vmul.f32 -1.442695, %v20_v2  ;;  %v2182_v8 = vmul.f32 -1.442695, %v21_v7 }
   0x3   :  { %v2197_v9 = vld.sshfl [vmem:[%s3106_s1] sm:$0x11 pattern:$0x75316420]  ;;  %v22_v10 = vld [vmem:[%s3105_s2 + $0x6] sm:$0x3]  ;;  %v209_v11 = vunpack.c.0.s8 %v208_v5 }
   0x4   :  { %2263 = vpow2.f32 %v2180_v1  ;;  %v211_v12 = vshrl.u32 %v210_v6, 7  ;;  %v2183_v13 = vmul.f32 -1.442695, %v22_v10  ;;  %v23_v14 = vld [vmem:[%s3105_s2 + $0x8] sm:$0x3]  ;;  %v288_v18 = vcombine.high %v2197_v9, %v2197_v9 }
   0x5   :  { %2265 = vpow2.f32 %v2181_v3  ;;  %v2200_v15 = vld.sshfl [vmem:[%s3106_s1 + $0x2] sm:$0x11 pattern:$0x75316420]  ;;  %v2382_v16 = vld [vmem:[%s3107_s0] sm:$0x3] }
   0x6   :  { %2267 = vpow2.f32 %v2182_v8  ;;  %v24_v17 = vld [vmem:[%s3105_s2 + $0xa] sm:$0x3]  ;;  %v2204_v19 = vld.sshfl [vmem:[%s3106_s1 + $0x4] sm:$0x11 pattern:$0x75316420]  ;;  %v2390_v21 = vsub.s32 %v209_v11, %v211_v12  ;;  %v404_v22 = vcombine.high %v2200_v15, %v2200_v15 }
   0x7   :  { %2269 = vpow2.f32 %v2183_v13  ;;  %v2184_v20 = vmul.f32 -1.442695, %v23_v14  ;;  %v2185_v23 = vmul.f32 -1.442695, %v24_v17  ;;  %v25_v24 = vld [vmem:[%s3105_s2 + $0xc] sm:$0x3]  ;;  %v520_v31 = vcombine.high %v2204_v19, %v2204_v19 }
   0x8   :  { %v26_v25 = vld [vmem:[%s3105_s2 + $0xe] sm:$0x3]  ;;  %v2399_v26 = vsub.f32 1.0, %v2382_v16  ;;  %v295_v27 = vrot.slane %v2197_v9, %v2390_v21  ;;  %v2405_v29 = vsub.s32 0, %v211_v12  ;;  %v2408_v30 = vrot.slane %v288_v18, %v2390_v21  ;;  %v27_v33 = vld [vmem:[%s3105_s2 + $0x10] sm:$0x3] }
   0x9   :  { %2271 = vpow2.f32 %v2184_v20  ;;  %v2208_v28 = vld.sshfl [vmem:[%s3106_s1 + $0x6] sm:$0x11 pattern:$0x75316420]  ;;  %v2186_v32 = vmul.f32 -1.442695, %v25_v24  ;;  %v411_v34 = vrot.slane %v2200_v15, %v2390_v21  ;;  %v2415_v35 = vrot.slane %v404_v22, %v2390_v21 }
   0xa   :  { %2273 = vpow2.f32 %v2185_v23  ;;  %v2212_v36 = vld.sshfl [vmem:[%s3106_s1 + $0x8] sm:$0x11 pattern:$0x75316420]  ;;  %v2187_v37 = vmul.f32 -1.442695, %v26_v25  ;;  %v527_v39 = vrot.slane %v2204_v19, %v2390_v21  ;;  %v636_v40 = vcombine.high %v2208_v28, %v2208_v28 }
   0xb   :  { %v2216_v41 = vld.sshfl [vmem:[%s3106_s1 + $0xa] sm:$0x11 pattern:$0x75316420]  ;;  %2275 = vpow2.f32 %v2186_v32  ;;  %v28_v42 = vld [vmem:[%s3105_s2 + $0x12] sm:$0x3]  ;;  %v2428_v45 = vrot.slane %v295_v27, %v2405_v29  ;;  %v310_v47 = vrot.slane %v2408_v30, %v2405_v29  ;;  %v2433_v49 = vrot.slane %v520_v31, %v2390_v21 }
   0xc   :  { %2277 = vpow2.f32 %v2187_v37  ;;  %v2188_v46 = vmul.f32 -1.442695, %v27_v33  ;;  %v752_v50 = vcombine.high %v2212_v36, %v2212_v36  ;;  %v29_v51 = vld [vmem:[%s3105_s2 + $0x14] sm:$0x3]  ;;  %v2439_v53 = vrot.slane %v411_v34, %v2405_v29  ;;  %v30_v63 = vld [vmem:[%s3105_s2 + $0x16] sm:$0x3] }
   0xd   :  { %v426_v54 = vrot.slane %v2415_v35, %v2405_v29  ;;  %v2189_v55 = vmul.f32 -1.442695, %v28_v42  ;;  %v643_v57 = vrot.slane %v2208_v28, %v2390_v21  ;;  %v2445_v58 = vrot.slane %v636_v40, %v2390_v21  ;;  %v2220_v59 = vld.sshfl [vmem:[%s3106_s1 + $0xc] sm:$0x11 pattern:$0x75316420] }
   0xe   :  { %v2451_v60 = vrot.slane %v527_v39, %v2405_v29  ;;  %v868_v61 = vcombine.high %v2216_v41, %v2216_v41  ;;  %v2190_v62 = vmul.f32 -1.442695, %v29_v51  ;;  %v542_v1 = vrot.slane %v2433_v49, %v2405_v29  ;;  %v2224_v4 = vld.sshfl [vmem:[%s3106_s1 + $0xe] sm:$0x11 pattern:$0x75316420] }
   0xf   :  { %v759_v2 = vrot.slane %v2212_v36, %v2390_v21  ;;  %v2460_v3 = vrot.slane %v752_v50, %v2390_v21  ;;  %v875_v6 = vrot.slane %v2216_v41, %v2390_v21  ;;  %v984_v7 = vcombine.high %v2220_v59, %v2220_v59  ;;  %v2228_v8 = vld.sshfl [vmem:[%s3106_s1 + $0x10] sm:$0x11 pattern:$0x75316420]  ;;  %v31_v12 = vld [vmem:[%s3105_s2 + $0x18] sm:$0x3] }
  0x10   :  { %v2470_v9 = vrot.slane %v643_v57, %v2405_v29  ;;  %v658_v10 = vrot.slane %v2445_v58, %v2405_v29  ;;  %v2191_v11 = vmul.f32 -1.442695, %v30_v63  ;;  %v2478_v14 = vrot.slane %v868_v61, %v2390_v21  ;;  %v2232_v18 = vld.sshfl [vmem:[%s3106_s1 + $0x12] sm:$0x11 pattern:$0x75316420] }
  0x11   :  { %v2264_v38 = vpop.eup %2263  ;;  %v991_v15 = vrot.slane %v2220_v59, %v2390_v21  ;;  %v1100_v17 = vcombine.high %v2224_v4, %v2224_v4  ;;  %v32_v19 = vld [vmem:[%s3105_s2 + $0x1a] sm:$0x3]  ;;  %v2488_v23 = vrot.slane %v759_v2, %v2405_v29  ;;  %v774_v24 = vrot.slane %v2460_v3, %v2405_v29  ;;  %v33_v41 = vld [vmem:[%s3105_s2 + $0x1c] sm:$0x3] }
  0x12   :  { %v2266_v43 = vpop.eup %2265  ;;  %v87_v44 = vadd.f32 1.0, %v2264_v38  ;;  %v1216_v25 = vcombine.high %v2228_v8, %v2228_v8  ;;  %v2493_v28 = vrot.slane %v875_v6, %v2405_v29  ;;  %v2496_v31 = vrot.slane %v984_v7, %v2390_v21 }
  0x13   :  { %v88_v48 = vadd.f32 1.0, %v2266_v43  ;;  %v2268_v52 = vpop.eup %2267  ;;  %v2192_v32 = vmul.f32 -1.442695, %v31_v12  ;;  %v1107_v33 = vrot.slane %v2224_v4, %v2390_v21  ;;  %v1332_v34 = vcombine.high %v2232_v18, %v2232_v18 }
  0x14   :  { %2279 = vrcp.f32 %v87_v44  ;;  %v89_v56 = vadd.f32 1.0, %v2268_v52  ;;  %v2270_v0 = vpop.eup %2269  ;;  %v2193_v36 = vmul.f32 -1.442695, %v32_v19  ;;  %v2502_v39 = vrot.slane %v991_v15, %v2405_v29 }
  0x15   :  { %2281 = vrcp.f32 %v88_v48  ;;  %v90_v5 = vadd.f32 1.0, %v2270_v0  ;;  %v2505_v40 = vrot.slane %v1100_v17, %v2390_v21  ;;  %v1223_v44 = vrot.slane %v2228_v8, %v2390_v21  ;;  %v34_v48 = vld [vmem:[%s3105_s2 + $0x1e] sm:$0x3] }
  0x16   :  { %2283 = vpow2.f32 %v2188_v46  ;;  %v2272_v13 = vpop.eup %2271  ;;  %v2512_v46 = vrot.slane %v1216_v25, %v2390_v21  ;;  %v1339_v52 = vrot.slane %v2232_v18, %v2390_v21  ;;  %v2524_v57 = vrot.slane %v1332_v34, %v2390_v21 }
  0x17   :  { %2285 = vrcp.f32 %v89_v56  ;;  %v2274_v20 = vpop.eup %2273  ;;  %v91_v22 = vadd.f32 1.0, %v2272_v13  ;;  %v2521_v56 = vrot.slane %v1107_v33, %v2405_v29  ;;  %v2194_v59 = vmul.f32 -1.442695, %v33_v41 }
  0x18   :  { %2287 = vpow2.f32 %v2189_v55  ;;  %v92_v27 = vadd.f32 1.0, %v2274_v20  ;;  %v2276_v37 = vpop.eup %2275  ;;  %v2195_v0 = vmul.f32 -1.442695, %v34_v48  ;;  %v2537_v12 = vrot.slane %v1339_v52, %v2405_v29 }
  0x19   :  { %2289 = vpow2.f32 %v2190_v62  ;;  %v2278_v42 = vpop.eup %2277  ;;  %v93_v43 = vadd.f32 1.0, %v2276_v37 }
  0x1a   :  { %2291 = vrcp.f32 %v90_v5  ;;  %v94_v51 = vadd.f32 1.0, %v2278_v42  ;;  %v2531_v5 = vrot.slane %v1223_v44, %v2405_v29 }
  0x1b   :  { %2293 = vpow2.f32 %v2191_v11 }
  0x1c   :  { %2295 = vrcp.f32 %v91_v22 }
  0x1d   :  { %2297 = vrcp.f32 %v92_v27 }
  0x1e   :  { %2299 = vpow2.f32 %v2192_v32 }
  0x1f   :  { %2301 = vpow2.f32 %v2193_v36 }
  0x20   :  { %2303 = vrcp.f32 %v93_v43 }
  0x21   :  { %v2280_v55 = vpop.eup %2279  ;;  %2305 = vrcp.f32 %v94_v51 }
  0x22   :  { %v2282_v61 = vpop.eup %2281  ;;  %v138_v62 = vmul.f32 %v2280_v55, %v2399_v26  ;;  %2307 = vpow2.f32 %v2194_v59 }
  0x23   :  { %v2284_v2 = vpop.eup %2283  ;;  %v139_v4 = vmul.f32 %v2282_v61, %v2399_v26  ;;  %2309 = vpow2.f32 %v2195_v0 }
  0x24   :  { %v2286_v7 = vpop.eup %2285  ;;  %v155_v8 = vadd.f32 %v138_v62, %v2382_v16  ;;  %v95_v11 = vadd.f32 1.0, %v2284_v2  ;;  %v264_v2 = vld [vmem:[%s3108_s3] sm:$0x3] }
  0x25   :  { %v2288_v13 = vpop.eup %2287  ;;  %v156_v15 = vadd.f32 %v139_v4, %v2382_v16  ;;  %v140_v17 = vmul.f32 %v2286_v7, %v2399_v26 }
  0x26   :  { %v2290_v19 = vpop.eup %2289  ;;  %v172_v20 = vadd.f32 1e-06, %v155_v8  ;;  %v189_v22 = vsub.f32 1.0, %v155_v8  ;;  %2311 = vrcp.f32 %v95_v11  ;;  %v96_v25 = vadd.f32 1.0, %v2288_v13 }
  0x27   :  { %v2292_v27 = vpop.eup %2291  ;;  %v173_v32 = vadd.f32 1e-06, %v156_v15  ;;  %v190_v33 = vsub.f32 1.0, %v156_v15  ;;  %v157_v34 = vadd.f32 %v140_v17, %v2382_v16  ;;  %v2544_v36 = vadd.f32 1.0, %v2290_v19 }
  0x28   :  { %v213_v37 = vrot.slane %v172_v20, %v2390_v21  ;;  %v248_v41 = vrot.slane %v189_v22, %v2390_v21  ;;  %v141_v42 = vmul.f32 %v2292_v27, %v2399_v26  ;;  %2313 = vrcp.f32 %v96_v25  ;;  %v2551_v52 = vpop.eup %2293  ;;  %v2198_v22 = vld [vmem:[%s3108_s3 + $0x2] sm:$0x3] }
  0x29   :  { %v327_v43 = vrot.slane %v173_v32, %v2390_v21  ;;  %v362_v44 = vrot.slane %v190_v33, %v2390_v21  ;;  %v174_v48 = vadd.f32 1e-06, %v157_v34  ;;  %v191_v51 = vsub.f32 1.0, %v157_v34  ;;  %v2555_v0 = vpop.eup %2295 }
  0x2a   :  { %v214_v55 = vcombine.high %v213_v37, %v213_v37  ;;  %v221_v59 = vrot.slane %v213_v37, %v2390_v21  ;;  %v249_v61 = vcombine.high %v248_v41, %v248_v41  ;;  %v256_v62 = vrot.slane %v248_v41, %v2390_v21  ;;  %v2562_v13 = vpop.eup %2297 }
  0x2b   :  { %v328_v4 = vcombine.high %v327_v43, %v327_v43  ;;  %v335_v7 = vrot.slane %v327_v43, %v2390_v21  ;;  %v363_v8 = vcombine.high %v362_v44, %v362_v44  ;;  %v370_v11 = vrot.slane %v362_v44, %v2390_v21  ;;  %v2571_v25 = vpop.eup %2299 }
  0x2c   :  { %v228_v15 = vrot.slane %v214_v55, %v2390_v21  ;;  %v232_v17 = vrot.slane %v221_v59, %v2405_v29  ;;  %v263_v19 = vrot.slane %v249_v61, %v2390_v21  ;;  %v268_v20 = vrot.slane %v256_v62, %v2405_v29  ;;  %v2577_v37 = vpop.eup %2301 }
  0x2d   :  { %v342_v27 = vrot.slane %v328_v4, %v2390_v21  ;;  %v346_v32 = vrot.slane %v335_v7, %v2405_v29  ;;  %v377_v33 = vrot.slane %v363_v8, %v2390_v21  ;;  %v383_v34 = vrot.slane %v370_v11, %v2405_v29  ;;  %v2581_v59 = vpop.eup %2303 }
  0x2e   :  { %v236_v41 = vrot.slane %v228_v15, %v2405_v29  ;;  %v239_v43 = vmul.f32 0.0, %v232_v17  ;;  %v272_v44 = vrot.slane %v263_v19, %v2405_v29  ;;  %v275_v55 = vmul.f32 %v268_v20, %v264_v2  ;;  %v2586_v8 = vpop.eup %2305 }
  0x2f   :  { %v350_v61 = vrot.slane %v342_v27, %v2405_v29  ;;  %v387_v62 = vrot.slane %v377_v33, %v2405_v29  ;;  %v390_v4 = vmul.f32 %v2198_v22, %v383_v34  ;;  %v443_v7 = vrot.slane %v174_v48, %v2390_v21  ;;  %v2589_v17 = vpop.eup %2307 }
  0x30   :  { %v240_v11 = vmul.f32 0.0, %v236_v41  ;;  %v276_v18 = vmul.f32 %v272_v44, %v264_v2  ;;  %v277_v6 = vadd.f32 %v275_v55, %v239_v43  ;;  %v478_v15 = vrot.slane %v191_v51, %v2390_v21  ;;  %v2593_v50 = vpop.eup %2309 }
  0x31   :  { %v391_v19 = vmul.f32 %v2198_v22, %v387_v62  ;;  %v444_v20 = vcombine.high %v443_v7, %v443_v7  ;;  %v451_v63 = vrot.slane %v443_v7, %v2390_v21  ;;  %v158_v27 = vadd.f32 %v141_v42, %v2382_v16 }
  0x32   :  { %v278_v33 = vadd.f32 %v276_v18, %v240_v11  ;;  %v313_v48 = vmul.f32 %v2428_v45, %v277_v6  ;;  %v353_v34 = vmul.f32 %v346_v32, %v277_v6  ;;  %v479_v38 = vcombine.high %v478_v15, %v478_v15  ;;  %v2202_v45 = vld [vmem:[%s3108_s3 + $0x4] sm:$0x3] }
  0x33   :  { %v2596_v41 = vpop.eup %2311  ;;  %v458_v2 = vrot.slane %v444_v20, %v2390_v21  ;;  %v462_v51 = vrot.slane %v451_v63, %v2405_v29  ;;  %v486_v22 = vrot.slane %v478_v15, %v2390_v21  ;;  %v175_v43 = vadd.f32 1e-06, %v158_v27 }
  0x34   :  { %v314_v42 = vmul.f32 %v310_v47, %v278_v33  ;;  %v316_v44 = vsel %vm315_vm0, %v313_v48, 0.0  ;;  %v354_v18 = vmul.f32 %v350_v61, %v278_v33  ;;  %v392_v55 = vadd.f32 %v390_v4, %v353_v34 }
  0x35   :  { %v2608_v6 = vpop.eup %2313  ;;  %v466_v32 = vrot.slane %v458_v2, %v2405_v29  ;;  %v493_v63 = vrot.slane %v479_v38, %v2390_v21  ;;  %v499_v62 = vrot.slane %v486_v22, %v2405_v29  ;;  %v192_v7 = vsub.f32 1.0, %v158_v27 }
  0x36   :  { %v317_v30 = vsel %vm315_vm0, %v314_v42, 0.0  ;;  %v393_v47 = vadd.f32 %v391_v19, %v354_v18  ;;  %v429_v11 = vmul.f32 %v2439_v53, %v392_v55  ;;  %v469_v61 = vmul.f32 %v462_v51, %v392_v55 }
  0x37   :  { %v318_v4 = vadd.f32 %v317_v30, %v316_v44  ;;  %v503_v15 = vrot.slane %v493_v63, %v2405_v29  ;;  %v506_v20 = vmul.f32 %v2202_v45, %v499_v62  ;;  %v559_v33 = vrot.slane %v175_v43, %v2390_v21 }
  0x38   :  { %v430_v48 = vmul.f32 %v426_v54, %v393_v47  ;;  %v431_v38 = vsel %vm315_vm0, %v429_v11, 0.0  ;;  %v470_v34 = vmul.f32 %v466_v32, %v393_v47  ;;  %v594_v27 = vrot.slane %v192_v7, %v2390_v21 }
  0x39   :  { %319 = vst.msk [vmem:[%s3109_s4] sm:$0x3] %vm315_vm0, %v318_v4  ;;  %v507_v53 = vmul.f32 %v2202_v45, %v503_v15  ;;  %v508_v19 = vadd.f32 %v506_v20, %v469_v61  ;;  %v560_v2 = vcombine.high %v559_v33, %v559_v33  ;;  %v567_v51 = vrot.slane %v559_v33, %v2390_v21  ;;  %v2206_v45 = vld [vmem:[%s3108_s3 + $0x6] sm:$0x3] }
  0x3a   :  { %v432_v22 = vsel %vm315_vm0, %v430_v48, 0.0  ;;  %v595_v43 = vcombine.high %v594_v27, %v594_v27  ;;  %v602_v35 = vrot.slane %v594_v27, %v2390_v21  ;;  %v142_v54 = vmul.f32 %v2555_v0, %v2399_v26 }
  0x3b   :  { %v433_v42 = vadd.f32 %v432_v22, %v431_v38  ;;  %v509_v44 = vadd.f32 %v507_v53, %v470_v34  ;;  %v545_v18 = vmul.f32 %v2451_v60, %v508_v19  ;;  %v574_v55 = vrot.slane %v560_v2, %v2390_v21 }
  0x3c   :  { %v578_v32 = vrot.slane %v567_v51, %v2405_v29  ;;  %v609_v63 = vrot.slane %v595_v43, %v2390_v21  ;;  %v615_v62 = vrot.slane %v602_v35, %v2405_v29  ;;  %v159_v7 = vadd.f32 %v142_v54, %v2382_v16 }
  0x3d   :  { %2201 = vst.msk [vmem:[%s3109_s4 + $0x2] sm:$0x3] %vm315_vm0, %v433_v42  ;;  %v546_v60 = vmul.f32 %v542_v1, %v509_v44  ;;  %v547_v0 = vsel %vm315_vm0, %v545_v18, 0.0  ;;  %v582_v30 = vrot.slane %v574_v55, %v2405_v29  ;;  %v143_v47 = vmul.f32 %v2562_v13, %v2399_v26 }
  0x3e   :  { %v585_v11 = vmul.f32 %v578_v32, %v508_v19  ;;  %v619_v61 = vrot.slane %v609_v63, %v2405_v29  ;;  %v622_v4 = vmul.f32 %v2206_v45, %v615_v62  ;;  %v176_v15 = vadd.f32 1e-06, %v159_v7  ;;  %v2210_v32 = vld [vmem:[%s3108_s3 + $0x8] sm:$0x3] }
  0x3f   :  { %v548_v20 = vsel %vm315_vm0, %v546_v60, 0.0  ;;  %v586_v33 = vmul.f32 %v582_v30, %v509_v44  ;;  %v193_v48 = vsub.f32 1.0, %v159_v7  ;;  %v160_v38 = vadd.f32 %v143_v47, %v2382_v16 }
  0x40   :  { %v549_v49 = vadd.f32 %v548_v20, %v547_v0  ;;  %v623_v1 = vmul.f32 %v2206_v45, %v619_v61  ;;  %v624_v34 = vadd.f32 %v622_v4, %v585_v11  ;;  %v675_v27 = vrot.slane %v176_v15, %v2390_v21 }
  0x41   :  { %v710_v53 = vrot.slane %v193_v48, %v2390_v21  ;;  %v177_v2 = vadd.f32 1e-06, %v160_v38  ;;  %v194_v13 = vsub.f32 1.0, %v160_v38  ;;  %v144_v19 = vmul.f32 %v2581_v59, %v2399_v26 }
  0x42   :  { %2205 = vst.msk [vmem:[%s3109_s4 + $0x4] sm:$0x3] %vm315_vm0, %v549_v49  ;;  %v625_v51 = vadd.f32 %v623_v1, %v586_v33  ;;  %v661_v22 = vmul.f32 %v2470_v9, %v624_v34  ;;  %v676_v43 = vcombine.high %v675_v27, %v675_v27  ;;  %v683_v35 = vrot.slane %v675_v27, %v2390_v21 }
  0x43   :  { %v711_v54 = vcombine.high %v710_v53, %v710_v53  ;;  %v718_v42 = vrot.slane %v710_v53, %v2390_v21  ;;  %v791_v44 = vrot.slane %v177_v2, %v2390_v21  ;;  %v826_v18 = vrot.slane %v194_v13, %v2390_v21 }
  0x44   :  { %v662_v59 = vmul.f32 %v658_v10, %v625_v51  ;;  %v663_v55 = vsel %vm315_vm0, %v661_v22, 0.0  ;;  %v690_v45 = vrot.slane %v676_v43, %v2390_v21  ;;  %v694_v9 = vrot.slane %v683_v35, %v2405_v29 }
  0x45   :  { %v725_v63 = vrot.slane %v711_v54, %v2390_v21  ;;  %v731_v62 = vrot.slane %v718_v42, %v2405_v29  ;;  %v792_v7 = vcombine.high %v791_v44, %v791_v44  ;;  %v799_v60 = vrot.slane %v791_v44, %v2390_v21 }
  0x46   :  { %v664_v58 = vsel %vm315_vm0, %v662_v59, 0.0  ;;  %v698_v10 = vrot.slane %v690_v45, %v2405_v29  ;;  %v701_v0 = vmul.f32 %v694_v9, %v624_v34  ;;  %v827_v30 = vcombine.high %v826_v18, %v826_v18  ;;  %v2214_v34 = vld [vmem:[%s3108_s3 + $0xa] sm:$0x3] }
  0x47   :  { %v665_v47 = vadd.f32 %v664_v58, %v663_v55  ;;  %v735_v11 = vrot.slane %v725_v63, %v2405_v29  ;;  %v738_v61 = vmul.f32 %v2210_v32, %v731_v62  ;;  %v806_v4 = vrot.slane %v792_v7, %v2390_v21 }
  0x48   :  { %v702_v15 = vmul.f32 %v698_v10, %v625_v51  ;;  %v810_v20 = vrot.slane %v799_v60, %v2405_v29  ;;  %v834_v33 = vrot.slane %v826_v18, %v2390_v21  ;;  %v841_v48 = vrot.slane %v827_v30, %v2390_v21 }
  0x49   :  { %2209 = vst.msk [vmem:[%s3109_s4 + $0x6] sm:$0x3] %vm315_vm0, %v665_v47  ;;  %v739_v38 = vmul.f32 %v2210_v32, %v735_v11  ;;  %v740_v49 = vadd.f32 %v738_v61, %v701_v0  ;;  %v814_v1 = vrot.slane %v806_v4, %v2405_v29  ;;  %v161_v27 = vadd.f32 %v144_v19, %v2382_v16  ;;  %v2218_v61 = vld [vmem:[%s3108_s3 + $0xc] sm:$0x3] }
  0x4a   :  { %v847_v53 = vrot.slane %v834_v33, %v2405_v29  ;;  %v851_v2 = vrot.slane %v841_v48, %v2405_v29  ;;  %v145_v13 = vmul.f32 %v2586_v8, %v2399_v26  ;;  %v146_v51 = vmul.f32 %v2596_v41, %v2399_v26 }
  0x4b   :  { %v741_v22 = vadd.f32 %v739_v38, %v702_v15  ;;  %v777_v43 = vmul.f32 %v2488_v23, %v740_v49  ;;  %v817_v35 = vmul.f32 %v810_v20, %v740_v49  ;;  %v178_v54 = vadd.f32 1e-06, %v161_v27 }
  0x4c   :  { %v854_v42 = vmul.f32 %v2214_v34, %v847_v53  ;;  %v855_v44 = vmul.f32 %v2214_v34, %v851_v2  ;;  %v195_v18 = vsub.f32 1.0, %v161_v27  ;;  %v162_v19 = vadd.f32 %v145_v13, %v2382_v16 }
  0x4d   :  { %v778_v59 = vmul.f32 %v774_v24, %v741_v22  ;;  %v779_v55 = vsel %vm315_vm0, %v777_v43, 0.0  ;;  %v818_v8 = vmul.f32 %v814_v1, %v741_v22  ;;  %v907_v45 = vrot.slane %v178_v54, %v2390_v21 }
  0x4e   :  { %v856_v41 = vadd.f32 %v854_v42, %v817_v35  ;;  %v942_v9 = vrot.slane %v195_v18, %v2390_v21  ;;  %v179_v23 = vadd.f32 1e-06, %v162_v19  ;;  %v196_v32 = vsub.f32 1.0, %v162_v19 }
  0x4f   :  { %v780_v63 = vsel %vm315_vm0, %v778_v59, 0.0  ;;  %v857_v62 = vadd.f32 %v855_v44, %v818_v8  ;;  %v908_v7 = vcombine.high %v907_v45, %v907_v45  ;;  %v915_v60 = vrot.slane %v907_v45, %v2390_v21  ;;  %v2222_v44 = vld [vmem:[%s3108_s3 + $0xe] sm:$0x3] }
  0x50   :  { %v781_v58 = vadd.f32 %v780_v63, %v779_v55  ;;  %v893_v3 = vmul.f32 %v2493_v28, %v856_v41  ;;  %v943_v24 = vcombine.high %v942_v9, %v942_v9  ;;  %v950_v10 = vrot.slane %v942_v9, %v2390_v21 }
  0x51   :  { %v3110_v0 = vrot.slane %v2478_v14, %v2405_v29  ;;  %v922_v47 = vrot.slane %v908_v7, %v2390_v21  ;;  %v926_v11 = vrot.slane %v915_v60, %v2405_v29  ;;  %v1023_v4 = vrot.slane %v179_v23, %v2390_v21 }
  0x52   :  { %2213 = vst.msk [vmem:[%s3109_s4 + $0x8] sm:$0x3] %vm315_vm0, %v781_v58  ;;  %v895_v28 = vsel %vm315_vm0, %v893_v3, 0.0  ;;  %v957_v14 = vrot.slane %v943_v24, %v2390_v21  ;;  %v963_v15 = vrot.slane %v950_v10, %v2405_v29  ;;  %v1058_v20 = vrot.slane %v196_v32, %v2390_v21 }
  0x53   :  { %v894_v30 = vmul.f32 %v3110_v0, %v857_v62  ;;  %v930_v48 = vrot.slane %v922_v47, %v2405_v29  ;;  %v933_v38 = vmul.f32 %v926_v11, %v856_v41  ;;  %v1024_v49 = vcombine.high %v1023_v4, %v1023_v4 }
  0x54   :  { %v967_v34 = vrot.slane %v957_v14, %v2405_v29  ;;  %v970_v27 = vmul.f32 %v2218_v61, %v963_v15  ;;  %v1031_v53 = vrot.slane %v1023_v4, %v2390_v21  ;;  %v1059_v22 = vcombine.high %v1058_v20, %v1058_v20 }
  0x55   :  { %v896_v33 = vsel %vm315_vm0, %v894_v30, 0.0  ;;  %v934_v2 = vmul.f32 %v930_v48, %v857_v62  ;;  %v1038_v13 = vrot.slane %v1024_v49, %v2390_v21  ;;  %v1066_v43 = vrot.slane %v1058_v20, %v2390_v21 }
  0x56   :  { %v897_v1 = vadd.f32 %v896_v33, %v895_v28  ;;  %v971_v35 = vmul.f32 %v2218_v61, %v967_v34  ;;  %v972_v54 = vadd.f32 %v970_v27, %v933_v38  ;;  %v1042_v42 = vrot.slane %v1031_v53, %v2405_v29  ;;  %v2226_v34 = vld [vmem:[%s3108_s3 + $0x10] sm:$0x3] }
  0x57   :  { %v163_v18 = vadd.f32 %v146_v51, %v2382_v16  ;;  %v1046_v19 = vrot.slane %v1038_v13, %v2405_v29  ;;  %v1073_v59 = vrot.slane %v1059_v22, %v2390_v21  ;;  %v1079_v55 = vrot.slane %v1066_v43, %v2405_v29 }
  0x58   :  { %2217 = vst.msk [vmem:[%s3109_s4 + $0xa] sm:$0x3] %vm315_vm0, %v897_v1  ;;  %v147_v8 = vmul.f32 %v2608_v6, %v2399_v26  ;;  %v973_v45 = vadd.f32 %v971_v35, %v934_v2  ;;  %v1009_v41 = vmul.f32 %v2502_v39, %v972_v54  ;;  %v1049_v9 = vmul.f32 %v1042_v42, %v972_v54 }
  0x59   :  { %v180_v23 = vadd.f32 1e-06, %v163_v18  ;;  %v1083_v32 = vrot.slane %v1073_v59, %v2405_v29  ;;  %v1086_v63 = vmul.f32 %v2222_v44, %v1079_v55  ;;  %v197_v62 = vsub.f32 1.0, %v163_v18 }
  0x5a   :  { %v164_v51 = vadd.f32 %v147_v8, %v2382_v16  ;;  %v3111_v7 = vrot.slane %v2496_v31, %v2405_v29  ;;  %v1011_v58 = vsel %vm315_vm0, %v1009_v41, 0.0  ;;  %v1050_v3 = vmul.f32 %v1046_v19, %v973_v45 }
  0x5b   :  { %v1139_v6 = vrot.slane %v180_v23, %v2390_v21  ;;  %v1087_v24 = vmul.f32 %v2222_v44, %v1083_v32  ;;  %v1088_v10 = vadd.f32 %v1086_v63, %v1049_v9  ;;  %v1174_v39 = vrot.slane %v197_v62, %v2390_v21  ;;  %v2230_v23 = vld [vmem:[%s3108_s3 + $0x12] sm:$0x3] }
  0x5c   :  { %v1010_v60 = vmul.f32 %v3111_v7, %v973_v45  ;;  %v181_v0 = vadd.f32 1e-06, %v164_v51  ;;  %v198_v61 = vsub.f32 1.0, %v164_v51  ;;  %v3112_v38 = vrot.slane %v2505_v40, %v2405_v29 }
  0x5d   :  { %v1140_v47 = vcombine.high %v1139_v6, %v1139_v6  ;;  %v1147_v11 = vrot.slane %v1139_v6, %v2390_v21  ;;  %v1089_v28 = vadd.f32 %v1087_v24, %v1050_v3  ;;  %v1125_v31 = vmul.f32 %v2521_v56, %v1088_v10  ;;  %v2236_v7 = vld.sshfl [vmem:[%s3106_s1 + $0x14] sm:$0x11 pattern:$0x75316420] }
  0x5e   :  { %v1012_v30 = vsel %vm315_vm0, %v1010_v60, 0.0  ;;  %v1175_v14 = vcombine.high %v1174_v39, %v1174_v39  ;;  %v1182_v33 = vrot.slane %v1174_v39, %v2390_v21  ;;  %v1255_v48 = vrot.slane %v181_v0, %v2390_v21 }
  0x5f   :  { %v1013_v4 = vadd.f32 %v1012_v30, %v1011_v58  ;;  %v1154_v15 = vrot.slane %v1140_v47, %v2390_v21  ;;  %v1158_v20 = vrot.slane %v1147_v11, %v2405_v29  ;;  %v1126_v49 = vmul.f32 %v3112_v38, %v1089_v28 }
  0x60   :  { %v1127_v56 = vsel %vm315_vm0, %v1125_v31, 0.0  ;;  %v1189_v1 = vrot.slane %v1175_v14, %v2390_v21  ;;  %v1290_v27 = vrot.slane %v198_v61, %v2390_v21  ;;  %v1195_v13 = vrot.slane %v1182_v33, %v2405_v29  ;;  %v2248_v61 = vld.sshfl [vmem:[%s3106_s1 + $0x1a] sm:$0x11 pattern:$0x75316420] }
  0x61   :  { %2221 = vst.msk [vmem:[%s3109_s4 + $0xc] sm:$0x3] %vm315_vm0, %v1013_v4  ;;  %v1162_v53 = vrot.slane %v1154_v15, %v2405_v29  ;;  %v1165_v2 = vmul.f32 %v1158_v20, %v1088_v10  ;;  %v1256_v22 = vcombine.high %v1255_v48, %v1255_v48  ;;  %v1128_v43 = vsel %vm315_vm0, %v1126_v49, 0.0 }
  0x62   :  { %v1199_v40 = vrot.slane %v1189_v1, %v2405_v29  ;;  %v1263_v35 = vrot.slane %v1255_v48, %v2390_v21  ;;  %v1291_v54 = vcombine.high %v1290_v27, %v1290_v27  ;;  %v1129_v42 = vadd.f32 %v1128_v43, %v1127_v56 }
  0x63   :  { %v1166_v44 = vmul.f32 %v1162_v53, %v1089_v28  ;;  %v1202_v18 = vmul.f32 %v2226_v34, %v1195_v13  ;;  %v1270_v19 = vrot.slane %v1256_v22, %v2390_v21  ;;  %v1298_v8 = vrot.slane %v1290_v27, %v2390_v21  ;;  %v35_v13 = vld [vmem:[%s3105_s2 + $0x20] sm:$0x3] }
  0x64   :  { %v1203_v59 = vmul.f32 %v2226_v34, %v1199_v40  ;;  %v1274_v55 = vrot.slane %v1263_v35, %v2405_v29  ;;  %v1305_v45 = vrot.slane %v1291_v54, %v2390_v21  ;;  %2225 = vst.msk [vmem:[%s3109_s4 + $0xe] sm:$0x3] %vm315_vm0, %v1129_v42  ;;  %2315 = vrcp.f32 %v2544_v36  ;;  %v2240_v36 = vld.sshfl [vmem:[%s3106_s1 + $0x16] sm:$0x11 pattern:$0x75316420] }
  0x65   :  { %v1204_v41 = vadd.f32 %v1202_v18, %v1165_v2  ;;  %v1278_v9 = vrot.slane %v1270_v19, %v2405_v29  ;;  %v98_v32 = vadd.f32 1.0, %v2551_v52  ;;  %v1311_v62 = vrot.slane %v1298_v8, %v2405_v29  ;;  %v2860_v2 = vld.sshfl [vmem:[%s3106_s1 + $0x1e] sm:$0x11 pattern:$0x75316420] }
  0x66   :  { %v1205_v63 = vadd.f32 %v1203_v59, %v1166_v44  ;;  %v1315_v51 = vrot.slane %v1305_v45, %v2405_v29  ;;  %v99_v60 = vadd.f32 1.0, %v2571_v25  ;;  %v100_v52 = vadd.f32 1.0, %v2577_v37  ;;  %v2244_v25 = vld.sshfl [vmem:[%s3106_s1 + $0x18] sm:$0x11 pattern:$0x75316420] }
  0x67   :  { %v1241_v58 = vmul.f32 %v2531_v5, %v1204_v41  ;;  %v1281_v3 = vmul.f32 %v1274_v55, %v1204_v41  ;;  %2317 = vrcp.f32 %v98_v32  ;;  %v3113_v6 = vrot.slane %v2512_v46, %v2405_v29 }
  0x68   :  { %v1282_v10 = vmul.f32 %v1278_v9, %v1205_v63  ;;  %v1318_v39 = vmul.f32 %v2230_v23, %v1311_v62  ;;  %v1319_v0 = vmul.f32 %v2230_v23, %v1315_v51  ;;  %2319 = vrcp.f32 %v99_v60 }
  0x69   :  { %v1242_v24 = vmul.f32 %v3113_v6, %v1205_v63  ;;  %v1243_v5 = vsel %vm315_vm0, %v1241_v58, 0.0  ;;  %v101_v30 = vadd.f32 1.0, %v2589_v17  ;;  %v102_v47 = vadd.f32 1.0, %v2593_v50 }
  0x6a   :  { %v2819_v11 = vadd.f32 %v1318_v39, %v1281_v3  ;;  %v2821_v46 = vadd.f32 %v1319_v0, %v1282_v10  ;;  %2321 = vrcp.f32 %v100_v52  ;;  %v1448_v28 = vcombine.high %v2236_v7, %v2236_v7  ;;  %v2252_v17 = vld.sshfl [vmem:[%s3106_s1 + $0x1c] sm:$0x11 pattern:$0x75316420] }
  0x6b   :  { %v1244_v37 = vsel %vm315_vm0, %v1242_v24, 0.0  ;;  %2323 = vrcp.f32 %v101_v30  ;;  %v3114_v31 = vrot.slane %v2524_v57, %v2405_v29  ;;  %v1564_v15 = vcombine.high %v2240_v36, %v2240_v36 }
  0x6c   :  { %v1245_v4 = vadd.f32 %v1244_v37, %v1243_v5  ;;  %v1357_v50 = vmul.f32 %v2537_v12, %v2819_v11  ;;  %2325 = vrcp.f32 %v102_v47  ;;  %v1680_v20 = vcombine.high %v2244_v25, %v2244_v25 }
  0x6d   :  { %v1358_v14 = vmul.f32 %v3114_v31, %v2821_v46  ;;  %v1796_v38 = vcombine.high %v2248_v61, %v2248_v61  ;;  %v1912_v49 = vcombine.high %v2252_v17, %v2252_v17  ;;  %v1455_v56 = vrot.slane %v2236_v7, %v2390_v21 }
  0x6e   :  { %2229 = vst.msk [vmem:[%s3109_s4 + $0x10] sm:$0x3] %vm315_vm0, %v1245_v4  ;;  %v1359_v33 = vsel %vm315_vm0, %v1357_v50, 0.0  ;;  %v2843_v57 = vrot.slane %v1448_v28, %v2390_v21  ;;  %v1571_v1 = vrot.slane %v2240_v36, %v2390_v21  ;;  %v2847_v34 = vrot.slane %v1564_v15, %v2390_v21 }
  0x6f   :  { %v1360_v48 = vsel %vm315_vm0, %v1358_v14, 0.0  ;;  %v1687_v27 = vrot.slane %v2244_v25, %v2390_v21  ;;  %v2855_v53 = vrot.slane %v1680_v20, %v2390_v21  ;;  %v1803_v43 = vrot.slane %v2248_v61, %v2390_v21  ;;  %v2234_v20 = vld [vmem:[%s3108_s3 + $0x14] sm:$0x3] }
  0x70   :  { %v1361_v12 = vadd.f32 %v1360_v48, %v1359_v33  ;;  %v2867_v40 = vrot.slane %v1796_v38, %v2390_v21  ;;  %v1919_v35 = vrot.slane %v2252_v17, %v2390_v21  ;;  %v2871_v54 = vrot.slane %v1912_v49, %v2390_v21 }
  0x71   :  { %v2316_v22 = vpop.eup %2315  ;;  %v2875_v44 = vrot.slane %v1455_v56, %v2405_v29  ;;  %v1470_v18 = vrot.slane %v2843_v57, %v2405_v29  ;;  %v2880_v59 = vrot.slane %v1571_v1, %v2405_v29  ;;  %v1586_v55 = vrot.slane %v2847_v34, %v2405_v29 }
  0x72   :  { %2233 = vst.msk [vmem:[%s3109_s4 + $0x12] sm:$0x3] %vm315_vm0, %v1361_v12  ;;  %v148_v42 = vmul.f32 %v2316_v22, %v2399_v26  ;;  %v2028_v8 = vcombine.high %v2860_v2, %v2860_v2  ;;  %v2196_v45 = vmul.f32 -1.442695, %v35_v13  ;;  %v2889_v23 = vrot.slane %v1687_v27, %v2405_v29 }
  0x73   :  { %v1702_v32 = vrot.slane %v2855_v53, %v2405_v29  ;;  %v2894_v62 = vrot.slane %v1803_v43, %v2405_v29  ;;  %v1818_v51 = vrot.slane %v2867_v40, %v2405_v29  ;;  %v2899_v7 = vrot.slane %v1919_v35, %v2405_v29 }
  0x74   :  { %v2318_v19 = vpop.eup %2317  ;;  %v165_v41 = vadd.f32 %v148_v42, %v2382_v16  ;;  %v1934_v60 = vrot.slane %v2871_v54, %v2405_v29  ;;  %v2035_v39 = vrot.slane %v2860_v2, %v2390_v21  ;;  %v2909_v0 = vrot.slane %v2028_v8, %v2390_v21 }
  0x75   :  { %v149_v9 = vmul.f32 %v2318_v19, %v2399_v26  ;;  %v2320_v63 = vpop.eup %2319  ;;  %2327 = vpow2.f32 %v2196_v45  ;;  %v2238_v45 = vld [vmem:[%s3108_s3 + $0x16] sm:$0x3] }
  0x76   :  { %v182_v3 = vadd.f32 1e-06, %v165_v41  ;;  %v199_v36 = vsub.f32 1.0, %v165_v41  ;;  %v150_v6 = vmul.f32 %v2320_v63, %v2399_v26  ;;  %v2050_v54 = vrot.slane %v2909_v0, %v2405_v29 }
  0x77   :  { %v2322_v58 = vpop.eup %2321  ;;  %v166_v52 = vadd.f32 %v149_v9, %v2382_v16 }
  0x78   :  { %v2324_v24 = vpop.eup %2323  ;;  %v151_v10 = vmul.f32 %v2322_v58, %v2399_v26  ;;  %v1371_v5 = vrot.slane %v182_v3, %v2390_v21  ;;  %v1406_v30 = vrot.slane %v199_v36, %v2390_v21  ;;  %v167_v61 = vadd.f32 %v150_v6, %v2382_v16 }
  0x79   :  { %v2326_v25 = vpop.eup %2325  ;;  %v183_v47 = vadd.f32 1e-06, %v166_v52  ;;  %v200_v37 = vsub.f32 1.0, %v166_v52  ;;  %v2918_v28 = vmul.f32 %v2324_v24, %v2399_v26 }
  0x7a   :  { %v2915_v4 = vadd.f32 %v151_v10, %v2382_v16  ;;  %v2921_v17 = vmul.f32 %v2326_v25, %v2399_v26  ;;  %v1372_v50 = vcombine.high %v1371_v5, %v1371_v5  ;;  %v1379_v31 = vrot.slane %v1371_v5, %v2390_v21 }
  0x7b   :  { %v1407_v14 = vcombine.high %v1406_v30, %v1406_v30  ;;  %v1414_v15 = vrot.slane %v1406_v30, %v2390_v21  ;;  %v1487_v33 = vrot.slane %v183_v47, %v2390_v21  ;;  %v1522_v16 = vrot.slane %v200_v37, %v2390_v21 }
  0x7c   :  { %v184_v48 = vadd.f32 1e-06, %v167_v61  ;;  %v201_v38 = vsub.f32 1.0, %v167_v61  ;;  %v1386_v49 = vrot.slane %v1372_v50, %v2390_v21  ;;  %v1390_v12 = vrot.slane %v1379_v31, %v2405_v29 }
  0x7d   :  { %v1421_v56 = vrot.slane %v1407_v14, %v2390_v21  ;;  %v1427_v1 = vrot.slane %v1414_v15, %v2405_v29  ;;  %v1488_v27 = vcombine.high %v1487_v33, %v1487_v33  ;;  %v1495_v13 = vrot.slane %v1487_v33, %v2390_v21 }
  0x7e   :  { %v1523_v22 = vcombine.high %v1522_v16, %v1522_v16  ;;  %v1530_v43 = vrot.slane %v1522_v16, %v2390_v21  ;;  %v1394_v35 = vrot.slane %v1386_v49, %v2405_v29  ;;  %v1397_v42 = vmul.f32 %v1390_v12, %v2819_v11  ;;  %v2242_v49 = vld [vmem:[%s3108_s3 + $0x18] sm:$0x3] }
  0x7f   :  { %v1431_v19 = vrot.slane %v1421_v56, %v2405_v29  ;;  %v1434_v8 = vmul.f32 %v2234_v20, %v1427_v1  ;;  %v1502_v41 = vrot.slane %v1488_v27, %v2390_v21  ;;  %v1506_v9 = vrot.slane %v1495_v13, %v2405_v29 }
  0x80   :  { %v1537_v63 = vrot.slane %v1523_v22, %v2390_v21  ;;  %v1543_v58 = vrot.slane %v1530_v43, %v2405_v29  ;;  %v1398_v3 = vmul.f32 %v1394_v35, %v2821_v46  ;;  %v1603_v11 = vrot.slane %v184_v48, %v2390_v21 }
  0x81   :  { %v1435_v36 = vmul.f32 %v2234_v20, %v1431_v19  ;;  %v1436_v52 = vadd.f32 %v1434_v8, %v1397_v42  ;;  %v1510_v6 = vrot.slane %v1502_v41, %v2405_v29  ;;  %v1638_v25 = vrot.slane %v201_v38, %v2390_v21 }
  0x82   :  { %v1547_v24 = vrot.slane %v1537_v63, %v2405_v29  ;;  %v1550_v10 = vmul.f32 %v2238_v45, %v1543_v58  ;;  %v1604_v37 = vcombine.high %v1603_v11, %v1603_v11  ;;  %v1611_v50 = vrot.slane %v1603_v11, %v2390_v21  ;;  %v2954_v14 = vpop.eup %2327 }
  0x83   :  { %v1437_v5 = vadd.f32 %v1435_v36, %v1398_v3  ;;  %v1473_v30 = vmul.f32 %v2875_v44, %v1436_v52  ;;  %v1513_v47 = vmul.f32 %v1506_v9, %v1436_v52  ;;  %v1639_v46 = vcombine.high %v1638_v25, %v1638_v25  ;;  %v2985_v9 = vld [vmem:[%s3107_s0] sm:$0x3] }
  0x84   :  { %v1551_v61 = vmul.f32 %v2238_v45, %v1547_v24  ;;  %v1646_v31 = vrot.slane %v1638_v25, %v2390_v21  ;;  %v1618_v44 = vrot.slane %v1604_v37, %v2390_v21  ;;  %v1622_v48 = vrot.slane %v1611_v50, %v2405_v29 }
  0x85   :  { %v1474_v15 = vmul.f32 %v1470_v18, %v1437_v5  ;;  %v1475_v20 = vsel %vm315_vm0, %v1473_v30, 0.0  ;;  %v1514_v33 = vmul.f32 %v1510_v6, %v1437_v5  ;;  %v1552_v16 = vadd.f32 %v1550_v10, %v1513_v47 }
  0x86   :  { %v1653_v38 = vrot.slane %v1639_v46, %v2390_v21  ;;  %v1659_v12 = vrot.slane %v1646_v31, %v2405_v29  ;;  %v185_v1 = vadd.f32 1e-06, %v2915_v4  ;;  %v1626_v13 = vrot.slane %v1618_v44, %v2405_v29 }
  0x87   :  { %v1476_v56 = vsel %vm315_vm0, %v1474_v15, 0.0  ;;  %v1553_v57 = vadd.f32 %v1551_v61, %v1514_v33  ;;  %v1589_v18 = vmul.f32 %v2880_v59, %v1552_v16  ;;  %v1629_v22 = vmul.f32 %v1622_v48, %v1552_v16 }
  0x88   :  { %v1477_v27 = vadd.f32 %v1476_v56, %v1475_v20  ;;  %v1663_v43 = vrot.slane %v1653_v38, %v2405_v29  ;;  %v1666_v19 = vmul.f32 %v2242_v49, %v1659_v12  ;;  %v202_v8 = vsub.f32 1.0, %v2915_v4 }
  0x89   :  { %v1590_v35 = vmul.f32 %v1586_v55, %v1553_v57  ;;  %v1591_v42 = vsel %vm315_vm0, %v1589_v18, 0.0  ;;  %v1630_v59 = vmul.f32 %v1626_v13, %v1553_v57  ;;  %v1719_v41 = vrot.slane %v185_v1, %v2390_v21  ;;  %v2250_v18 = vld [vmem:[%s3108_s3 + $0x1c] sm:$0x3] }
  0x8a   :  { %2237 = vst.msk [vmem:[%s3109_s4 + $0x14] sm:$0x3] %vm315_vm0, %v1477_v27  ;;  %v1667_v45 = vmul.f32 %v2242_v49, %v1663_v43  ;;  %v169_v34 = vadd.f32 %v2985_v9, %v2918_v28  ;;  %v1668_v4 = vadd.f32 %v1666_v19, %v1629_v22  ;;  %v1754_v63 = vrot.slane %v202_v8, %v2390_v21 }
  0x8b   :  { %v1592_v55 = vsel %vm315_vm0, %v1590_v35, 0.0  ;;  %v170_v58 = vadd.f32 %v2985_v9, %v2921_v17  ;;  %v1720_v52 = vcombine.high %v1719_v41, %v1719_v41  ;;  %v1727_v11 = vrot.slane %v1719_v41, %v2390_v21 }
  0x8c   :  { %v1593_v3 = vadd.f32 %v1592_v55, %v1591_v42  ;;  %v1669_v36 = vadd.f32 %v1667_v45, %v1630_v59  ;;  %v1705_v6 = vmul.f32 %v2889_v23, %v1668_v4  ;;  %v1755_v24 = vcombine.high %v1754_v63, %v1754_v63  ;;  %v2246_v23 = vld [vmem:[%s3108_s3 + $0x1a] sm:$0x3] }
  0x8d   :  { %v1762_v10 = vrot.slane %v1754_v63, %v2390_v21  ;;  %v186_v25 = vadd.f32 1e-06, %v169_v34  ;;  %v1734_v17 = vrot.slane %v1720_v52, %v2390_v21  ;;  %v1738_v5 = vrot.slane %v1727_v11, %v2405_v29 }
  0x8e   :  { %2241 = vst.msk [vmem:[%s3109_s4 + $0x16] sm:$0x3] %vm315_vm0, %v1593_v3  ;;  %v1706_v28 = vmul.f32 %v1702_v32, %v1669_v36  ;;  %v203_v30 = vsub.f32 1.0, %v169_v34  ;;  %v1707_v47 = vsel %vm315_vm0, %v1705_v6, 0.0  ;;  %v1769_v37 = vrot.slane %v1755_v24, %v2390_v21 }
  0x8f   :  { %v1775_v61 = vrot.slane %v1762_v10, %v2405_v29  ;;  %v1835_v50 = vrot.slane %v186_v25, %v2390_v21  ;;  %v1742_v32 = vrot.slane %v1734_v17, %v2405_v29  ;;  %v1745_v46 = vmul.f32 %v1738_v5, %v1668_v4  ;;  %v2254_v17 = vld [vmem:[%s3108_s3 + $0x1e] sm:$0x3] }
  0x90   :  { %v1708_v53 = vsel %vm315_vm0, %v1706_v28, 0.0  ;;  %v1870_v31 = vrot.slane %v203_v30, %v2390_v21  ;;  %v1779_v20 = vrot.slane %v1769_v37, %v2405_v29  ;;  %v187_v1 = vadd.f32 1e-06, %v170_v58 }
  0x91   :  { %v1709_v15 = vadd.f32 %v1708_v53, %v1707_v47  ;;  %v1782_v33 = vmul.f32 %v2246_v23, %v1775_v61  ;;  %v1836_v16 = vcombine.high %v1835_v50, %v1835_v50  ;;  %v1746_v44 = vmul.f32 %v1742_v32, %v1669_v36 }
  0x92   :  { %v1843_v48 = vrot.slane %v1835_v50, %v2390_v21  ;;  %v1871_v38 = vcombine.high %v1870_v31, %v1870_v31  ;;  %v1878_v49 = vrot.slane %v1870_v31, %v2390_v21  ;;  %v1783_v12 = vmul.f32 %v2246_v23, %v1779_v20 }
  0x93   :  { %2245 = vst.msk [vmem:[%s3109_s4 + $0x18] sm:$0x3] %vm315_vm0, %v1709_v15  ;;  %v1784_v56 = vadd.f32 %v1782_v33, %v1745_v46  ;;  %v1850_v57 = vrot.slane %v1836_v16, %v2390_v21  ;;  %v204_v43 = vsub.f32 1.0, %v170_v58  ;;  %v1951_v8 = vrot.slane %v187_v1, %v2390_v21 }
  0x94   :  { %v1854_v27 = vrot.slane %v1843_v48, %v2405_v29  ;;  %v1885_v13 = vrot.slane %v1871_v38, %v2390_v21  ;;  %v1891_v22 = vrot.slane %v1878_v49, %v2405_v29  ;;  %v1785_v35 = vadd.f32 %v1783_v12, %v1746_v44  ;;  %v2260_v38 = vld.sshfl [vmem:[%s3106_s1 + $0x20] sm:$0x11 pattern:$0x75316420] }
  0x95   :  { %v1821_v42 = vmul.f32 %v2894_v62, %v1784_v56  ;;  %v1858_v19 = vrot.slane %v1850_v57, %v2405_v29  ;;  %v1986_v34 = vrot.slane %v204_v43, %v2390_v21  ;;  %v1952_v58 = vcombine.high %v1951_v8, %v1951_v8 }
  0x96   :  { %v1861_v59 = vmul.f32 %v1854_v27, %v1784_v56  ;;  %v1895_v45 = vrot.slane %v1885_v13, %v2405_v29  ;;  %v1898_v41 = vmul.f32 %v2250_v18, %v1891_v22  ;;  %v1822_v55 = vmul.f32 %v1818_v51, %v1785_v35 }
  0x97   :  { %v1823_v4 = vsel %vm315_vm0, %v1821_v42, 0.0  ;;  %v1862_v63 = vmul.f32 %v1858_v19, %v1785_v35  ;;  %v1959_v36 = vrot.slane %v1951_v8, %v2390_v21  ;;  %v1987_v52 = vcombine.high %v1986_v34, %v1986_v34 }
  0x98   :  { %v1899_v3 = vmul.f32 %v2250_v18, %v1895_v45  ;;  %v1900_v62 = vadd.f32 %v1898_v41, %v1861_v59  ;;  %v1824_v11 = vsel %vm315_vm0, %v1822_v55, 0.0  ;;  %v1966_v6 = vrot.slane %v1952_v58, %v2390_v21 }
  0x99   :  { %v1994_v24 = vrot.slane %v1986_v34, %v2390_v21  ;;  %v103_v10 = vadd.f32 1.0, %v2954_v14  ;;  %v1825_v25 = vadd.f32 %v1824_v11, %v1823_v4  ;;  %v1970_v28 = vrot.slane %v1959_v36, %v2405_v29 }
  0x9a   :  { %v1901_v40 = vadd.f32 %v1899_v3, %v1862_v63  ;;  %v1937_v51 = vmul.f32 %v2899_v7, %v1900_v62  ;;  %v1974_v5 = vrot.slane %v1966_v6, %v2405_v29  ;;  %v2001_v23 = vrot.slane %v1987_v52, %v2390_v21 }
  0x9b   :  { %v2007_v30 = vrot.slane %v1994_v24, %v2405_v29  ;;  %2329 = vrcp.f32 %v103_v10  ;;  %2249 = vst.msk [vmem:[%s3109_s4 + $0x1a] sm:$0x3] %vm315_vm0, %v1825_v25  ;;  %v1977_v47 = vmul.f32 %v1970_v28, %v1900_v62  ;;  %v2046_v53 = vrot.slane %v2035_v39, %v2405_v29 }
  0x9c   :  { %v1938_v7 = vmul.f32 %v1934_v60, %v1901_v40  ;;  %v1939_v14 = vsel %vm315_vm0, %v1937_v51, 0.0  ;;  %v1978_v37 = vmul.f32 %v1974_v5, %v1901_v40  ;;  %v2011_v61 = vrot.slane %v2001_v23, %v2405_v29 }
  0x9d   :  { %v2014_v50 = vmul.f32 %v2254_v17, %v2007_v30  ;;  %v2144_v56 = vcombine.high %v2260_v38, %v2260_v38  ;;  %v2151_v1 = vrot.slane %v2260_v38, %v2390_v21 }
  0x9e   :  { %v1940_v32 = vsel %vm315_vm0, %v1938_v7, 0.0  ;;  %v2015_v31 = vmul.f32 %v2254_v17, %v2011_v61 }
  0x9f   :  { %v1941_v46 = vadd.f32 %v1940_v32, %v1939_v14  ;;  %v2016_v15 = vadd.f32 %v2014_v50, %v1977_v47  ;;  %v2158_v43 = vrot.slane %v2144_v56, %v2390_v21  ;;  %v2162_v59 = vrot.slane %v2151_v1, %v2405_v29 }
  0xa0   :  { %v2017_v60 = vadd.f32 %v2015_v31, %v1978_v37 }
  0xa1   :  { %2253 = vst.msk [vmem:[%s3109_s4 + $0x1c] sm:$0x3] %vm315_vm0, %v1941_v46  ;;  %v2053_v20 = vmul.f32 %v2046_v53, %v2016_v15  ;;  %v2166_v3 = vrot.slane %v2158_v43, %v2405_v29 }
  0xa2   :  { %v2054_v33 = vmul.f32 %v2050_v54, %v2017_v60 }
  0xa3   :  { %v2055_v16 = vsel %vm315_vm0, %v2053_v20, 0.0 }
  0xa4   :  { %v2056_v2 = vsel %vm315_vm0, %v2054_v33, 0.0 }
  0xa5   :  { %v2057_v39 = vadd.f32 %v2056_v2, %v2055_v16 }
  0xa7   :  { %2257 = vst.msk [vmem:[%s3109_s4 + $0x1e] sm:$0x3] %vm315_vm0, %v2057_v39 }
  0xa8   :  { %v2330_v44 = vpop.eup %2329 }
  0xa9   :  { %v154_v0 = vmul.f32 %v2330_v44, %v2399_v26 }
  0xab   :  { %v171_v48 = vadd.f32 %v2985_v9, %v154_v0  ;;  %v2258_v9 = vld [vmem:[%s3108_s3 + $0x20] sm:$0x3] }
  0xad   :  { %v188_v49 = vadd.f32 1e-06, %v171_v48  ;;  %v205_v12 = vsub.f32 1.0, %v171_v48 }
  0xaf   :  { %v2067_v57 = vrot.slane %v188_v49, %v2390_v21  ;;  %v2102_v18 = vrot.slane %v205_v12, %v2390_v21 }
  0xb1   :  { %v2068_v27 = vcombine.high %v2067_v57, %v2067_v57  ;;  %v2075_v13 = vrot.slane %v2067_v57, %v2390_v21  ;;  %v2103_v22 = vcombine.high %v2102_v18, %v2102_v18  ;;  %v2110_v26 = vrot.slane %v2102_v18, %v2390_v21 }
  0xb3   :  { %v2082_v35 = vrot.slane %v2068_v27, %v2390_v21  ;;  %v2086_v42 = vrot.slane %v2075_v13, %v2405_v29  ;;  %v2117_v19 = vrot.slane %v2103_v22, %v2390_v21  ;;  %v2123_v8 = vrot.slane %v2110_v26, %v2405_v29 }
  0xb5   :  { %v2090_v45 = vrot.slane %v2082_v35, %v2405_v29  ;;  %v2093_v41 = vmul.f32 %v2086_v42, %v2016_v15  ;;  %v2127_v34 = vrot.slane %v2117_v19, %v2405_v29  ;;  %v2130_v55 = vmul.f32 %v2258_v9, %v2123_v8 }
  0xb7   :  { %v2094_v4 = vmul.f32 %v2090_v45, %v2017_v60  ;;  %v2131_v63 = vmul.f32 %v2258_v9, %v2127_v34  ;;  %v2132_v58 = vadd.f32 %v2130_v55, %v2093_v41 }
  0xb9   :  { %v2133_v62 = vadd.f32 %v2131_v63, %v2094_v4  ;;  %v2169_v36 = vmul.f32 %v2162_v59, %v2132_v58 }
  0xbb   :  { %v2170_v52 = vmul.f32 %v2166_v3, %v2133_v62  ;;  %v2171_v21 = vsel %vm315_vm0, %v2169_v36, 0.0 }
  0xbd   :  { %v2172_v11 = vsel %vm315_vm0, %v2170_v52, 0.0 }
  0xbe   :  { %v2173_v6 = vadd.f32 %v2172_v11, %v2171_v21 }
  0xc0   :  { %2261 = vst.msk [vmem:[%s3109_s4 + $0x20] sm:$0x3] %vm315_vm0, %v2173_v6 }

</bundles_post_ra>
